<compile_context>
chip_gen: v7x
topology: tpu7x:2x2x1
jax: 0.10.0
libtpu: 0.0.40
codegen_flags: <defaults>
</compile_context>

<pallas_src>
import jax
import jax.numpy as jnp
from jax import lax
from jax.experimental import pallas as pl
from jax.experimental.pallas import tpu as pltpu


def _round_up(n, m):
    return ((n + m - 1) // m) * m


# ------------------------------------------------------------------ kernel

def _encoder_gru_kernel(
        idx_ref,                       # (1, T*bb, 1) int32  per-tile, time-major token ids
        len_ref,                       # (bb, 1)      int32  sequence lengths
        vc_ref, tif_ref,               # (bb, 6*img), (bb, img)  f32
        emb_tbl_ref,                   # (Vp, Ep)     bf16
        w_vc_ref, b_vc_ref, w_sep_ref, b_sep_ref,
        w_hid_a_ref, w_hid_b_ref, b_hid_ref,          # MLP (f32, one-shot)
        w_all_ref, b_all_ref,          # (Ep, 6Hp) bf16, (1, 6Hp) f32
        whf_ref, whb_ref,              # (Hp, 3Hp) bf16
        bhn_f_ref, bhn_b_ref,          # (1, 3Hp)  f32
        out_ref,                       # (T, bb, 2Hp) f32: fwd lanes 0:Hp, bwd Hp:2Hp
        hid_ref,                       # (2, bb, Hp)  f32
        gi_f_scr, gi_b_scr):           # (T*bb, 3Hp)  f32 each
    T, bb, Hp2 = out_ref.shape
    Hp = Hp2 // 2
    H3 = 3 * Hp
    f32 = jnp.float32
    bf16 = jnp.bfloat16

    # ---- fused visual-context MLP -> initial hidden state (dropout = id) ----
    vch = jnp.maximum(
        jnp.dot(vc_ref[...], w_vc_ref[...], preferred_element_type=f32)
        + b_vc_ref[...], 0.0)
    tih = jnp.maximum(
        jnp.dot(tif_ref[...], w_sep_ref[...], preferred_element_type=f32)
        + b_sep_ref[...], 0.0)
    h0 = jnp.maximum(
        jnp.dot(vch, w_hid_a_ref[...], preferred_element_type=f32)
        + jnp.dot(tih, w_hid_b_ref[...], preferred_element_type=f32)
        + b_hid_ref[...], 0.0)

    # ---- in-kernel embedding gather: one-hot (bf16) x table (bf16) on MXU ---
    Vp = emb_tbl_ref.shape[0]
    TB = T * bb
    ids = idx_ref[0]                                         # (T*bb, 1) int32
    onehot = jnp.where(
        lax.broadcasted_iota(jnp.int32, (TB, Vp), 1) == ids, 1.0, 0.0
    ).astype(bf16)
    emb = jnp.dot(onehot, emb_tbl_ref[...],
                  preferred_element_type=f32).astype(bf16)   # (T*bb, Ep)

    # ---- hoisted input-to-hidden projection, one matmul per direction;
    #      input biases + r/z hidden biases already folded into b_all ---------
    gi_f_scr[...] = (
        jnp.dot(emb, w_all_ref[:, 0:H3], preferred_element_type=f32)
        + b_all_ref[:, 0:H3])
    gi_b_scr[...] = (
        jnp.dot(emb, w_all_ref[:, H3:2 * H3], preferred_element_type=f32)
        + b_all_ref[:, H3:2 * H3])

    lengths = len_ref[...]             # (bb, 1) int32
    bhn_f = bhn_f_ref[...]             # only the n-gate hidden bias remains
    bhn_b = bhn_b_ref[...]

    def sigmoid(x):
        # one EUP tanh instead of exp + reciprocal on the serial path
        return 0.5 * jnp.tanh(0.5 * x) + 0.5

    def gru_cell(gi_t, h, wh_ref, bhn):
        gh = jnp.dot(h.astype(bf16), wh_ref[...],
                     preferred_element_type=f32) + bhn
        r = sigmoid(gi_t[:, 0:Hp] + gh[:, 0:Hp])
        z = sigmoid(gi_t[:, Hp:2 * Hp] + gh[:, Hp:2 * Hp])
        n = jnp.tanh(gi_t[:, 2 * Hp:3 * Hp] + r * gh[:, 2 * Hp:3 * Hp])
        return (1.0 - z) * n + z * h

    # ---- merged forward/backward recurrence (2 independent chains / iter) ---
    def body(i, carry):
        h_f, h_b = carry
        tf = i
        tb = T - 1 - i
        row_f = pl.multiple_of(tf * bb, 8)
        row_b = pl.multiple_of(tb * bb, 8)
        gi_f = gi_f_scr[pl.ds(row_f, bb), :]                 # (bb, 3Hp)
        gi_b = gi_b_scr[pl.ds(row_b, bb), :]
        hf_new = gru_cell(gi_f, h_f, whf_ref, bhn_f)
        hb_new = gru_cell(gi_b, h_b, whb_ref, bhn_b)
        valid_f = lengths > tf                               # (bb, 1) bool
        valid_b = lengths > tb
        # packed-sequence semantics: pads write 0, hidden frozen past length
        out_ref[tf, :, 0:Hp] = jnp.where(valid_f, hf_new, 0.0)
        out_ref[tb, :, Hp:2 * Hp] = jnp.where(valid_b, hb_new, 0.0)
        return (jnp.where(valid_f, hf_new, h_f),
                jnp.where(valid_b, hb_new, h_b))

    h_f, h_b = lax.fori_loop(0, T, body, (h0, h0),
                             unroll=(T if T <= 8 else 4))
    hid_ref[0] = h_f
    hid_ref[1] = h_b


# ------------------------------------------------------------------ params

def init_params(key, vocab_size, embedding_dim, hidden_dim, img_dim):
    ks = jax.random.split(key, 12)
    u = lambda k, shape, b: jax.random.uniform(k, shape, jnp.float32, -b, b)
    kg = 1.0 / float(hidden_dim) ** 0.5
    return {
        # embedding.weight.data.uniform_(-0.1, 0.1)
        "embedding": u(ks[0], (vocab_size, embedding_dim), 0.1),
        # linear layers: weight uniform(-0.1, 0.1), bias 0 (stored transposed)
        "w_vc": u(ks[1], (img_dim * 6, hidden_dim), 0.1),
        "b_vc": jnp.zeros((1, hidden_dim), jnp.float32),
        "w_sep": u(ks[2], (img_dim, hidden_dim), 0.1),
        "b_sep": jnp.zeros((1, hidden_dim), jnp.float32),
        "w_hid": u(ks[3], (hidden_dim * 2, hidden_dim), 0.1),
        "b_hid": jnp.zeros((1, hidden_dim), jnp.float32),
        # bidirectional GRU, PyTorch default init U(-1/sqrt(H), 1/sqrt(H)),
        # stored transposed: ih (E, 3H), hh (H, 3H); gate order r, z, n
        "wif": u(ks[4], (embedding_dim, 3 * hidden_dim), kg),
        "whf": u(ks[5], (hidden_dim, 3 * hidden_dim), kg),
        "bif": u(ks[6], (1, 3 * hidden_dim), kg),
        "bhf": u(ks[7], (1, 3 * hidden_dim), kg),
        "wib": u(ks[8], (embedding_dim, 3 * hidden_dim), kg),
        "whb": u(ks[9], (hidden_dim, 3 * hidden_dim), kg),
        "bib": u(ks[10], (1, 3 * hidden_dim), kg),
        "bhb": u(ks[11], (1, 3 * hidden_dim), kg),
    }


def pack_params(params):
    """One-time repack: lane-pad to 128, fold biases, bf16 MXU operands."""
    H = params["w_hid"].shape[1]
    E = params["embedding"].shape[1]
    V = params["embedding"].shape[0]
    Hp = _round_up(H, 128)
    Ep = _round_up(E, 128)
    Vp = _round_up(V, 128)          # lane-dense one-hot gather in-kernel
    bf16 = jnp.bfloat16

    def pad2(x, rows, cols):
        return jnp.zeros((rows, cols), x.dtype).at[:x.shape[0],
                                                   :x.shape[1]].set(x)

    def pad_gates(w, rows):          # (K, 3H) -> (rows, 3Hp), gates aligned
        out = jnp.zeros((rows, 3 * Hp), w.dtype)
        for g in range(3):
            out = out.at[:w.shape[0],
                         g * Hp:g * Hp + H].set(w[:, g * H:(g + 1) * H])
        return out

    def gi_bias(bi, bh):             # fold b_ih (all) + b_hh (r, z only)
        folded = jnp.concatenate(
            [bi[:, :2 * H] + bh[:, :2 * H], bi[:, 2 * H:]], axis=1)
        return pad_gates(folded, 1)

    def hn_bias(bh):                 # n-gate hidden bias (scaled by r)
        out = jnp.zeros((1, 3 * Hp), bh.dtype)
        return out.at[:, 2 * Hp:2 * Hp + H].set(bh[:, 2 * H:])

    return {
        # bf16 MXU operands (accumulation stays f32 in-kernel)
        "embedding": pad2(params["embedding"], Vp, Ep).astype(bf16),
        "w_all": jnp.concatenate([pad_gates(params["wif"], Ep),
                                  pad_gates(params["wib"], Ep)],
                                 axis=1).astype(bf16),
        "whf": pad_gates(params["whf"], Hp).astype(bf16),
        "whb": pad_gates(params["whb"], Hp).astype(bf16),
        # biases (added post-accumulation) and the one-shot MLP stay f32
        "b_all": jnp.concatenate([gi_bias(params["bif"], params["bhf"]),
                                  gi_bias(params["bib"], params["bhb"])],
                                 axis=1),
        "bhn_f": hn_bias(params["bhf"]),
        "bhn_b": hn_bias(params["bhb"]),
        "w_vc": pad2(params["w_vc"], params["w_vc"].shape[0], Hp),
        "b_vc": pad2(params["b_vc"], 1, Hp),
        "w_sep": pad2(params["w_sep"], params["w_sep"].shape[0], Hp),
        "b_sep": pad2(params["b_sep"], 1, Hp),
        "w_hid_a": pad2(params["w_hid"][:H], Hp, Hp),
        "w_hid_b": pad2(params["w_hid"][H:], Hp, Hp),
        "b_hid": pad2(params["b_hid"], 1, Hp),
    }


# ------------------------------------------------------------------ wrapper

def encoder_gru_forward(packed, prev_utterance, prev_utt_lengths,
                        visual_context, target_image_feat, *,
                        hidden_dim, max_len=None):
    """Returns (output (B, T or max_len, 2H), hidden_state (2, B, H)).

    jit-compatible: no host sync on lengths; pass `max_len` statically for
    exact pad_packed_sequence cropping (padded positions are zero, matching
    PyTorch semantics when max(lengths) == T).
    """
    B, T = prev_utterance.shape
    H = hidden_dim
    Hp = packed["w_vc"].shape[1]
    Vp, Ep = packed["embedding"].shape
    BB = 8                                        # one sublane group per tile
    Bp = _round_up(max(B, 1), BB)
    nb = Bp // BB
    pad_b = Bp - B

    utt_p = jnp.pad(prev_utterance.astype(jnp.int32), ((0, pad_b), (0, 0)))
    len_p = jnp.pad(prev_utt_lengths.astype(jnp.int32),
                    (0, pad_b)).reshape(Bp, 1)
    vc_p = jnp.pad(visual_context.astype(jnp.float32), ((0, pad_b), (0, 0)))
    tif_p = jnp.pad(target_image_feat.astype(jnp.float32),
                    ((0, pad_b), (0, 0)))

    # Per-batch-tile, time-major token ids (index data only — the embedding
    # activation itself is gathered inside the kernel, no HBM round trip).
    idx = (utt_p.reshape(nb, BB, T).transpose(0, 2, 1)
           .reshape(nb, T * BB, 1))

    weight_keys = ("embedding", "w_vc", "b_vc", "w_sep", "b_sep",
                   "w_hid_a", "w_hid_b", "b_hid", "w_all", "b_all",
                   "whf", "whb", "bhn_f", "bhn_b")
    weights = [packed[k] for k in weight_keys]

    def _full_spec(x):
        nd = x.ndim
        return pl.BlockSpec(tuple(x.shape), lambda i: (0,) * nd)

    in_specs = ([pl.BlockSpec((1, T * BB, 1), lambda i: (i, 0, 0)),
                 pl.BlockSpec((BB, 1), lambda i: (i, 0)),
                 pl.BlockSpec((BB, vc_p.shape[1]), lambda i: (i, 0)),
                 pl.BlockSpec((BB, tif_p.shape[1]), lambda i: (i, 0))]
                + [_full_spec(w) for w in weights])

    out_shape = (jax.ShapeDtypeStruct((T, Bp, 2 * Hp), jnp.float32),
                 jax.ShapeDtypeStruct((2, Bp, Hp), jnp.float32))
    out_specs = (pl.BlockSpec((T, BB, 2 * Hp), lambda i: (0, i, 0)),
                 pl.BlockSpec((2, BB, Hp), lambda i: (0, i, 0)))

    # advisory cost model + explicit VMEM budget
    def _nbytes(x):
        return x.size * jnp.dtype(x.dtype).itemsize

    img6 = vc_p.shape[1]
    img = tif_p.shape[1]
    flops = int(2 * T * Bp * (Vp * Ep + Ep * 6 * Hp)          # gather + proj
                + 2 * T * Bp * Hp * 3 * Hp * 2                # recurrent dots
                + 2 * Bp * (img6 * Hp + img * Hp + 2 * Hp * Hp))
    transcendentals = int(6 * T * Bp * Hp)                    # 3 tanh/cell x 2
    in_bytes = int(sum(_nbytes(a) for a in [idx, len_p, vc_p, tif_p] + weights))
    out_bytes = int((T * Bp * 2 * Hp + 2 * Bp * Hp) * 4)
    scratch_bytes = int(2 * T * BB * 3 * Hp * 4)
    vmem_limit = int(min(64 * 2 ** 20,
                         max(4 * 2 ** 20,
                             4 * (in_bytes + out_bytes + scratch_bytes))))

    out, hid = pl.pallas_call(
        _encoder_gru_kernel,
        grid=(nb,),
        out_shape=out_shape,
        in_specs=in_specs,
        out_specs=out_specs,
        scratch_shapes=[pltpu.VMEM((T * BB, 3 * Hp), jnp.float32),
                        pltpu.VMEM((T * BB, 3 * Hp), jnp.float32)],
        compiler_params=pltpu.CompilerParams(
            dimension_semantics=("parallel",),    # v7x: 2 TCs split the batch
            vmem_limit_bytes=vmem_limit),
        cost_estimate=pl.CostEstimate(flops=flops,
                                      transcendentals=transcendentals,
                                      bytes_accessed=in_bytes + out_bytes),
    )(idx, len_p, vc_p, tif_p, *weights)

    # crop padding, fuse direction lanes -> (B, T, 2H) batch-first (tiny)
    output = jnp.concatenate([out[:, :B, :H], out[:, :B, Hp:Hp + H]], axis=-1)
    output = jnp.transpose(output, (1, 0, 2))                 # (B, T, 2H)
    hidden = hid[:, :B, :H]                                   # (2, B, H)
    if max_len is not None:
        output = output[:, :max_len]
    return output, hidden


# ------------------------------------------------------------------ reference

def _reference_forward(params, prev_utterance, prev_utt_lengths,
                       visual_context, target_image_feat):
    H = params["w_hid"].shape[1]
    vch = jnp.maximum(visual_context @ params["w_vc"] + params["b_vc"], 0.0)
    tih = jnp.maximum(target_image_feat @ params["w_sep"]
                      + params["b_sep"], 0.0)
    vcc = jnp.maximum(jnp.concatenate([vch, tih], 1) @ params["w_hid"]
                      + params["b_hid"], 0.0)
    emb = params["embedding"][prev_utterance]            # (B, T, E)
    lengths = prev_utt_lengths.astype(jnp.int32)[:, None]

    def cell(x, h, wi, wh, bi, bh):
        gi = x @ wi + bi
        gh = h @ wh + bh
        r = jax.nn.sigmoid(gi[:, :H] + gh[:, :H])
        z = jax.nn.sigmoid(gi[:, H:2 * H] + gh[:, H:2 * H])
        n = jnp.tanh(gi[:, 2 * H:] + r * gh[:, 2 * H:])
        return (1.0 - z) * n + z * h

    def run(dirn, wi, wh, bi, bh):
        T = emb.shape[1]
        ts = range(T) if dirn == "f" else range(T - 1, -1, -1)
        h = vcc
        outs = [None] * T
        for t in ts:
            h_new = cell(emb[:, t], h, wi, wh, bi, bh)
            valid = (lengths > t).astype(jnp.float32)
            outs[t] = valid * h_new
            h = valid * h_new + (1.0 - valid) * h
        return jnp.stack(outs, 1), h

    of, hf = run("f", params["wif"], params["whf"],
                 params["bif"], params["bhf"])
    ob, hb = run("b", params["wib"], params["whb"],
                 params["bib"], params["bhb"])
    return jnp.concatenate([of, ob], -1), jnp.stack([hf, hb], 0)


# ------------------------------------------------------------------ main

if __name__ == "__main__":
    vocab_size, embedding_dim, hidden_dim, img_dim = 50, 32, 32, 16
    B, T = 2, 8

    key = jax.random.PRNGKey(0)
    kp, k1, k2, k3 = jax.random.split(key, 4)
    params = init_params(kp, vocab_size, embedding_dim, hidden_dim, img_dim)
    packed = pack_params(params)

    prev_utterance = jax.random.randint(k1, (B, T), 1, vocab_size, jnp.int32)
    prev_utt_lengths = jnp.array([T, 5], jnp.int32)
    # zero out tokens past each sequence's length (padding), like real data
    tmask = jnp.arange(T)[None, :] < prev_utt_lengths[:, None]
    prev_utterance = jnp.where(tmask, prev_utterance, 0)
    visual_context = jax.random.normal(k2, (B, img_dim * 6), jnp.float32)
    target_image_feat = jax.random.normal(k3, (B, img_dim), jnp.float32)

    fwd = jax.jit(encoder_gru_forward,
                  static_argnames=("hidden_dim", "max_len"))
    output, hidden_state = fwd(packed, prev_utterance, prev_utt_lengths,
                               visual_context, target_image_feat,
                               hidden_dim=hidden_dim)
    jax.block_until_ready((output, hidden_state))

    ref_out, ref_hid = _reference_forward(
        params, prev_utterance, prev_utt_lengths, visual_context,
        target_image_feat)

    assert output.shape == (B, T, 2 * hidden_dim)
    assert hidden_state.shape == (2, B, hidden_dim)
    # kernel uses bf16 MXU operands with f32 accumulation; reference is f32
    assert jnp.allclose(output, ref_out, atol=5e-2, rtol=5e-2)
    assert jnp.allclose(hidden_state, ref_hid, atol=5e-2, rtol=5e-2)

    print("KERNEL_OK")
</pallas_src>

<mosaic_0001>
module attributes {stable_mosaic.version = 11 : i64} {
  func.func @_encoder_gru_kernel(%arg0: i32, %arg1: memref<1x64x1xi32, #tpu.memory_space<vmem>>, %arg2: memref<8x1xi32, #tpu.memory_space<vmem>>, %arg3: memref<8x96xf32, #tpu.memory_space<vmem>>, %arg4: memref<8x16xf32, #tpu.memory_space<vmem>>, %arg5: memref<128x128xbf16, #tpu.memory_space<vmem>>, %arg6: memref<96x128xf32, #tpu.memory_space<vmem>>, %arg7: memref<1x128xf32, #tpu.memory_space<vmem>>, %arg8: memref<16x128xf32, #tpu.memory_space<vmem>>, %arg9: memref<1x128xf32, #tpu.memory_space<vmem>>, %arg10: memref<128x128xf32, #tpu.memory_space<vmem>>, %arg11: memref<128x128xf32, #tpu.memory_space<vmem>>, %arg12: memref<1x128xf32, #tpu.memory_space<vmem>>, %arg13: memref<128x768xbf16, #tpu.memory_space<vmem>>, %arg14: memref<1x768xf32, #tpu.memory_space<vmem>>, %arg15: memref<128x384xbf16, #tpu.memory_space<vmem>>, %arg16: memref<128x384xbf16, #tpu.memory_space<vmem>>, %arg17: memref<1x384xf32, #tpu.memory_space<vmem>>, %arg18: memref<1x384xf32, #tpu.memory_space<vmem>>, %arg19: memref<8x8x256xf32, #tpu.memory_space<vmem>>, %arg20: memref<2x8x128xf32, #tpu.memory_space<vmem>>, %arg21: memref<64x384xf32, #tpu.memory_space<vmem>>, %arg22: memref<64x384xf32, #tpu.memory_space<vmem>>) attributes {dimension_semantics = [#tpu.dimension_semantics<parallel>], iteration_bounds = array<i64: 1>, scalar_prefetch = 0 : i64, scratch_operands = 2 : i64, tpu.core_type = #tpu.core_type<tc>, window_params = [{transform_indices = @transform_0, window_bounds = array<i64: 1, 64, 1>}, {transform_indices = @transform_1, window_bounds = array<i64: 8, 1>}, {transform_indices = @transform_2, window_bounds = array<i64: 8, 96>}, {transform_indices = @transform_3, window_bounds = array<i64: 8, 16>}, {pipeline_mode = #tpu.pipeline_mode<synchronous>, transform_indices = @transform_4, window_bounds = array<i64: 128, 128>}, {pipeline_mode = #tpu.pipeline_mode<synchronous>, transform_indices = @transform_5, window_bounds = array<i64: 96, 128>}, {pipeline_mode = #tpu.pipeline_mode<synchronous>, transform_indices = @transform_6, window_bounds = array<i64: 1, 128>}, {pipeline_mode = #tpu.pipeline_mode<synchronous>, transform_indices = @transform_7, window_bounds = array<i64: 16, 128>}, {pipeline_mode = #tpu.pipeline_mode<synchronous>, transform_indices = @transform_8, window_bounds = array<i64: 1, 128>}, {pipeline_mode = #tpu.pipeline_mode<synchronous>, transform_indices = @transform_9, window_bounds = array<i64: 128, 128>}, {pipeline_mode = #tpu.pipeline_mode<synchronous>, transform_indices = @transform_10, window_bounds = array<i64: 128, 128>}, {pipeline_mode = #tpu.pipeline_mode<synchronous>, transform_indices = @transform_11, window_bounds = array<i64: 1, 128>}, {pipeline_mode = #tpu.pipeline_mode<synchronous>, transform_indices = @transform_12, window_bounds = array<i64: 128, 768>}, {pipeline_mode = #tpu.pipeline_mode<synchronous>, transform_indices = @transform_13, window_bounds = array<i64: 1, 768>}, {pipeline_mode = #tpu.pipeline_mode<synchronous>, transform_indices = @transform_14, window_bounds = array<i64: 128, 384>}, {pipeline_mode = #tpu.pipeline_mode<synchronous>, transform_indices = @transform_15, window_bounds = array<i64: 128, 384>}, {pipeline_mode = #tpu.pipeline_mode<synchronous>, transform_indices = @transform_16, window_bounds = array<i64: 1, 384>}, {pipeline_mode = #tpu.pipeline_mode<synchronous>, transform_indices = @transform_17, window_bounds = array<i64: 1, 384>}, {transform_indices = @transform_18, window_bounds = array<i64: 8, 8, 256>}, {transform_indices = @transform_19, window_bounds = array<i64: 2, 8, 128>}]} {
    %c0 = arith.constant 0 : index
    %c0_0 = arith.constant 0 : index
    %0 = vector.load %arg3[%c0, %c0_0] : memref<8x96xf32, #tpu.memory_space<vmem>>, vector<8x96xf32>
    %c0_1 = arith.constant 0 : index
    %c0_2 = arith.constant 0 : index
    %1 = vector.load %arg6[%c0_1, %c0_2] : memref<96x128xf32, #tpu.memory_space<vmem>>, vector<96x128xf32>
    %cst = arith.constant dense<0.000000e+00> : vector<8x128xf32>
    %2 = tpu.matmul %0, %1, %cst {dimension_numbers = #tpu.dot_dimension_numbers<[1], [0], [0], [1], [0, 0, 1, 1], [], []>} : vector<8x96xf32>, vector<96x128xf32>, vector<8x128xf32> -> vector<8x128xf32>
    %c0_3 = arith.constant 0 : index
    %c0_4 = arith.constant 0 : index
    %3 = vector.load %arg7[%c0_3, %c0_4] : memref<1x128xf32, #tpu.memory_space<vmem>>, vector<1x128xf32>
    %4 = vector.broadcast %3 : vector<1x128xf32> to vector<8x128xf32>
    %5 = arith.addf %2, %4 : vector<8x128xf32>
    %cst_5 = arith.constant 0.000000e+00 : f32
    %6 = vector.broadcast %cst_5 : f32 to vector<8x128xf32>
    %7 = arith.maximumf %5, %6 : vector<8x128xf32>
    %c0_6 = arith.constant 0 : index
    %c0_7 = arith.constant 0 : index
    %8 = vector.load %arg4[%c0_6, %c0_7] : memref<8x16xf32, #tpu.memory_space<vmem>>, vector<8x16xf32>
    %c0_8 = arith.constant 0 : index
    %c0_9 = arith.constant 0 : index
    %9 = vector.load %arg8[%c0_8, %c0_9] : memref<16x128xf32, #tpu.memory_space<vmem>>, vector<16x128xf32>
    %cst_10 = arith.constant dense<0.000000e+00> : vector<8x128xf32>
    %10 = tpu.matmul %8, %9, %cst_10 {dimension_numbers = #tpu.dot_dimension_numbers<[1], [0], [0], [1], [0, 0, 1, 1], [], []>} : vector<8x16xf32>, vector<16x128xf32>, vector<8x128xf32> -> vector<8x128xf32>
    %c0_11 = arith.constant 0 : index
    %c0_12 = arith.constant 0 : index
    %11 = vector.load %arg9[%c0_11, %c0_12] : memref<1x128xf32, #tpu.memory_space<vmem>>, vector<1x128xf32>
    %12 = vector.broadcast %11 : vector<1x128xf32> to vector<8x128xf32>
    %13 = arith.addf %10, %12 : vector<8x128xf32>
    %cst_13 = arith.constant 0.000000e+00 : f32
    %14 = vector.broadcast %cst_13 : f32 to vector<8x128xf32>
    %15 = arith.maximumf %13, %14 : vector<8x128xf32>
    %c0_14 = arith.constant 0 : index
    %c0_15 = arith.constant 0 : index
    %16 = vector.load %arg10[%c0_14, %c0_15] : memref<128x128xf32, #tpu.memory_space<vmem>>, vector<128x128xf32>
    %cst_16 = arith.constant dense<0.000000e+00> : vector<8x128xf32>
    %17 = tpu.matmul %7, %16, %cst_16 {dimension_numbers = #tpu.dot_dimension_numbers<[1], [0], [0], [1], [0, 0, 1, 1], [], []>} : vector<8x128xf32>, vector<128x128xf32>, vector<8x128xf32> -> vector<8x128xf32>
    %c0_17 = arith.constant 0 : index
    %c0_18 = arith.constant 0 : index
    %18 = vector.load %arg11[%c0_17, %c0_18] : memref<128x128xf32, #tpu.memory_space<vmem>>, vector<128x128xf32>
    %cst_19 = arith.constant dense<0.000000e+00> : vector<8x128xf32>
    %19 = tpu.matmul %15, %18, %cst_19 {dimension_numbers = #tpu.dot_dimension_numbers<[1], [0], [0], [1], [0, 0, 1, 1], [], []>} : vector<8x128xf32>, vector<128x128xf32>, vector<8x128xf32> -> vector<8x128xf32>
    %20 = arith.addf %17, %19 : vector<8x128xf32>
    %c0_20 = arith.constant 0 : index
    %c0_21 = arith.constant 0 : index
    %21 = vector.load %arg12[%c0_20, %c0_21] : memref<1x128xf32, #tpu.memory_space<vmem>>, vector<1x128xf32>
    %22 = vector.broadcast %21 : vector<1x128xf32> to vector<8x128xf32>
    %23 = arith.addf %20, %22 : vector<8x128xf32>
    %cst_22 = arith.constant 0.000000e+00 : f32
    %24 = vector.broadcast %cst_22 : f32 to vector<8x128xf32>
    %25 = arith.maximumf %23, %24 : vector<8x128xf32>
    %c0_23 = arith.constant 0 : index
    %c0_24 = arith.constant 0 : index
    %c0_25 = arith.constant 0 : index
    %26 = vector.load %arg1[%c0_23, %c0_24, %c0_25] : memref<1x64x1xi32, #tpu.memory_space<vmem>>, vector<1x64x1xi32>
    %27 = vector.shape_cast %26 : vector<1x64x1xi32> to vector<64x1xi32>
    %28 = tpu.iota {dimensions = array<i32: 1>} : vector<64x128xi32>
    %29 = vector.broadcast %27 : vector<64x1xi32> to vector<64x128xi32>
    %30 = arith.cmpi eq, %28, %29 : vector<64x128xi32>
    %cst_26 = arith.constant 1.000000e+00 : f32
    %cst_27 = arith.constant 0.000000e+00 : f32
    %31 = vector.broadcast %cst_26 : f32 to vector<64x128xf32>
    %32 = vector.broadcast %cst_27 : f32 to vector<64x128xf32>
    %33 = arith.select %30, %31, %32 : vector<64x128xi1>, vector<64x128xf32>
    %34 = arith.truncf %33 : vector<64x128xf32> to vector<64x128xbf16>
    %c0_28 = arith.constant 0 : index
    %c0_29 = arith.constant 0 : index
    %35 = vector.load %arg5[%c0_28, %c0_29] : memref<128x128xbf16, #tpu.memory_space<vmem>>, vector<128x128xbf16>
    %cst_30 = arith.constant dense<0.000000e+00> : vector<64x128xf32>
    %36 = tpu.matmul %34, %35, %cst_30 {dimension_numbers = #tpu.dot_dimension_numbers<[1], [0], [0], [1], [0, 0, 1, 1], [], []>} : vector<64x128xbf16>, vector<128x128xbf16>, vector<64x128xf32> -> vector<64x128xf32>
    %37 = arith.truncf %36 : vector<64x128xf32> to vector<64x128xbf16>
    %c0_31 = arith.constant 0 : index
    %c0_32 = arith.constant 0 : index
    %38 = vector.load %arg13[%c0_31, %c0_32] : memref<128x768xbf16, #tpu.memory_space<vmem>>, vector<128x384xbf16>
    %cst_33 = arith.constant dense<0.000000e+00> : vector<64x384xf32>
    %39 = tpu.matmul %37, %38, %cst_33 {dimension_numbers = #tpu.dot_dimension_numbers<[1], [0], [0], [1], [0, 0, 1, 1], [], []>} : vector<64x128xbf16>, vector<128x384xbf16>, vector<64x384xf32> -> vector<64x384xf32>
    %c0_34 = arith.constant 0 : index
    %c0_35 = arith.constant 0 : index
    %40 = vector.load %arg14[%c0_34, %c0_35] : memref<1x768xf32, #tpu.memory_space<vmem>>, vector<1x384xf32>
    %41 = vector.broadcast %40 : vector<1x384xf32> to vector<64x384xf32>
    %42 = arith.addf %39, %41 : vector<64x384xf32>
    %c0_36 = arith.constant 0 : index
    %c0_37 = arith.constant 0 : index
    %43 = vector.load %arg21[%c0_36, %c0_37] : memref<64x384xf32, #tpu.memory_space<vmem>>, vector<64x384xf32>
    tpu.vector_store %arg21[%c0_36, %c0_37], %42 {strides = array<i32>} : memref<64x384xf32, #tpu.memory_space<vmem>>, vector<64x384xf32>,
    %c0_38 = arith.constant 0 : index
    %c384 = arith.constant 384 : index
    %44 = vector.load %arg13[%c0_38, %c384] : memref<128x768xbf16, #tpu.memory_space<vmem>>, vector<128x384xbf16>
    %cst_39 = arith.constant dense<0.000000e+00> : vector<64x384xf32>
    %45 = tpu.matmul %37, %44, %cst_39 {dimension_numbers = #tpu.dot_dimension_numbers<[1], [0], [0], [1], [0, 0, 1, 1], [], []>} : vector<64x128xbf16>, vector<128x384xbf16>, vector<64x384xf32> -> vector<64x384xf32>
    %c0_40 = arith.constant 0 : index
    %c384_41 = arith.constant 384 : index
    %46 = vector.load %arg14[%c0_40, %c384_41] : memref<1x768xf32, #tpu.memory_space<vmem>>, vector<1x384xf32>
    %47 = vector.broadcast %46 : vector<1x384xf32> to vector<64x384xf32>
    %48 = arith.addf %45, %47 : vector<64x384xf32>
    %c0_42 = arith.constant 0 : index
    %c0_43 = arith.constant 0 : index
    %49 = vector.load %arg22[%c0_42, %c0_43] : memref<64x384xf32, #tpu.memory_space<vmem>>, vector<64x384xf32>
    tpu.vector_store %arg22[%c0_42, %c0_43], %48 {strides = array<i32>} : memref<64x384xf32, #tpu.memory_space<vmem>>, vector<64x384xf32>,
    %c0_44 = arith.constant 0 : index
    %c0_45 = arith.constant 0 : index
    %50 = vector.load %arg2[%c0_44, %c0_45] : memref<8x1xi32, #tpu.memory_space<vmem>>, vector<8x1xi32>
    %c0_46 = arith.constant 0 : index
    %c0_47 = arith.constant 0 : index
    %51 = vector.load %arg17[%c0_46, %c0_47] : memref<1x384xf32, #tpu.memory_space<vmem>>, vector<1x384xf32>
    %c0_48 = arith.constant 0 : index
    %c0_49 = arith.constant 0 : index
    %52 = vector.load %arg18[%c0_48, %c0_49] : memref<1x384xf32, #tpu.memory_space<vmem>>, vector<1x384xf32>
    %c0_i32 = arith.constant 0 : i32
    %c7_i32 = arith.constant 7 : i32
    %53 = arith.subi %c7_i32, %c0_i32 : i32
    %c8_i32 = arith.constant 8 : i32
    %54 = arith.muli %c0_i32, %c8_i32 : i32
    %55 = tpu.assume_multiple %54, 8 : i32
    %c8_i32_50 = arith.constant 8 : i32
    %56 = arith.muli %53, %c8_i32_50 : i32
    %57 = tpu.assume_multiple %56, 8 : i32
    %58 = arith.index_cast %55 : i32 to index
    %c0_51 = arith.constant 0 : index
    %59 = vector.load %arg21[%58, %c0_51] : memref<64x384xf32, #tpu.memory_space<vmem>>, vector<8x384xf32>
    %60 = arith.index_cast %57 : i32 to index
    %c0_52 = arith.constant 0 : index
    %61 = vector.load %arg22[%60, %c0_52] : memref<64x384xf32, #tpu.memory_space<vmem>>, vector<8x384xf32>
    %62 = arith.truncf %25 : vector<8x128xf32> to vector<8x128xbf16>
    %c0_53 = arith.constant 0 : index
    %c0_54 = arith.constant 0 : index
    %63 = vector.load %arg15[%c0_53, %c0_54] : memref<128x384xbf16, #tpu.memory_space<vmem>>, vector<128x384xbf16>
    %cst_55 = arith.constant dense<0.000000e+00> : vector<8x384xf32>
    %64 = tpu.matmul %62, %63, %cst_55 {dimension_numbers = #tpu.dot_dimension_numbers<[1], [0], [0], [1], [0, 0, 1, 1], [], []>} : vector<8x128xbf16>, vector<128x384xbf16>, vector<8x384xf32> -> vector<8x384xf32>
    %65 = vector.broadcast %51 : vector<1x384xf32> to vector<8x384xf32>
    %66 = arith.addf %64, %65 : vector<8x384xf32>
    %67 = vector.extract_strided_slice %59 {offsets = [0, 0], sizes = [8, 128], strides = [1, 1]} : vector<8x384xf32> to vector<8x128xf32>
    %68 = vector.extract_strided_slice %66 {offsets = [0, 0], sizes = [8, 128], strides = [1, 1]} : vector<8x384xf32> to vector<8x128xf32>
    %69 = arith.addf %67, %68 : vector<8x128xf32>
    %cst_56 = arith.constant 5.000000e-01 : f32
    %70 = vector.broadcast %cst_56 : f32 to vector<8x128xf32>
    %71 = arith.mulf %70, %69 : vector<8x128xf32>
    %72 = math.tanh %71 : vector<8x128xf32>
    %cst_57 = arith.constant 5.000000e-01 : f32
    %73 = vector.broadcast %cst_57 : f32 to vector<8x128xf32>
    %74 = arith.mulf %73, %72 : vector<8x128xf32>
    %cst_58 = arith.constant 5.000000e-01 : f32
    %75 = vector.broadcast %cst_58 : f32 to vector<8x128xf32>
    %76 = arith.addf %74, %75 : vector<8x128xf32>
    %77 = vector.extract_strided_slice %59 {offsets = [0, 128], sizes = [8, 128], strides = [1, 1]} : vector<8x384xf32> to vector<8x128xf32>
    %78 = vector.extract_strided_slice %66 {offsets = [0, 128], sizes = [8, 128], strides = [1, 1]} : vector<8x384xf32> to vector<8x128xf32>
    %79 = arith.addf %77, %78 : vector<8x128xf32>
    %cst_59 = arith.constant 5.000000e-01 : f32
    %80 = vector.broadcast %cst_59 : f32 to vector<8x128xf32>
    %81 = arith.mulf %80, %79 : vector<8x128xf32>
    %82 = math.tanh %81 : vector<8x128xf32>
    %cst_60 = arith.constant 5.000000e-01 : f32
    %83 = vector.broadcast %cst_60 : f32 to vector<8x128xf32>
    %84 = arith.mulf %83, %82 : vector<8x128xf32>
    %cst_61 = arith.constant 5.000000e-01 : f32
    %85 = vector.broadcast %cst_61 : f32 to vector<8x128xf32>
    %86 = arith.addf %84, %85 : vector<8x128xf32>
    %87 = vector.extract_strided_slice %59 {offsets = [0, 256], sizes = [8, 128], strides = [1, 1]} : vector<8x384xf32> to vector<8x128xf32>
    %88 = vector.extract_strided_slice %66 {offsets = [0, 256], sizes = [8, 128], strides = [1, 1]} : vector<8x384xf32> to vector<8x128xf32>
    %89 = arith.mulf %76, %88 : vector<8x128xf32>
    %90 = arith.addf %87, %89 : vector<8x128xf32>
    %91 = math.tanh %90 : vector<8x128xf32>
    %cst_62 = arith.constant 1.000000e+00 : f32
    %92 = vector.broadcast %cst_62 : f32 to vector<8x128xf32>
    %93 = arith.subf %92, %86 : vector<8x128xf32>
    %94 = arith.mulf %93, %91 : vector<8x128xf32>
    %95 = arith.mulf %86, %25 : vector<8x128xf32>
    %96 = arith.addf %94, %95 : vector<8x128xf32>
    %97 = arith.truncf %25 : vector<8x128xf32> to vector<8x128xbf16>
    %c0_63 = arith.constant 0 : index
    %c0_64 = arith.constant 0 : index
    %98 = vector.load %arg16[%c0_63, %c0_64] : memref<128x384xbf16, #tpu.memory_space<vmem>>, vector<128x384xbf16>
    %cst_65 = arith.constant dense<0.000000e+00> : vector<8x384xf32>
    %99 = tpu.matmul %97, %98, %cst_65 {dimension_numbers = #tpu.dot_dimension_numbers<[1], [0], [0], [1], [0, 0, 1, 1], [], []>} : vector<8x128xbf16>, vector<128x384xbf16>, vector<8x384xf32> -> vector<8x384xf32>
    %100 = vector.broadcast %52 : vector<1x384xf32> to vector<8x384xf32>
    %101 = arith.addf %99, %100 : vector<8x384xf32>
    %102 = vector.extract_strided_slice %61 {offsets = [0, 0], sizes = [8, 128], strides = [1, 1]} : vector<8x384xf32> to vector<8x128xf32>
    %103 = vector.extract_strided_slice %101 {offsets = [0, 0], sizes = [8, 128], strides = [1, 1]} : vector<8x384xf32> to vector<8x128xf32>
    %104 = arith.addf %102, %103 : vector<8x128xf32>
    %cst_66 = arith.constant 5.000000e-01 : f32
    %105 = vector.broadcast %cst_66 : f32 to vector<8x128xf32>
    %106 = arith.mulf %105, %104 : vector<8x128xf32>
    %107 = math.tanh %106 : vector<8x128xf32>
    %cst_67 = arith.constant 5.000000e-01 : f32
    %108 = vector.broadcast %cst_67 : f32 to vector<8x128xf32>
    %109 = arith.mulf %108, %107 : vector<8x128xf32>
    %cst_68 = arith.constant 5.000000e-01 : f32
    %110 = vector.broadcast %cst_68 : f32 to vector<8x128xf32>
    %111 = arith.addf %109, %110 : vector<8x128xf32>
    %112 = vector.extract_strided_slice %61 {offsets = [0, 128], sizes = [8, 128], strides = [1, 1]} : vector<8x384xf32> to vector<8x128xf32>
    %113 = vector.extract_strided_slice %101 {offsets = [0, 128], sizes = [8, 128], strides = [1, 1]} : vector<8x384xf32> to vector<8x128xf32>
    %114 = arith.addf %112, %113 : vector<8x128xf32>
    %cst_69 = arith.constant 5.000000e-01 : f32
    %115 = vector.broadcast %cst_69 : f32 to vector<8x128xf32>
    %116 = arith.mulf %115, %114 : vector<8x128xf32>
    %117 = math.tanh %116 : vector<8x128xf32>
    %cst_70 = arith.constant 5.000000e-01 : f32
    %118 = vector.broadcast %cst_70 : f32 to vector<8x128xf32>
    %119 = arith.mulf %118, %117 : vector<8x128xf32>
    %cst_71 = arith.constant 5.000000e-01 : f32
    %120 = vector.broadcast %cst_71 : f32 to vector<8x128xf32>
    %121 = arith.addf %119, %120 : vector<8x128xf32>
    %122 = vector.extract_strided_slice %61 {offsets = [0, 256], sizes = [8, 128], strides = [1, 1]} : vector<8x384xf32> to vector<8x128xf32>
    %123 = vector.extract_strided_slice %101 {offsets = [0, 256], sizes = [8, 128], strides = [1, 1]} : vector<8x384xf32> to vector<8x128xf32>
    %124 = arith.mulf %111, %123 : vector<8x128xf32>
    %125 = arith.addf %122, %124 : vector<8x128xf32>
    %126 = math.tanh %125 : vector<8x128xf32>
    %cst_72 = arith.constant 1.000000e+00 : f32
    %127 = vector.broadcast %cst_72 : f32 to vector<8x128xf32>
    %128 = arith.subf %127, %121 : vector<8x128xf32>
    %129 = arith.mulf %128, %126 : vector<8x128xf32>
    %130 = arith.mulf %121, %25 : vector<8x128xf32>
    %131 = arith.addf %129, %130 : vector<8x128xf32>
    %132 = vector.broadcast %c0_i32 : i32 to vector<8x1xi32>
    %133 = arith.cmpi sgt, %50, %132 : vector<8x1xi32>
    %134 = vector.broadcast %53 : i32 to vector<8x1xi32>
    %135 = arith.cmpi sgt, %50, %134 : vector<8x1xi32>
    %cst_73 = arith.constant 0.000000e+00 : f32
    %136 = vector.shape_cast %133 : vector<8x1xi1> to vector<8x1xi1>
    %137 = vector.broadcast %136 : vector<8x1xi1> to vector<8x128xi1>
    %138 = vector.broadcast %cst_73 : f32 to vector<8x128xf32>
    %139 = arith.select %137, %96, %138 : vector<8x128xi1>, vector<8x128xf32>
    %140 = arith.index_cast %c0_i32 : i32 to index
    %c0_74 = arith.constant 0 : index
    %c0_75 = arith.constant 0 : index
    %141 = vector.load %arg19[%140, %c0_74, %c0_75] : memref<8x8x256xf32, #tpu.memory_space<vmem>>, vector<1x8x128xf32>
    %142 = vector.shape_cast %141 : vector<1x8x128xf32> to vector<8x128xf32>
    %143 = vector.shape_cast %139 : vector<8x128xf32> to vector<1x8x128xf32>
    tpu.vector_store %arg19[%140, %c0_74, %c0_75], %143 {strides = array<i32>} : memref<8x8x256xf32, #tpu.memory_space<vmem>>, vector<1x8x128xf32>,
    %cst_76 = arith.constant 0.000000e+00 : f32
    %144 = vector.shape_cast %135 : vector<8x1xi1> to vector<8x1xi1>
    %145 = vector.broadcast %144 : vector<8x1xi1> to vector<8x128xi1>
    %146 = vector.broadcast %cst_76 : f32 to vector<8x128xf32>
    %147 = arith.select %145, %131, %146 : vector<8x128xi1>, vector<8x128xf32>
    %148 = arith.index_cast %53 : i32 to index
    %c0_77 = arith.constant 0 : index
    %c128 = arith.constant 128 : index
    %149 = vector.load %arg19[%148, %c0_77, %c128] : memref<8x8x256xf32, #tpu.memory_space<vmem>>, vector<1x8x128xf32>
    %150 = vector.shape_cast %149 : vector<1x8x128xf32> to vector<8x128xf32>
    %151 = vector.shape_cast %147 : vector<8x128xf32> to vector<1x8x128xf32>
    tpu.vector_store %arg19[%148, %c0_77, %c128], %151 {strides = array<i32>} : memref<8x8x256xf32, #tpu.memory_space<vmem>>, vector<1x8x128xf32>,
    %152 = vector.shape_cast %133 : vector<8x1xi1> to vector<8x1xi1>
    %153 = vector.broadcast %152 : vector<8x1xi1> to vector<8x128xi1>
    %154 = arith.select %153, %96, %25 : vector<8x128xi1>, vector<8x128xf32>
    %155 = vector.shape_cast %135 : vector<8x1xi1> to vector<8x1xi1>
    %156 = vector.broadcast %155 : vector<8x1xi1> to vector<8x128xi1>
    %157 = arith.select %156, %131, %25 : vector<8x128xi1>, vector<8x128xf32>
    %c1_i32 = arith.constant 1 : i32
    %c7_i32_78 = arith.constant 7 : i32
    %158 = arith.subi %c7_i32_78, %c1_i32 : i32
    %c8_i32_79 = arith.constant 8 : i32
    %159 = arith.muli %c1_i32, %c8_i32_79 : i32
    %160 = tpu.assume_multiple %159, 8 : i32
    %c8_i32_80 = arith.constant 8 : i32
    %161 = arith.muli %158, %c8_i32_80 : i32
    %162 = tpu.assume_multiple %161, 8 : i32
    %163 = arith.index_cast %160 : i32 to index
    %c0_81 = arith.constant 0 : index
    %164 = vector.load %arg21[%163, %c0_81] : memref<64x384xf32, #tpu.memory_space<vmem>>, vector<8x384xf32>
    %165 = arith.index_cast %162 : i32 to index
    %c0_82 = arith.constant 0 : index
    %166 = vector.load %arg22[%165, %c0_82] : memref<64x384xf32, #tpu.memory_space<vmem>>, vector<8x384xf32>
    %167 = arith.truncf %154 : vector<8x128xf32> to vector<8x128xbf16>
    %c0_83 = arith.constant 0 : index
    %c0_84 = arith.constant 0 : index
    %168 = vector.load %arg15[%c0_83, %c0_84] : memref<128x384xbf16, #tpu.memory_space<vmem>>, vector<128x384xbf16>
    %cst_85 = arith.constant dense<0.000000e+00> : vector<8x384xf32>
    %169 = tpu.matmul %167, %168, %cst_85 {dimension_numbers = #tpu.dot_dimension_numbers<[1], [0], [0], [1], [0, 0, 1, 1], [], []>} : vector<8x128xbf16>, vector<128x384xbf16>, vector<8x384xf32> -> vector<8x384xf32>
    %170 = vector.broadcast %51 : vector<1x384xf32> to vector<8x384xf32>
    %171 = arith.addf %169, %170 : vector<8x384xf32>
    %172 = vector.extract_strided_slice %164 {offsets = [0, 0], sizes = [8, 128], strides = [1, 1]} : vector<8x384xf32> to vector<8x128xf32>
    %173 = vector.extract_strided_slice %171 {offsets = [0, 0], sizes = [8, 128], strides = [1, 1]} : vector<8x384xf32> to vector<8x128xf32>
    %174 = arith.addf %172, %173 : vector<8x128xf32>
    %cst_86 = arith.constant 5.000000e-01 : f32
    %175 = vector.broadcast %cst_86 : f32 to vector<8x128xf32>
    %176 = arith.mulf %175, %174 : vector<8x128xf32>
    %177 = math.tanh %176 : vector<8x128xf32>
    %cst_87 = arith.constant 5.000000e-01 : f32
    %178 = vector.broadcast %cst_87 : f32 to vector<8x128xf32>
    %179 = arith.mulf %178, %177 : vector<8x128xf32>
    %cst_88 = arith.constant 5.000000e-01 : f32
    %180 = vector.broadcast %cst_88 : f32 to vector<8x128xf32>
    %181 = arith.addf %179, %180 : vector<8x128xf32>
    %182 = vector.extract_strided_slice %164 {offsets = [0, 128], sizes = [8, 128], strides = [1, 1]} : vector<8x384xf32> to vector<8x128xf32>
    %183 = vector.extract_strided_slice %171 {offsets = [0, 128], sizes = [8, 128], strides = [1, 1]} : vector<8x384xf32> to vector<8x128xf32>
    %184 = arith.addf %182, %183 : vector<8x128xf32>
    %cst_89 = arith.constant 5.000000e-01 : f32
    %185 = vector.broadcast %cst_89 : f32 to vector<8x128xf32>
    %186 = arith.mulf %185, %184 : vector<8x128xf32>
    %187 = math.tanh %186 : vector<8x128xf32>
    %cst_90 = arith.constant 5.000000e-01 : f32
    %188 = vector.broadcast %cst_90 : f32 to vector<8x128xf32>
    %189 = arith.mulf %188, %187 : vector<8x128xf32>
    %cst_91 = arith.constant 5.000000e-01 : f32
    %190 = vector.broadcast %cst_91 : f32 to vector<8x128xf32>
    %191 = arith.addf %189, %190 : vector<8x128xf32>
    %192 = vector.extract_strided_slice %164 {offsets = [0, 256], sizes = [8, 128], strides = [1, 1]} : vector<8x384xf32> to vector<8x128xf32>
    %193 = vector.extract_strided_slice %171 {offsets = [0, 256], sizes = [8, 128], strides = [1, 1]} : vector<8x384xf32> to vector<8x128xf32>
    %194 = arith.mulf %181, %193 : vector<8x128xf32>
    %195 = arith.addf %192, %194 : vector<8x128xf32>
    %196 = math.tanh %195 : vector<8x128xf32>
    %cst_92 = arith.constant 1.000000e+00 : f32
    %197 = vector.broadcast %cst_92 : f32 to vector<8x128xf32>
    %198 = arith.subf %197, %191 : vector<8x128xf32>
    %199 = arith.mulf %198, %196 : vector<8x128xf32>
    %200 = arith.mulf %191, %154 : vector<8x128xf32>
    %201 = arith.addf %199, %200 : vector<8x128xf32>
    %202 = arith.truncf %157 : vector<8x128xf32> to vector<8x128xbf16>
    %c0_93 = arith.constant 0 : index
    %c0_94 = arith.constant 0 : index
    %203 = vector.load %arg16[%c0_93, %c0_94] : memref<128x384xbf16, #tpu.memory_space<vmem>>, vector<128x384xbf16>
    %cst_95 = arith.constant dense<0.000000e+00> : vector<8x384xf32>
    %204 = tpu.matmul %202, %203, %cst_95 {dimension_numbers = #tpu.dot_dimension_numbers<[1], [0], [0], [1], [0, 0, 1, 1], [], []>} : vector<8x128xbf16>, vector<128x384xbf16>, vector<8x384xf32> -> vector<8x384xf32>
    %205 = vector.broadcast %52 : vector<1x384xf32> to vector<8x384xf32>
    %206 = arith.addf %204, %205 : vector<8x384xf32>
    %207 = vector.extract_strided_slice %166 {offsets = [0, 0], sizes = [8, 128], strides = [1, 1]} : vector<8x384xf32> to vector<8x128xf32>
    %208 = vector.extract_strided_slice %206 {offsets = [0, 0], sizes = [8, 128], strides = [1, 1]} : vector<8x384xf32> to vector<8x128xf32>
    %209 = arith.addf %207, %208 : vector<8x128xf32>
    %cst_96 = arith.constant 5.000000e-01 : f32
    %210 = vector.broadcast %cst_96 : f32 to vector<8x128xf32>
    %211 = arith.mulf %210, %209 : vector<8x128xf32>
    %212 = math.tanh %211 : vector<8x128xf32>
    %cst_97 = arith.constant 5.000000e-01 : f32
    %213 = vector.broadcast %cst_97 : f32 to vector<8x128xf32>
    %214 = arith.mulf %213, %212 : vector<8x128xf32>
    %cst_98 = arith.constant 5.000000e-01 : f32
    %215 = vector.broadcast %cst_98 : f32 to vector<8x128xf32>
    %216 = arith.addf %214, %215 : vector<8x128xf32>
    %217 = vector.extract_strided_slice %166 {offsets = [0, 128], sizes = [8, 128], strides = [1, 1]} : vector<8x384xf32> to vector<8x128xf32>
    %218 = vector.extract_strided_slice %206 {offsets = [0, 128], sizes = [8, 128], strides = [1, 1]} : vector<8x384xf32> to vector<8x128xf32>
    %219 = arith.addf %217, %218 : vector<8x128xf32>
    %cst_99 = arith.constant 5.000000e-01 : f32
    %220 = vector.broadcast %cst_99 : f32 to vector<8x128xf32>
    %221 = arith.mulf %220, %219 : vector<8x128xf32>
    %222 = math.tanh %221 : vector<8x128xf32>
    %cst_100 = arith.constant 5.000000e-01 : f32
    %223 = vector.broadcast %cst_100 : f32 to vector<8x128xf32>
    %224 = arith.mulf %223, %222 : vector<8x128xf32>
    %cst_101 = arith.constant 5.000000e-01 : f32
    %225 = vector.broadcast %cst_101 : f32 to vector<8x128xf32>
    %226 = arith.addf %224, %225 : vector<8x128xf32>
    %227 = vector.extract_strided_slice %166 {offsets = [0, 256], sizes = [8, 128], strides = [1, 1]} : vector<8x384xf32> to vector<8x128xf32>
    %228 = vector.extract_strided_slice %206 {offsets = [0, 256], sizes = [8, 128], strides = [1, 1]} : vector<8x384xf32> to vector<8x128xf32>
    %229 = arith.mulf %216, %228 : vector<8x128xf32>
    %230 = arith.addf %227, %229 : vector<8x128xf32>
    %231 = math.tanh %230 : vector<8x128xf32>
    %cst_102 = arith.constant 1.000000e+00 : f32
    %232 = vector.broadcast %cst_102 : f32 to vector<8x128xf32>
    %233 = arith.subf %232, %226 : vector<8x128xf32>
    %234 = arith.mulf %233, %231 : vector<8x128xf32>
    %235 = arith.mulf %226, %157 : vector<8x128xf32>
    %236 = arith.addf %234, %235 : vector<8x128xf32>
    %237 = vector.broadcast %c1_i32 : i32 to vector<8x1xi32>
    %238 = arith.cmpi sgt, %50, %237 : vector<8x1xi32>
    %239 = vector.broadcast %158 : i32 to vector<8x1xi32>
    %240 = arith.cmpi sgt, %50, %239 : vector<8x1xi32>
    %cst_103 = arith.constant 0.000000e+00 : f32
    %241 = vector.shape_cast %238 : vector<8x1xi1> to vector<8x1xi1>
    %242 = vector.broadcast %241 : vector<8x1xi1> to vector<8x128xi1>
    %243 = vector.broadcast %cst_103 : f32 to vector<8x128xf32>
    %244 = arith.select %242, %201, %243 : vector<8x128xi1>, vector<8x128xf32>
    %245 = arith.index_cast %c1_i32 : i32 to index
    %c0_104 = arith.constant 0 : index
    %c0_105 = arith.constant 0 : index
    %246 = vector.load %arg19[%245, %c0_104, %c0_105] : memref<8x8x256xf32, #tpu.memory_space<vmem>>, vector<1x8x128xf32>
    %247 = vector.shape_cast %246 : vector<1x8x128xf32> to vector<8x128xf32>
    %248 = vector.shape_cast %244 : vector<8x128xf32> to vector<1x8x128xf32>
    tpu.vector_store %arg19[%245, %c0_104, %c0_105], %248 {strides = array<i32>} : memref<8x8x256xf32, #tpu.memory_space<vmem>>, vector<1x8x128xf32>,
    %cst_106 = arith.constant 0.000000e+00 : f32
    %249 = vector.shape_cast %240 : vector<8x1xi1> to vector<8x1xi1>
    %250 = vector.broadcast %249 : vector<8x1xi1> to vector<8x128xi1>
    %251 = vector.broadcast %cst_106 : f32 to vector<8x128xf32>
    %252 = arith.select %250, %236, %251 : vector<8x128xi1>, vector<8x128xf32>
    %253 = arith.index_cast %158 : i32 to index
    %c0_107 = arith.constant 0 : index
    %c128_108 = arith.constant 128 : index
    %254 = vector.load %arg19[%253, %c0_107, %c128_108] : memref<8x8x256xf32, #tpu.memory_space<vmem>>, vector<1x8x128xf32>
    %255 = vector.shape_cast %254 : vector<1x8x128xf32> to vector<8x128xf32>
    %256 = vector.shape_cast %252 : vector<8x128xf32> to vector<1x8x128xf32>
    tpu.vector_store %arg19[%253, %c0_107, %c128_108], %256 {strides = array<i32>} : memref<8x8x256xf32, #tpu.memory_space<vmem>>, vector<1x8x128xf32>,
    %257 = vector.shape_cast %238 : vector<8x1xi1> to vector<8x1xi1>
    %258 = vector.broadcast %257 : vector<8x1xi1> to vector<8x128xi1>
    %259 = arith.select %258, %201, %154 : vector<8x128xi1>, vector<8x128xf32>
    %260 = vector.shape_cast %240 : vector<8x1xi1> to vector<8x1xi1>
    %261 = vector.broadcast %260 : vector<8x1xi1> to vector<8x128xi1>
    %262 = arith.select %261, %236, %157 : vector<8x128xi1>, vector<8x128xf32>
    %c2_i32 = arith.constant 2 : i32
    %c7_i32_109 = arith.constant 7 : i32
    %263 = arith.subi %c7_i32_109, %c2_i32 : i32
    %c8_i32_110 = arith.constant 8 : i32
    %264 = arith.muli %c2_i32, %c8_i32_110 : i32
    %265 = tpu.assume_multiple %264, 8 : i32
    %c8_i32_111 = arith.constant 8 : i32
    %266 = arith.muli %263, %c8_i32_111 : i32
    %267 = tpu.assume_multiple %266, 8 : i32
    %268 = arith.index_cast %265 : i32 to index
    %c0_112 = arith.constant 0 : index
    %269 = vector.load %arg21[%268, %c0_112] : memref<64x384xf32, #tpu.memory_space<vmem>>, vector<8x384xf32>
    %270 = arith.index_cast %267 : i32 to index
    %c0_113 = arith.constant 0 : index
    %271 = vector.load %arg22[%270, %c0_113] : memref<64x384xf32, #tpu.memory_space<vmem>>, vector<8x384xf32>
    %272 = arith.truncf %259 : vector<8x128xf32> to vector<8x128xbf16>
    %c0_114 = arith.constant 0 : index
    %c0_115 = arith.constant 0 : index
    %273 = vector.load %arg15[%c0_114, %c0_115] : memref<128x384xbf16, #tpu.memory_space<vmem>>, vector<128x384xbf16>
    %cst_116 = arith.constant dense<0.000000e+00> : vector<8x384xf32>
    %274 = tpu.matmul %272, %273, %cst_116 {dimension_numbers = #tpu.dot_dimension_numbers<[1], [0], [0], [1], [0, 0, 1, 1], [], []>} : vector<8x128xbf16>, vector<128x384xbf16>, vector<8x384xf32> -> vector<8x384xf32>
    %275 = vector.broadcast %51 : vector<1x384xf32> to vector<8x384xf32>
    %276 = arith.addf %274, %275 : vector<8x384xf32>
    %277 = vector.extract_strided_slice %269 {offsets = [0, 0], sizes = [8, 128], strides = [1, 1]} : vector<8x384xf32> to vector<8x128xf32>
    %278 = vector.extract_strided_slice %276 {offsets = [0, 0], sizes = [8, 128], strides = [1, 1]} : vector<8x384xf32> to vector<8x128xf32>
    %279 = arith.addf %277, %278 : vector<8x128xf32>
    %cst_117 = arith.constant 5.000000e-01 : f32
    %280 = vector.broadcast %cst_117 : f32 to vector<8x128xf32>
    %281 = arith.mulf %280, %279 : vector<8x128xf32>
    %282 = math.tanh %281 : vector<8x128xf32>
    %cst_118 = arith.constant 5.000000e-01 : f32
    %283 = vector.broadcast %cst_118 : f32 to vector<8x128xf32>
    %284 = arith.mulf %283, %282 : vector<8x128xf32>
    %cst_119 = arith.constant 5.000000e-01 : f32
    %285 = vector.broadcast %cst_119 : f32 to vector<8x128xf32>
    %286 = arith.addf %284, %285 : vector<8x128xf32>
    %287 = vector.extract_strided_slice %269 {offsets = [0, 128], sizes = [8, 128], strides = [1, 1]} : vector<8x384xf32> to vector<8x128xf32>
    %288 = vector.extract_strided_slice %276 {offsets = [0, 128], sizes = [8, 128], strides = [1, 1]} : vector<8x384xf32> to vector<8x128xf32>
    %289 = arith.addf %287, %288 : vector<8x128xf32>
    %cst_120 = arith.constant 5.000000e-01 : f32
    %290 = vector.broadcast %cst_120 : f32 to vector<8x128xf32>
    %291 = arith.mulf %290, %289 : vector<8x128xf32>
    %292 = math.tanh %291 : vector<8x128xf32>
    %cst_121 = arith.constant 5.000000e-01 : f32
    %293 = vector.broadcast %cst_121 : f32 to vector<8x128xf32>
    %294 = arith.mulf %293, %292 : vector<8x128xf32>
    %cst_122 = arith.constant 5.000000e-01 : f32
    %295 = vector.broadcast %cst_122 : f32 to vector<8x128xf32>
    %296 = arith.addf %294, %295 : vector<8x128xf32>
    %297 = vector.extract_strided_slice %269 {offsets = [0, 256], sizes = [8, 128], strides = [1, 1]} : vector<8x384xf32> to vector<8x128xf32>
    %298 = vector.extract_strided_slice %276 {offsets = [0, 256], sizes = [8, 128], strides = [1, 1]} : vector<8x384xf32> to vector<8x128xf32>
    %299 = arith.mulf %286, %298 : vector<8x128xf32>
    %300 = arith.addf %297, %299 : vector<8x128xf32>
    %301 = math.tanh %300 : vector<8x128xf32>
    %cst_123 = arith.constant 1.000000e+00 : f32
    %302 = vector.broadcast %cst_123 : f32 to vector<8x128xf32>
    %303 = arith.subf %302, %296 : vector<8x128xf32>
    %304 = arith.mulf %303, %301 : vector<8x128xf32>
    %305 = arith.mulf %296, %259 : vector<8x128xf32>
    %306 = arith.addf %304, %305 : vector<8x128xf32>
    %307 = arith.truncf %262 : vector<8x128xf32> to vector<8x128xbf16>
    %c0_124 = arith.constant 0 : index
    %c0_125 = arith.constant 0 : index
    %308 = vector.load %arg16[%c0_124, %c0_125] : memref<128x384xbf16, #tpu.memory_space<vmem>>, vector<128x384xbf16>
    %cst_126 = arith.constant dense<0.000000e+00> : vector<8x384xf32>
    %309 = tpu.matmul %307, %308, %cst_126 {dimension_numbers = #tpu.dot_dimension_numbers<[1], [0], [0], [1], [0, 0, 1, 1], [], []>} : vector<8x128xbf16>, vector<128x384xbf16>, vector<8x384xf32> -> vector<8x384xf32>
    %310 = vector.broadcast %52 : vector<1x384xf32> to vector<8x384xf32>
    %311 = arith.addf %309, %310 : vector<8x384xf32>
    %312 = vector.extract_strided_slice %271 {offsets = [0, 0], sizes = [8, 128], strides = [1, 1]} : vector<8x384xf32> to vector<8x128xf32>
    %313 = vector.extract_strided_slice %311 {offsets = [0, 0], sizes = [8, 128], strides = [1, 1]} : vector<8x384xf32> to vector<8x128xf32>
    %314 = arith.addf %312, %313 : vector<8x128xf32>
    %cst_127 = arith.constant 5.000000e-01 : f32
    %315 = vector.broadcast %cst_127 : f32 to vector<8x128xf32>
    %316 = arith.mulf %315, %314 : vector<8x128xf32>
    %317 = math.tanh %316 : vector<8x128xf32>
    %cst_128 = arith.constant 5.000000e-01 : f32
    %318 = vector.broadcast %cst_128 : f32 to vector<8x128xf32>
    %319 = arith.mulf %318, %317 : vector<8x128xf32>
    %cst_129 = arith.constant 5.000000e-01 : f32
    %320 = vector.broadcast %cst_129 : f32 to vector<8x128xf32>
    %321 = arith.addf %319, %320 : vector<8x128xf32>
    %322 = vector.extract_strided_slice %271 {offsets = [0, 128], sizes = [8, 128], strides = [1, 1]} : vector<8x384xf32> to vector<8x128xf32>
    %323 = vector.extract_strided_slice %311 {offsets = [0, 128], sizes = [8, 128], strides = [1, 1]} : vector<8x384xf32> to vector<8x128xf32>
    %324 = arith.addf %322, %323 : vector<8x128xf32>
    %cst_130 = arith.constant 5.000000e-01 : f32
    %325 = vector.broadcast %cst_130 : f32 to vector<8x128xf32>
    %326 = arith.mulf %325, %324 : vector<8x128xf32>
    %327 = math.tanh %326 : vector<8x128xf32>
    %cst_131 = arith.constant 5.000000e-01 : f32
    %328 = vector.broadcast %cst_131 : f32 to vector<8x128xf32>
    %329 = arith.mulf %328, %327 : vector<8x128xf32>
    %cst_132 = arith.constant 5.000000e-01 : f32
    %330 = vector.broadcast %cst_132 : f32 to vector<8x128xf32>
    %331 = arith.addf %329, %330 : vector<8x128xf32>
    %332 = vector.extract_strided_slice %271 {offsets = [0, 256], sizes = [8, 128], strides = [1, 1]} : vector<8x384xf32> to vector<8x128xf32>
    %333 = vector.extract_strided_slice %311 {offsets = [0, 256], sizes = [8, 128], strides = [1, 1]} : vector<8x384xf32> to vector<8x128xf32>
    %334 = arith.mulf %321, %333 : vector<8x128xf32>
    %335 = arith.addf %332, %334 : vector<8x128xf32>
    %336 = math.tanh %335 : vector<8x128xf32>
    %cst_133 = arith.constant 1.000000e+00 : f32
    %337 = vector.broadcast %cst_133 : f32 to vector<8x128xf32>
    %338 = arith.subf %337, %331 : vector<8x128xf32>
    %339 = arith.mulf %338, %336 : vector<8x128xf32>
    %340 = arith.mulf %331, %262 : vector<8x128xf32>
    %341 = arith.addf %339, %340 : vector<8x128xf32>
    %342 = vector.broadcast %c2_i32 : i32 to vector<8x1xi32>
    %343 = arith.cmpi sgt, %50, %342 : vector<8x1xi32>
    %344 = vector.broadcast %263 : i32 to vector<8x1xi32>
    %345 = arith.cmpi sgt, %50, %344 : vector<8x1xi32>
    %cst_134 = arith.constant 0.000000e+00 : f32
    %346 = vector.shape_cast %343 : vector<8x1xi1> to vector<8x1xi1>
    %347 = vector.broadcast %346 : vector<8x1xi1> to vector<8x128xi1>
    %348 = vector.broadcast %cst_134 : f32 to vector<8x128xf32>
    %349 = arith.select %347, %306, %348 : vector<8x128xi1>, vector<8x128xf32>
    %350 = arith.index_cast %c2_i32 : i32 to index
    %c0_135 = arith.constant 0 : index
    %c0_136 = arith.constant 0 : index
    %351 = vector.load %arg19[%350, %c0_135, %c0_136] : memref<8x8x256xf32, #tpu.memory_space<vmem>>, vector<1x8x128xf32>
    %352 = vector.shape_cast %351 : vector<1x8x128xf32> to vector<8x128xf32>
    %353 = vector.shape_cast %349 : vector<8x128xf32> to vector<1x8x128xf32>
    tpu.vector_store %arg19[%350, %c0_135, %c0_136], %353 {strides = array<i32>} : memref<8x8x256xf32, #tpu.memory_space<vmem>>, vector<1x8x128xf32>,
    %cst_137 = arith.constant 0.000000e+00 : f32
    %354 = vector.shape_cast %345 : vector<8x1xi1> to vector<8x1xi1>
    %355 = vector.broadcast %354 : vector<8x1xi1> to vector<8x128xi1>
    %356 = vector.broadcast %cst_137 : f32 to vector<8x128xf32>
    %357 = arith.select %355, %341, %356 : vector<8x128xi1>, vector<8x128xf32>
    %358 = arith.index_cast %263 : i32 to index
    %c0_138 = arith.constant 0 : index
    %c128_139 = arith.constant 128 : index
    %359 = vector.load %arg19[%358, %c0_138, %c128_139] : memref<8x8x256xf32, #tpu.memory_space<vmem>>, vector<1x8x128xf32>
    %360 = vector.shape_cast %359 : vector<1x8x128xf32> to vector<8x128xf32>
    %361 = vector.shape_cast %357 : vector<8x128xf32> to vector<1x8x128xf32>
    tpu.vector_store %arg19[%358, %c0_138, %c128_139], %361 {strides = array<i32>} : memref<8x8x256xf32, #tpu.memory_space<vmem>>, vector<1x8x128xf32>,
    %362 = vector.shape_cast %343 : vector<8x1xi1> to vector<8x1xi1>
    %363 = vector.broadcast %362 : vector<8x1xi1> to vector<8x128xi1>
    %364 = arith.select %363, %306, %259 : vector<8x128xi1>, vector<8x128xf32>
    %365 = vector.shape_cast %345 : vector<8x1xi1> to vector<8x1xi1>
    %366 = vector.broadcast %365 : vector<8x1xi1> to vector<8x128xi1>
    %367 = arith.select %366, %341, %262 : vector<8x128xi1>, vector<8x128xf32>
    %c3_i32 = arith.constant 3 : i32
    %c7_i32_140 = arith.constant 7 : i32
    %368 = arith.subi %c7_i32_140, %c3_i32 : i32
    %c8_i32_141 = arith.constant 8 : i32
    %369 = arith.muli %c3_i32, %c8_i32_141 : i32
    %370 = tpu.assume_multiple %369, 8 : i32
    %c8_i32_142 = arith.constant 8 : i32
    %371 = arith.muli %368, %c8_i32_142 : i32
    %372 = tpu.assume_multiple %371, 8 : i32
    %373 = arith.index_cast %370 : i32 to index
    %c0_143 = arith.constant 0 : index
    %374 = vector.load %arg21[%373, %c0_143] : memref<64x384xf32, #tpu.memory_space<vmem>>, vector<8x384xf32>
    %375 = arith.index_cast %372 : i32 to index
    %c0_144 = arith.constant 0 : index
    %376 = vector.load %arg22[%375, %c0_144] : memref<64x384xf32, #tpu.memory_space<vmem>>, vector<8x384xf32>
    %377 = arith.truncf %364 : vector<8x128xf32> to vector<8x128xbf16>
    %c0_145 = arith.constant 0 : index
    %c0_146 = arith.constant 0 : index
    %378 = vector.load %arg15[%c0_145, %c0_146] : memref<128x384xbf16, #tpu.memory_space<vmem>>, vector<128x384xbf16>
    %cst_147 = arith.constant dense<0.000000e+00> : vector<8x384xf32>
    %379 = tpu.matmul %377, %378, %cst_147 {dimension_numbers = #tpu.dot_dimension_numbers<[1], [0], [0], [1], [0, 0, 1, 1], [], []>} : vector<8x128xbf16>, vector<128x384xbf16>, vector<8x384xf32> -> vector<8x384xf32>
    %380 = vector.broadcast %51 : vector<1x384xf32> to vector<8x384xf32>
    %381 = arith.addf %379, %380 : vector<8x384xf32>
    %382 = vector.extract_strided_slice %374 {offsets = [0, 0], sizes = [8, 128], strides = [1, 1]} : vector<8x384xf32> to vector<8x128xf32>
    %383 = vector.extract_strided_slice %381 {offsets = [0, 0], sizes = [8, 128], strides = [1, 1]} : vector<8x384xf32> to vector<8x128xf32>
    %384 = arith.addf %382, %383 : vector<8x128xf32>
    %cst_148 = arith.constant 5.000000e-01 : f32
    %385 = vector.broadcast %cst_148 : f32 to vector<8x128xf32>
    %386 = arith.mulf %385, %384 : vector<8x128xf32>
    %387 = math.tanh %386 : vector<8x128xf32>
    %cst_149 = arith.constant 5.000000e-01 : f32
    %388 = vector.broadcast %cst_149 : f32 to vector<8x128xf32>
    %389 = arith.mulf %388, %387 : vector<8x128xf32>
    %cst_150 = arith.constant 5.000000e-01 : f32
    %390 = vector.broadcast %cst_150 : f32 to vector<8x128xf32>
    %391 = arith.addf %389, %390 : vector<8x128xf32>
    %392 = vector.extract_strided_slice %374 {offsets = [0, 128], sizes = [8, 128], strides = [1, 1]} : vector<8x384xf32> to vector<8x128xf32>
    %393 = vector.extract_strided_slice %381 {offsets = [0, 128], sizes = [8, 128], strides = [1, 1]} : vector<8x384xf32> to vector<8x128xf32>
    %394 = arith.addf %392, %393 : vector<8x128xf32>
    %cst_151 = arith.constant 5.000000e-01 : f32
    %395 = vector.broadcast %cst_151 : f32 to vector<8x128xf32>
    %396 = arith.mulf %395, %394 : vector<8x128xf32>
    %397 = math.tanh %396 : vector<8x128xf32>
    %cst_152 = arith.constant 5.000000e-01 : f32
    %398 = vector.broadcast %cst_152 : f32 to vector<8x128xf32>
    %399 = arith.mulf %398, %397 : vector<8x128xf32>
    %cst_153 = arith.constant 5.000000e-01 : f32
    %400 = vector.broadcast %cst_153 : f32 to vector<8x128xf32>
    %401 = arith.addf %399, %400 : vector<8x128xf32>
    %402 = vector.extract_strided_slice %374 {offsets = [0, 256], sizes = [8, 128], strides = [1, 1]} : vector<8x384xf32> to vector<8x128xf32>
    %403 = vector.extract_strided_slice %381 {offsets = [0, 256], sizes = [8, 128], strides = [1, 1]} : vector<8x384xf32> to vector<8x128xf32>
    %404 = arith.mulf %391, %403 : vector<8x128xf32>
    %405 = arith.addf %402, %404 : vector<8x128xf32>
    %406 = math.tanh %405 : vector<8x128xf32>
    %cst_154 = arith.constant 1.000000e+00 : f32
    %407 = vector.broadcast %cst_154 : f32 to vector<8x128xf32>
    %408 = arith.subf %407, %401 : vector<8x128xf32>
    %409 = arith.mulf %408, %406 : vector<8x128xf32>
    %410 = arith.mulf %401, %364 : vector<8x128xf32>
    %411 = arith.addf %409, %410 : vector<8x128xf32>
    %412 = arith.truncf %367 : vector<8x128xf32> to vector<8x128xbf16>
    %c0_155 = arith.constant 0 : index
    %c0_156 = arith.constant 0 : index
    %413 = vector.load %arg16[%c0_155, %c0_156] : memref<128x384xbf16, #tpu.memory_space<vmem>>, vector<128x384xbf16>
    %cst_157 = arith.constant dense<0.000000e+00> : vector<8x384xf32>
    %414 = tpu.matmul %412, %413, %cst_157 {dimension_numbers = #tpu.dot_dimension_numbers<[1], [0], [0], [1], [0, 0, 1, 1], [], []>} : vector<8x128xbf16>, vector<128x384xbf16>, vector<8x384xf32> -> vector<8x384xf32>
    %415 = vector.broadcast %52 : vector<1x384xf32> to vector<8x384xf32>
    %416 = arith.addf %414, %415 : vector<8x384xf32>
    %417 = vector.extract_strided_slice %376 {offsets = [0, 0], sizes = [8, 128], strides = [1, 1]} : vector<8x384xf32> to vector<8x128xf32>
    %418 = vector.extract_strided_slice %416 {offsets = [0, 0], sizes = [8, 128], strides = [1, 1]} : vector<8x384xf32> to vector<8x128xf32>
    %419 = arith.addf %417, %418 : vector<8x128xf32>
    %cst_158 = arith.constant 5.000000e-01 : f32
    %420 = vector.broadcast %cst_158 : f32 to vector<8x128xf32>
    %421 = arith.mulf %420, %419 : vector<8x128xf32>
    %422 = math.tanh %421 : vector<8x128xf32>
    %cst_159 = arith.constant 5.000000e-01 : f32
    %423 = vector.broadcast %cst_159 : f32 to vector<8x128xf32>
    %424 = arith.mulf %423, %422 : vector<8x128xf32>
    %cst_160 = arith.constant 5.000000e-01 : f32
    %425 = vector.broadcast %cst_160 : f32 to vector<8x128xf32>
    %426 = arith.addf %424, %425 : vector<8x128xf32>
    %427 = vector.extract_strided_slice %376 {offsets = [0, 128], sizes = [8, 128], strides = [1, 1]} : vector<8x384xf32> to vector<8x128xf32>
    %428 = vector.extract_strided_slice %416 {offsets = [0, 128], sizes = [8, 128], strides = [1, 1]} : vector<8x384xf32> to vector<8x128xf32>
    %429 = arith.addf %427, %428 : vector<8x128xf32>
    %cst_161 = arith.constant 5.000000e-01 : f32
    %430 = vector.broadcast %cst_161 : f32 to vector<8x128xf32>
    %431 = arith.mulf %430, %429 : vector<8x128xf32>
    %432 = math.tanh %431 : vector<8x128xf32>
    %cst_162 = arith.constant 5.000000e-01 : f32
    %433 = vector.broadcast %cst_162 : f32 to vector<8x128xf32>
    %434 = arith.mulf %433, %432 : vector<8x128xf32>
    %cst_163 = arith.constant 5.000000e-01 : f32
    %435 = vector.broadcast %cst_163 : f32 to vector<8x128xf32>
    %436 = arith.addf %434, %435 : vector<8x128xf32>
    %437 = vector.extract_strided_slice %376 {offsets = [0, 256], sizes = [8, 128], strides = [1, 1]} : vector<8x384xf32> to vector<8x128xf32>
    %438 = vector.extract_strided_slice %416 {offsets = [0, 256], sizes = [8, 128], strides = [1, 1]} : vector<8x384xf32> to vector<8x128xf32>
    %439 = arith.mulf %426, %438 : vector<8x128xf32>
    %440 = arith.addf %437, %439 : vector<8x128xf32>
    %441 = math.tanh %440 : vector<8x128xf32>
    %cst_164 = arith.constant 1.000000e+00 : f32
    %442 = vector.broadcast %cst_164 : f32 to vector<8x128xf32>
    %443 = arith.subf %442, %436 : vector<8x128xf32>
    %444 = arith.mulf %443, %441 : vector<8x128xf32>
    %445 = arith.mulf %436, %367 : vector<8x128xf32>
    %446 = arith.addf %444, %445 : vector<8x128xf32>
    %447 = vector.broadcast %c3_i32 : i32 to vector<8x1xi32>
    %448 = arith.cmpi sgt, %50, %447 : vector<8x1xi32>
    %449 = vector.broadcast %368 : i32 to vector<8x1xi32>
    %450 = arith.cmpi sgt, %50, %449 : vector<8x1xi32>
    %cst_165 = arith.constant 0.000000e+00 : f32
    %451 = vector.shape_cast %448 : vector<8x1xi1> to vector<8x1xi1>
    %452 = vector.broadcast %451 : vector<8x1xi1> to vector<8x128xi1>
    %453 = vector.broadcast %cst_165 : f32 to vector<8x128xf32>
    %454 = arith.select %452, %411, %453 : vector<8x128xi1>, vector<8x128xf32>
    %455 = arith.index_cast %c3_i32 : i32 to index
    %c0_166 = arith.constant 0 : index
    %c0_167 = arith.constant 0 : index
    %456 = vector.load %arg19[%455, %c0_166, %c0_167] : memref<8x8x256xf32, #tpu.memory_space<vmem>>, vector<1x8x128xf32>
    %457 = vector.shape_cast %456 : vector<1x8x128xf32> to vector<8x128xf32>
    %458 = vector.shape_cast %454 : vector<8x128xf32> to vector<1x8x128xf32>
    tpu.vector_store %arg19[%455, %c0_166, %c0_167], %458 {strides = array<i32>} : memref<8x8x256xf32, #tpu.memory_space<vmem>>, vector<1x8x128xf32>,
    %cst_168 = arith.constant 0.000000e+00 : f32
    %459 = vector.shape_cast %450 : vector<8x1xi1> to vector<8x1xi1>
    %460 = vector.broadcast %459 : vector<8x1xi1> to vector<8x128xi1>
    %461 = vector.broadcast %cst_168 : f32 to vector<8x128xf32>
    %462 = arith.select %460, %446, %461 : vector<8x128xi1>, vector<8x128xf32>
    %463 = arith.index_cast %368 : i32 to index
    %c0_169 = arith.constant 0 : index
    %c128_170 = arith.constant 128 : index
    %464 = vector.load %arg19[%463, %c0_169, %c128_170] : memref<8x8x256xf32, #tpu.memory_space<vmem>>, vector<1x8x128xf32>
    %465 = vector.shape_cast %464 : vector<1x8x128xf32> to vector<8x128xf32>
    %466 = vector.shape_cast %462 : vector<8x128xf32> to vector<1x8x128xf32>
    tpu.vector_store %arg19[%463, %c0_169, %c128_170], %466 {strides = array<i32>} : memref<8x8x256xf32, #tpu.memory_space<vmem>>, vector<1x8x128xf32>,
    %467 = vector.shape_cast %448 : vector<8x1xi1> to vector<8x1xi1>
    %468 = vector.broadcast %467 : vector<8x1xi1> to vector<8x128xi1>
    %469 = arith.select %468, %411, %364 : vector<8x128xi1>, vector<8x128xf32>
    %470 = vector.shape_cast %450 : vector<8x1xi1> to vector<8x1xi1>
    %471 = vector.broadcast %470 : vector<8x1xi1> to vector<8x128xi1>
    %472 = arith.select %471, %446, %367 : vector<8x128xi1>, vector<8x128xf32>
    %c4_i32 = arith.constant 4 : i32
    %c7_i32_171 = arith.constant 7 : i32
    %473 = arith.subi %c7_i32_171, %c4_i32 : i32
    %c8_i32_172 = arith.constant 8 : i32
    %474 = arith.muli %c4_i32, %c8_i32_172 : i32
    %475 = tpu.assume_multiple %474, 8 : i32
    %c8_i32_173 = arith.constant 8 : i32
    %476 = arith.muli %473, %c8_i32_173 : i32
    %477 = tpu.assume_multiple %476, 8 : i32
    %478 = arith.index_cast %475 : i32 to index
    %c0_174 = arith.constant 0 : index
    %479 = vector.load %arg21[%478, %c0_174] : memref<64x384xf32, #tpu.memory_space<vmem>>, vector<8x384xf32>
    %480 = arith.index_cast %477 : i32 to index
    %c0_175 = arith.constant 0 : index
    %481 = vector.load %arg22[%480, %c0_175] : memref<64x384xf32, #tpu.memory_space<vmem>>, vector<8x384xf32>
    %482 = arith.truncf %469 : vector<8x128xf32> to vector<8x128xbf16>
    %c0_176 = arith.constant 0 : index
    %c0_177 = arith.constant 0 : index
    %483 = vector.load %arg15[%c0_176, %c0_177] : memref<128x384xbf16, #tpu.memory_space<vmem>>, vector<128x384xbf16>
    %cst_178 = arith.constant dense<0.000000e+00> : vector<8x384xf32>
    %484 = tpu.matmul %482, %483, %cst_178 {dimension_numbers = #tpu.dot_dimension_numbers<[1], [0], [0], [1], [0, 0, 1, 1], [], []>} : vector<8x128xbf16>, vector<128x384xbf16>, vector<8x384xf32> -> vector<8x384xf32>
    %485 = vector.broadcast %51 : vector<1x384xf32> to vector<8x384xf32>
    %486 = arith.addf %484, %485 : vector<8x384xf32>
    %487 = vector.extract_strided_slice %479 {offsets = [0, 0], sizes = [8, 128], strides = [1, 1]} : vector<8x384xf32> to vector<8x128xf32>
    %488 = vector.extract_strided_slice %486 {offsets = [0, 0], sizes = [8, 128], strides = [1, 1]} : vector<8x384xf32> to vector<8x128xf32>
    %489 = arith.addf %487, %488 : vector<8x128xf32>
    %cst_179 = arith.constant 5.000000e-01 : f32
    %490 = vector.broadcast %cst_179 : f32 to vector<8x128xf32>
    %491 = arith.mulf %490, %489 : vector<8x128xf32>
    %492 = math.tanh %491 : vector<8x128xf32>
    %cst_180 = arith.constant 5.000000e-01 : f32
    %493 = vector.broadcast %cst_180 : f32 to vector<8x128xf32>
    %494 = arith.mulf %493, %492 : vector<8x128xf32>
    %cst_181 = arith.constant 5.000000e-01 : f32
    %495 = vector.broadcast %cst_181 : f32 to vector<8x128xf32>
    %496 = arith.addf %494, %495 : vector<8x128xf32>
    %497 = vector.extract_strided_slice %479 {offsets = [0, 128], sizes = [8, 128], strides = [1, 1]} : vector<8x384xf32> to vector<8x128xf32>
    %498 = vector.extract_strided_slice %486 {offsets = [0, 128], sizes = [8, 128], strides = [1, 1]} : vector<8x384xf32> to vector<8x128xf32>
    %499 = arith.addf %497, %498 : vector<8x128xf32>
    %cst_182 = arith.constant 5.000000e-01 : f32
    %500 = vector.broadcast %cst_182 : f32 to vector<8x128xf32>
    %501 = arith.mulf %500, %499 : vector<8x128xf32>
    %502 = math.tanh %501 : vector<8x128xf32>
    %cst_183 = arith.constant 5.000000e-01 : f32
    %503 = vector.broadcast %cst_183 : f32 to vector<8x128xf32>
    %504 = arith.mulf %503, %502 : vector<8x128xf32>
    %cst_184 = arith.constant 5.000000e-01 : f32
    %505 = vector.broadcast %cst_184 : f32 to vector<8x128xf32>
    %506 = arith.addf %504, %505 : vector<8x128xf32>
    %507 = vector.extract_strided_slice %479 {offsets = [0, 256], sizes = [8, 128], strides = [1, 1]} : vector<8x384xf32> to vector<8x128xf32>
    %508 = vector.extract_strided_slice %486 {offsets = [0, 256], sizes = [8, 128], strides = [1, 1]} : vector<8x384xf32> to vector<8x128xf32>
    %509 = arith.mulf %496, %508 : vector<8x128xf32>
    %510 = arith.addf %507, %509 : vector<8x128xf32>
    %511 = math.tanh %510 : vector<8x128xf32>
    %cst_185 = arith.constant 1.000000e+00 : f32
    %512 = vector.broadcast %cst_185 : f32 to vector<8x128xf32>
    %513 = arith.subf %512, %506 : vector<8x128xf32>
    %514 = arith.mulf %513, %511 : vector<8x128xf32>
    %515 = arith.mulf %506, %469 : vector<8x128xf32>
    %516 = arith.addf %514, %515 : vector<8x128xf32>
    %517 = arith.truncf %472 : vector<8x128xf32> to vector<8x128xbf16>
    %c0_186 = arith.constant 0 : index
    %c0_187 = arith.constant 0 : index
    %518 = vector.load %arg16[%c0_186, %c0_187] : memref<128x384xbf16, #tpu.memory_space<vmem>>, vector<128x384xbf16>
    %cst_188 = arith.constant dense<0.000000e+00> : vector<8x384xf32>
    %519 = tpu.matmul %517, %518, %cst_188 {dimension_numbers = #tpu.dot_dimension_numbers<[1], [0], [0], [1], [0, 0, 1, 1], [], []>} : vector<8x128xbf16>, vector<128x384xbf16>, vector<8x384xf32> -> vector<8x384xf32>
    %520 = vector.broadcast %52 : vector<1x384xf32> to vector<8x384xf32>
    %521 = arith.addf %519, %520 : vector<8x384xf32>
    %522 = vector.extract_strided_slice %481 {offsets = [0, 0], sizes = [8, 128], strides = [1, 1]} : vector<8x384xf32> to vector<8x128xf32>
    %523 = vector.extract_strided_slice %521 {offsets = [0, 0], sizes = [8, 128], strides = [1, 1]} : vector<8x384xf32> to vector<8x128xf32>
    %524 = arith.addf %522, %523 : vector<8x128xf32>
    %cst_189 = arith.constant 5.000000e-01 : f32
    %525 = vector.broadcast %cst_189 : f32 to vector<8x128xf32>
    %526 = arith.mulf %525, %524 : vector<8x128xf32>
    %527 = math.tanh %526 : vector<8x128xf32>
    %cst_190 = arith.constant 5.000000e-01 : f32
    %528 = vector.broadcast %cst_190 : f32 to vector<8x128xf32>
    %529 = arith.mulf %528, %527 : vector<8x128xf32>
    %cst_191 = arith.constant 5.000000e-01 : f32
    %530 = vector.broadcast %cst_191 : f32 to vector<8x128xf32>
    %531 = arith.addf %529, %530 : vector<8x128xf32>
    %532 = vector.extract_strided_slice %481 {offsets = [0, 128], sizes = [8, 128], strides = [1, 1]} : vector<8x384xf32> to vector<8x128xf32>
    %533 = vector.extract_strided_slice %521 {offsets = [0, 128], sizes = [8, 128], strides = [1, 1]} : vector<8x384xf32> to vector<8x128xf32>
    %534 = arith.addf %532, %533 : vector<8x128xf32>
    %cst_192 = arith.constant 5.000000e-01 : f32
    %535 = vector.broadcast %cst_192 : f32 to vector<8x128xf32>
    %536 = arith.mulf %535, %534 : vector<8x128xf32>
    %537 = math.tanh %536 : vector<8x128xf32>
    %cst_193 = arith.constant 5.000000e-01 : f32
    %538 = vector.broadcast %cst_193 : f32 to vector<8x128xf32>
    %539 = arith.mulf %538, %537 : vector<8x128xf32>
    %cst_194 = arith.constant 5.000000e-01 : f32
    %540 = vector.broadcast %cst_194 : f32 to vector<8x128xf32>
    %541 = arith.addf %539, %540 : vector<8x128xf32>
    %542 = vector.extract_strided_slice %481 {offsets = [0, 256], sizes = [8, 128], strides = [1, 1]} : vector<8x384xf32> to vector<8x128xf32>
    %543 = vector.extract_strided_slice %521 {offsets = [0, 256], sizes = [8, 128], strides = [1, 1]} : vector<8x384xf32> to vector<8x128xf32>
    %544 = arith.mulf %531, %543 : vector<8x128xf32>
    %545 = arith.addf %542, %544 : vector<8x128xf32>
    %546 = math.tanh %545 : vector<8x128xf32>
    %cst_195 = arith.constant 1.000000e+00 : f32
    %547 = vector.broadcast %cst_195 : f32 to vector<8x128xf32>
    %548 = arith.subf %547, %541 : vector<8x128xf32>
    %549 = arith.mulf %548, %546 : vector<8x128xf32>
    %550 = arith.mulf %541, %472 : vector<8x128xf32>
    %551 = arith.addf %549, %550 : vector<8x128xf32>
    %552 = vector.broadcast %c4_i32 : i32 to vector<8x1xi32>
    %553 = arith.cmpi sgt, %50, %552 : vector<8x1xi32>
    %554 = vector.broadcast %473 : i32 to vector<8x1xi32>
    %555 = arith.cmpi sgt, %50, %554 : vector<8x1xi32>
    %cst_196 = arith.constant 0.000000e+00 : f32
    %556 = vector.shape_cast %553 : vector<8x1xi1> to vector<8x1xi1>
    %557 = vector.broadcast %556 : vector<8x1xi1> to vector<8x128xi1>
    %558 = vector.broadcast %cst_196 : f32 to vector<8x128xf32>
    %559 = arith.select %557, %516, %558 : vector<8x128xi1>, vector<8x128xf32>
    %560 = arith.index_cast %c4_i32 : i32 to index
    %c0_197 = arith.constant 0 : index
    %c0_198 = arith.constant 0 : index
    %561 = vector.load %arg19[%560, %c0_197, %c0_198] : memref<8x8x256xf32, #tpu.memory_space<vmem>>, vector<1x8x128xf32>
    %562 = vector.shape_cast %561 : vector<1x8x128xf32> to vector<8x128xf32>
    %563 = vector.shape_cast %559 : vector<8x128xf32> to vector<1x8x128xf32>
    tpu.vector_store %arg19[%560, %c0_197, %c0_198], %563 {strides = array<i32>} : memref<8x8x256xf32, #tpu.memory_space<vmem>>, vector<1x8x128xf32>,
    %cst_199 = arith.constant 0.000000e+00 : f32
    %564 = vector.shape_cast %555 : vector<8x1xi1> to vector<8x1xi1>
    %565 = vector.broadcast %564 : vector<8x1xi1> to vector<8x128xi1>
    %566 = vector.broadcast %cst_199 : f32 to vector<8x128xf32>
    %567 = arith.select %565, %551, %566 : vector<8x128xi1>, vector<8x128xf32>
    %568 = arith.index_cast %473 : i32 to index
    %c0_200 = arith.constant 0 : index
    %c128_201 = arith.constant 128 : index
    %569 = vector.load %arg19[%568, %c0_200, %c128_201] : memref<8x8x256xf32, #tpu.memory_space<vmem>>, vector<1x8x128xf32>
    %570 = vector.shape_cast %569 : vector<1x8x128xf32> to vector<8x128xf32>
    %571 = vector.shape_cast %567 : vector<8x128xf32> to vector<1x8x128xf32>
    tpu.vector_store %arg19[%568, %c0_200, %c128_201], %571 {strides = array<i32>} : memref<8x8x256xf32, #tpu.memory_space<vmem>>, vector<1x8x128xf32>,
    %572 = vector.shape_cast %553 : vector<8x1xi1> to vector<8x1xi1>
    %573 = vector.broadcast %572 : vector<8x1xi1> to vector<8x128xi1>
    %574 = arith.select %573, %516, %469 : vector<8x128xi1>, vector<8x128xf32>
    %575 = vector.shape_cast %555 : vector<8x1xi1> to vector<8x1xi1>
    %576 = vector.broadcast %575 : vector<8x1xi1> to vector<8x128xi1>
    %577 = arith.select %576, %551, %472 : vector<8x128xi1>, vector<8x128xf32>
    %c5_i32 = arith.constant 5 : i32
    %c7_i32_202 = arith.constant 7 : i32
    %578 = arith.subi %c7_i32_202, %c5_i32 : i32
    %c8_i32_203 = arith.constant 8 : i32
    %579 = arith.muli %c5_i32, %c8_i32_203 : i32
    %580 = tpu.assume_multiple %579, 8 : i32
    %c8_i32_204 = arith.constant 8 : i32
    %581 = arith.muli %578, %c8_i32_204 : i32
    %582 = tpu.assume_multiple %581, 8 : i32
    %583 = arith.index_cast %580 : i32 to index
    %c0_205 = arith.constant 0 : index
    %584 = vector.load %arg21[%583, %c0_205] : memref<64x384xf32, #tpu.memory_space<vmem>>, vector<8x384xf32>
    %585 = arith.index_cast %582 : i32 to index
    %c0_206 = arith.constant 0 : index
    %586 = vector.load %arg22[%585, %c0_206] : memref<64x384xf32, #tpu.memory_space<vmem>>, vector<8x384xf32>
    %587 = arith.truncf %574 : vector<8x128xf32> to vector<8x128xbf16>
    %c0_207 = arith.constant 0 : index
    %c0_208 = arith.constant 0 : index
    %588 = vector.load %arg15[%c0_207, %c0_208] : memref<128x384xbf16, #tpu.memory_space<vmem>>, vector<128x384xbf16>
    %cst_209 = arith.constant dense<0.000000e+00> : vector<8x384xf32>
    %589 = tpu.matmul %587, %588, %cst_209 {dimension_numbers = #tpu.dot_dimension_numbers<[1], [0], [0], [1], [0, 0, 1, 1], [], []>} : vector<8x128xbf16>, vector<128x384xbf16>, vector<8x384xf32> -> vector<8x384xf32>
    %590 = vector.broadcast %51 : vector<1x384xf32> to vector<8x384xf32>
    %591 = arith.addf %589, %590 : vector<8x384xf32>
    %592 = vector.extract_strided_slice %584 {offsets = [0, 0], sizes = [8, 128], strides = [1, 1]} : vector<8x384xf32> to vector<8x128xf32>
    %593 = vector.extract_strided_slice %591 {offsets = [0, 0], sizes = [8, 128], strides = [1, 1]} : vector<8x384xf32> to vector<8x128xf32>
    %594 = arith.addf %592, %593 : vector<8x128xf32>
    %cst_210 = arith.constant 5.000000e-01 : f32
    %595 = vector.broadcast %cst_210 : f32 to vector<8x128xf32>
    %596 = arith.mulf %595, %594 : vector<8x128xf32>
    %597 = math.tanh %596 : vector<8x128xf32>
    %cst_211 = arith.constant 5.000000e-01 : f32
    %598 = vector.broadcast %cst_211 : f32 to vector<8x128xf32>
    %599 = arith.mulf %598, %597 : vector<8x128xf32>
    %cst_212 = arith.constant 5.000000e-01 : f32
    %600 = vector.broadcast %cst_212 : f32 to vector<8x128xf32>
    %601 = arith.addf %599, %600 : vector<8x128xf32>
    %602 = vector.extract_strided_slice %584 {offsets = [0, 128], sizes = [8, 128], strides = [1, 1]} : vector<8x384xf32> to vector<8x128xf32>
    %603 = vector.extract_strided_slice %591 {offsets = [0, 128], sizes = [8, 128], strides = [1, 1]} : vector<8x384xf32> to vector<8x128xf32>
    %604 = arith.addf %602, %603 : vector<8x128xf32>
    %cst_213 = arith.constant 5.000000e-01 : f32
    %605 = vector.broadcast %cst_213 : f32 to vector<8x128xf32>
    %606 = arith.mulf %605, %604 : vector<8x128xf32>
    %607 = math.tanh %606 : vector<8x128xf32>
    %cst_214 = arith.constant 5.000000e-01 : f32
    %608 = vector.broadcast %cst_214 : f32 to vector<8x128xf32>
    %609 = arith.mulf %608, %607 : vector<8x128xf32>
    %cst_215 = arith.constant 5.000000e-01 : f32
    %610 = vector.broadcast %cst_215 : f32 to vector<8x128xf32>
    %611 = arith.addf %609, %610 : vector<8x128xf32>
    %612 = vector.extract_strided_slice %584 {offsets = [0, 256], sizes = [8, 128], strides = [1, 1]} : vector<8x384xf32> to vector<8x128xf32>
    %613 = vector.extract_strided_slice %591 {offsets = [0, 256], sizes = [8, 128], strides = [1, 1]} : vector<8x384xf32> to vector<8x128xf32>
    %614 = arith.mulf %601, %613 : vector<8x128xf32>
    %615 = arith.addf %612, %614 : vector<8x128xf32>
    %616 = math.tanh %615 : vector<8x128xf32>
    %cst_216 = arith.constant 1.000000e+00 : f32
    %617 = vector.broadcast %cst_216 : f32 to vector<8x128xf32>
    %618 = arith.subf %617, %611 : vector<8x128xf32>
    %619 = arith.mulf %618, %616 : vector<8x128xf32>
    %620 = arith.mulf %611, %574 : vector<8x128xf32>
    %621 = arith.addf %619, %620 : vector<8x128xf32>
    %622 = arith.truncf %577 : vector<8x128xf32> to vector<8x128xbf16>
    %c0_217 = arith.constant 0 : index
    %c0_218 = arith.constant 0 : index
    %623 = vector.load %arg16[%c0_217, %c0_218] : memref<128x384xbf16, #tpu.memory_space<vmem>>, vector<128x384xbf16>
    %cst_219 = arith.constant dense<0.000000e+00> : vector<8x384xf32>
    %624 = tpu.matmul %622, %623, %cst_219 {dimension_numbers = #tpu.dot_dimension_numbers<[1], [0], [0], [1], [0, 0, 1, 1], [], []>} : vector<8x128xbf16>, vector<128x384xbf16>, vector<8x384xf32> -> vector<8x384xf32>
    %625 = vector.broadcast %52 : vector<1x384xf32> to vector<8x384xf32>
    %626 = arith.addf %624, %625 : vector<8x384xf32>
    %627 = vector.extract_strided_slice %586 {offsets = [0, 0], sizes = [8, 128], strides = [1, 1]} : vector<8x384xf32> to vector<8x128xf32>
    %628 = vector.extract_strided_slice %626 {offsets = [0, 0], sizes = [8, 128], strides = [1, 1]} : vector<8x384xf32> to vector<8x128xf32>
    %629 = arith.addf %627, %628 : vector<8x128xf32>
    %cst_220 = arith.constant 5.000000e-01 : f32
    %630 = vector.broadcast %cst_220 : f32 to vector<8x128xf32>
    %631 = arith.mulf %630, %629 : vector<8x128xf32>
    %632 = math.tanh %631 : vector<8x128xf32>
    %cst_221 = arith.constant 5.000000e-01 : f32
    %633 = vector.broadcast %cst_221 : f32 to vector<8x128xf32>
    %634 = arith.mulf %633, %632 : vector<8x128xf32>
    %cst_222 = arith.constant 5.000000e-01 : f32
    %635 = vector.broadcast %cst_222 : f32 to vector<8x128xf32>
    %636 = arith.addf %634, %635 : vector<8x128xf32>
    %637 = vector.extract_strided_slice %586 {offsets = [0, 128], sizes = [8, 128], strides = [1, 1]} : vector<8x384xf32> to vector<8x128xf32>
    %638 = vector.extract_strided_slice %626 {offsets = [0, 128], sizes = [8, 128], strides = [1, 1]} : vector<8x384xf32> to vector<8x128xf32>
    %639 = arith.addf %637, %638 : vector<8x128xf32>
    %cst_223 = arith.constant 5.000000e-01 : f32
    %640 = vector.broadcast %cst_223 : f32 to vector<8x128xf32>
    %641 = arith.mulf %640, %639 : vector<8x128xf32>
    %642 = math.tanh %641 : vector<8x128xf32>
    %cst_224 = arith.constant 5.000000e-01 : f32
    %643 = vector.broadcast %cst_224 : f32 to vector<8x128xf32>
    %644 = arith.mulf %643, %642 : vector<8x128xf32>
    %cst_225 = arith.constant 5.000000e-01 : f32
    %645 = vector.broadcast %cst_225 : f32 to vector<8x128xf32>
    %646 = arith.addf %644, %645 : vector<8x128xf32>
    %647 = vector.extract_strided_slice %586 {offsets = [0, 256], sizes = [8, 128], strides = [1, 1]} : vector<8x384xf32> to vector<8x128xf32>
    %648 = vector.extract_strided_slice %626 {offsets = [0, 256], sizes = [8, 128], strides = [1, 1]} : vector<8x384xf32> to vector<8x128xf32>
    %649 = arith.mulf %636, %648 : vector<8x128xf32>
    %650 = arith.addf %647, %649 : vector<8x128xf32>
    %651 = math.tanh %650 : vector<8x128xf32>
    %cst_226 = arith.constant 1.000000e+00 : f32
    %652 = vector.broadcast %cst_226 : f32 to vector<8x128xf32>
    %653 = arith.subf %652, %646 : vector<8x128xf32>
    %654 = arith.mulf %653, %651 : vector<8x128xf32>
    %655 = arith.mulf %646, %577 : vector<8x128xf32>
    %656 = arith.addf %654, %655 : vector<8x128xf32>
    %657 = vector.broadcast %c5_i32 : i32 to vector<8x1xi32>
    %658 = arith.cmpi sgt, %50, %657 : vector<8x1xi32>
    %659 = vector.broadcast %578 : i32 to vector<8x1xi32>
    %660 = arith.cmpi sgt, %50, %659 : vector<8x1xi32>
    %cst_227 = arith.constant 0.000000e+00 : f32
    %661 = vector.shape_cast %658 : vector<8x1xi1> to vector<8x1xi1>
    %662 = vector.broadcast %661 : vector<8x1xi1> to vector<8x128xi1>
    %663 = vector.broadcast %cst_227 : f32 to vector<8x128xf32>
    %664 = arith.select %662, %621, %663 : vector<8x128xi1>, vector<8x128xf32>
    %665 = arith.index_cast %c5_i32 : i32 to index
    %c0_228 = arith.constant 0 : index
    %c0_229 = arith.constant 0 : index
    %666 = vector.load %arg19[%665, %c0_228, %c0_229] : memref<8x8x256xf32, #tpu.memory_space<vmem>>, vector<1x8x128xf32>
    %667 = vector.shape_cast %666 : vector<1x8x128xf32> to vector<8x128xf32>
    %668 = vector.shape_cast %664 : vector<8x128xf32> to vector<1x8x128xf32>
    tpu.vector_store %arg19[%665, %c0_228, %c0_229], %668 {strides = array<i32>} : memref<8x8x256xf32, #tpu.memory_space<vmem>>, vector<1x8x128xf32>,
    %cst_230 = arith.constant 0.000000e+00 : f32
    %669 = vector.shape_cast %660 : vector<8x1xi1> to vector<8x1xi1>
    %670 = vector.broadcast %669 : vector<8x1xi1> to vector<8x128xi1>
    %671 = vector.broadcast %cst_230 : f32 to vector<8x128xf32>
    %672 = arith.select %670, %656, %671 : vector<8x128xi1>, vector<8x128xf32>
    %673 = arith.index_cast %578 : i32 to index
    %c0_231 = arith.constant 0 : index
    %c128_232 = arith.constant 128 : index
    %674 = vector.load %arg19[%673, %c0_231, %c128_232] : memref<8x8x256xf32, #tpu.memory_space<vmem>>, vector<1x8x128xf32>
    %675 = vector.shape_cast %674 : vector<1x8x128xf32> to vector<8x128xf32>
    %676 = vector.shape_cast %672 : vector<8x128xf32> to vector<1x8x128xf32>
    tpu.vector_store %arg19[%673, %c0_231, %c128_232], %676 {strides = array<i32>} : memref<8x8x256xf32, #tpu.memory_space<vmem>>, vector<1x8x128xf32>,
    %677 = vector.shape_cast %658 : vector<8x1xi1> to vector<8x1xi1>
    %678 = vector.broadcast %677 : vector<8x1xi1> to vector<8x128xi1>
    %679 = arith.select %678, %621, %574 : vector<8x128xi1>, vector<8x128xf32>
    %680 = vector.shape_cast %660 : vector<8x1xi1> to vector<8x1xi1>
    %681 = vector.broadcast %680 : vector<8x1xi1> to vector<8x128xi1>
    %682 = arith.select %681, %656, %577 : vector<8x128xi1>, vector<8x128xf32>
    %c6_i32 = arith.constant 6 : i32
    %c7_i32_233 = arith.constant 7 : i32
    %683 = arith.subi %c7_i32_233, %c6_i32 : i32
    %c8_i32_234 = arith.constant 8 : i32
    %684 = arith.muli %c6_i32, %c8_i32_234 : i32
    %685 = tpu.assume_multiple %684, 8 : i32
    %c8_i32_235 = arith.constant 8 : i32
    %686 = arith.muli %683, %c8_i32_235 : i32
    %687 = tpu.assume_multiple %686, 8 : i32
    %688 = arith.index_cast %685 : i32 to index
    %c0_236 = arith.constant 0 : index
    %689 = vector.load %arg21[%688, %c0_236] : memref<64x384xf32, #tpu.memory_space<vmem>>, vector<8x384xf32>
    %690 = arith.index_cast %687 : i32 to index
    %c0_237 = arith.constant 0 : index
    %691 = vector.load %arg22[%690, %c0_237] : memref<64x384xf32, #tpu.memory_space<vmem>>, vector<8x384xf32>
    %692 = arith.truncf %679 : vector<8x128xf32> to vector<8x128xbf16>
    %c0_238 = arith.constant 0 : index
    %c0_239 = arith.constant 0 : index
    %693 = vector.load %arg15[%c0_238, %c0_239] : memref<128x384xbf16, #tpu.memory_space<vmem>>, vector<128x384xbf16>
    %cst_240 = arith.constant dense<0.000000e+00> : vector<8x384xf32>
    %694 = tpu.matmul %692, %693, %cst_240 {dimension_numbers = #tpu.dot_dimension_numbers<[1], [0], [0], [1], [0, 0, 1, 1], [], []>} : vector<8x128xbf16>, vector<128x384xbf16>, vector<8x384xf32> -> vector<8x384xf32>
    %695 = vector.broadcast %51 : vector<1x384xf32> to vector<8x384xf32>
    %696 = arith.addf %694, %695 : vector<8x384xf32>
    %697 = vector.extract_strided_slice %689 {offsets = [0, 0], sizes = [8, 128], strides = [1, 1]} : vector<8x384xf32> to vector<8x128xf32>
    %698 = vector.extract_strided_slice %696 {offsets = [0, 0], sizes = [8, 128], strides = [1, 1]} : vector<8x384xf32> to vector<8x128xf32>
    %699 = arith.addf %697, %698 : vector<8x128xf32>
    %cst_241 = arith.constant 5.000000e-01 : f32
    %700 = vector.broadcast %cst_241 : f32 to vector<8x128xf32>
    %701 = arith.mulf %700, %699 : vector<8x128xf32>
    %702 = math.tanh %701 : vector<8x128xf32>
    %cst_242 = arith.constant 5.000000e-01 : f32
    %703 = vector.broadcast %cst_242 : f32 to vector<8x128xf32>
    %704 = arith.mulf %703, %702 : vector<8x128xf32>
    %cst_243 = arith.constant 5.000000e-01 : f32
    %705 = vector.broadcast %cst_243 : f32 to vector<8x128xf32>
    %706 = arith.addf %704, %705 : vector<8x128xf32>
    %707 = vector.extract_strided_slice %689 {offsets = [0, 128], sizes = [8, 128], strides = [1, 1]} : vector<8x384xf32> to vector<8x128xf32>
    %708 = vector.extract_strided_slice %696 {offsets = [0, 128], sizes = [8, 128], strides = [1, 1]} : vector<8x384xf32> to vector<8x128xf32>
    %709 = arith.addf %707, %708 : vector<8x128xf32>
    %cst_244 = arith.constant 5.000000e-01 : f32
    %710 = vector.broadcast %cst_244 : f32 to vector<8x128xf32>
    %711 = arith.mulf %710, %709 : vector<8x128xf32>
    %712 = math.tanh %711 : vector<8x128xf32>
    %cst_245 = arith.constant 5.000000e-01 : f32
    %713 = vector.broadcast %cst_245 : f32 to vector<8x128xf32>
    %714 = arith.mulf %713, %712 : vector<8x128xf32>
    %cst_246 = arith.constant 5.000000e-01 : f32
    %715 = vector.broadcast %cst_246 : f32 to vector<8x128xf32>
    %716 = arith.addf %714, %715 : vector<8x128xf32>
    %717 = vector.extract_strided_slice %689 {offsets = [0, 256], sizes = [8, 128], strides = [1, 1]} : vector<8x384xf32> to vector<8x128xf32>
    %718 = vector.extract_strided_slice %696 {offsets = [0, 256], sizes = [8, 128], strides = [1, 1]} : vector<8x384xf32> to vector<8x128xf32>
    %719 = arith.mulf %706, %718 : vector<8x128xf32>
    %720 = arith.addf %717, %719 : vector<8x128xf32>
    %721 = math.tanh %720 : vector<8x128xf32>
    %cst_247 = arith.constant 1.000000e+00 : f32
    %722 = vector.broadcast %cst_247 : f32 to vector<8x128xf32>
    %723 = arith.subf %722, %716 : vector<8x128xf32>
    %724 = arith.mulf %723, %721 : vector<8x128xf32>
    %725 = arith.mulf %716, %679 : vector<8x128xf32>
    %726 = arith.addf %724, %725 : vector<8x128xf32>
    %727 = arith.truncf %682 : vector<8x128xf32> to vector<8x128xbf16>
    %c0_248 = arith.constant 0 : index
    %c0_249 = arith.constant 0 : index
    %728 = vector.load %arg16[%c0_248, %c0_249] : memref<128x384xbf16, #tpu.memory_space<vmem>>, vector<128x384xbf16>
    %cst_250 = arith.constant dense<0.000000e+00> : vector<8x384xf32>
    %729 = tpu.matmul %727, %728, %cst_250 {dimension_numbers = #tpu.dot_dimension_numbers<[1], [0], [0], [1], [0, 0, 1, 1], [], []>} : vector<8x128xbf16>, vector<128x384xbf16>, vector<8x384xf32> -> vector<8x384xf32>
    %730 = vector.broadcast %52 : vector<1x384xf32> to vector<8x384xf32>
    %731 = arith.addf %729, %730 : vector<8x384xf32>
    %732 = vector.extract_strided_slice %691 {offsets = [0, 0], sizes = [8, 128], strides = [1, 1]} : vector<8x384xf32> to vector<8x128xf32>
    %733 = vector.extract_strided_slice %731 {offsets = [0, 0], sizes = [8, 128], strides = [1, 1]} : vector<8x384xf32> to vector<8x128xf32>
    %734 = arith.addf %732, %733 : vector<8x128xf32>
    %cst_251 = arith.constant 5.000000e-01 : f32
    %735 = vector.broadcast %cst_251 : f32 to vector<8x128xf32>
    %736 = arith.mulf %735, %734 : vector<8x128xf32>
    %737 = math.tanh %736 : vector<8x128xf32>
    %cst_252 = arith.constant 5.000000e-01 : f32
    %738 = vector.broadcast %cst_252 : f32 to vector<8x128xf32>
    %739 = arith.mulf %738, %737 : vector<8x128xf32>
    %cst_253 = arith.constant 5.000000e-01 : f32
    %740 = vector.broadcast %cst_253 : f32 to vector<8x128xf32>
    %741 = arith.addf %739, %740 : vector<8x128xf32>
    %742 = vector.extract_strided_slice %691 {offsets = [0, 128], sizes = [8, 128], strides = [1, 1]} : vector<8x384xf32> to vector<8x128xf32>
    %743 = vector.extract_strided_slice %731 {offsets = [0, 128], sizes = [8, 128], strides = [1, 1]} : vector<8x384xf32> to vector<8x128xf32>
    %744 = arith.addf %742, %743 : vector<8x128xf32>
    %cst_254 = arith.constant 5.000000e-01 : f32
    %745 = vector.broadcast %cst_254 : f32 to vector<8x128xf32>
    %746 = arith.mulf %745, %744 : vector<8x128xf32>
    %747 = math.tanh %746 : vector<8x128xf32>
    %cst_255 = arith.constant 5.000000e-01 : f32
    %748 = vector.broadcast %cst_255 : f32 to vector<8x128xf32>
    %749 = arith.mulf %748, %747 : vector<8x128xf32>
    %cst_256 = arith.constant 5.000000e-01 : f32
    %750 = vector.broadcast %cst_256 : f32 to vector<8x128xf32>
    %751 = arith.addf %749, %750 : vector<8x128xf32>
    %752 = vector.extract_strided_slice %691 {offsets = [0, 256], sizes = [8, 128], strides = [1, 1]} : vector<8x384xf32> to vector<8x128xf32>
    %753 = vector.extract_strided_slice %731 {offsets = [0, 256], sizes = [8, 128], strides = [1, 1]} : vector<8x384xf32> to vector<8x128xf32>
    %754 = arith.mulf %741, %753 : vector<8x128xf32>
    %755 = arith.addf %752, %754 : vector<8x128xf32>
    %756 = math.tanh %755 : vector<8x128xf32>
    %cst_257 = arith.constant 1.000000e+00 : f32
    %757 = vector.broadcast %cst_257 : f32 to vector<8x128xf32>
    %758 = arith.subf %757, %751 : vector<8x128xf32>
    %759 = arith.mulf %758, %756 : vector<8x128xf32>
    %760 = arith.mulf %751, %682 : vector<8x128xf32>
    %761 = arith.addf %759, %760 : vector<8x128xf32>
    %762 = vector.broadcast %c6_i32 : i32 to vector<8x1xi32>
    %763 = arith.cmpi sgt, %50, %762 : vector<8x1xi32>
    %764 = vector.broadcast %683 : i32 to vector<8x1xi32>
    %765 = arith.cmpi sgt, %50, %764 : vector<8x1xi32>
    %cst_258 = arith.constant 0.000000e+00 : f32
    %766 = vector.shape_cast %763 : vector<8x1xi1> to vector<8x1xi1>
    %767 = vector.broadcast %766 : vector<8x1xi1> to vector<8x128xi1>
    %768 = vector.broadcast %cst_258 : f32 to vector<8x128xf32>
    %769 = arith.select %767, %726, %768 : vector<8x128xi1>, vector<8x128xf32>
    %770 = arith.index_cast %c6_i32 : i32 to index
    %c0_259 = arith.constant 0 : index
    %c0_260 = arith.constant 0 : index
    %771 = vector.load %arg19[%770, %c0_259, %c0_260] : memref<8x8x256xf32, #tpu.memory_space<vmem>>, vector<1x8x128xf32>
    %772 = vector.shape_cast %771 : vector<1x8x128xf32> to vector<8x128xf32>
    %773 = vector.shape_cast %769 : vector<8x128xf32> to vector<1x8x128xf32>
    tpu.vector_store %arg19[%770, %c0_259, %c0_260], %773 {strides = array<i32>} : memref<8x8x256xf32, #tpu.memory_space<vmem>>, vector<1x8x128xf32>,
    %cst_261 = arith.constant 0.000000e+00 : f32
    %774 = vector.shape_cast %765 : vector<8x1xi1> to vector<8x1xi1>
    %775 = vector.broadcast %774 : vector<8x1xi1> to vector<8x128xi1>
    %776 = vector.broadcast %cst_261 : f32 to vector<8x128xf32>
    %777 = arith.select %775, %761, %776 : vector<8x128xi1>, vector<8x128xf32>
    %778 = arith.index_cast %683 : i32 to index
    %c0_262 = arith.constant 0 : index
    %c128_263 = arith.constant 128 : index
    %779 = vector.load %arg19[%778, %c0_262, %c128_263] : memref<8x8x256xf32, #tpu.memory_space<vmem>>, vector<1x8x128xf32>
    %780 = vector.shape_cast %779 : vector<1x8x128xf32> to vector<8x128xf32>
    %781 = vector.shape_cast %777 : vector<8x128xf32> to vector<1x8x128xf32>
    tpu.vector_store %arg19[%778, %c0_262, %c128_263], %781 {strides = array<i32>} : memref<8x8x256xf32, #tpu.memory_space<vmem>>, vector<1x8x128xf32>,
    %782 = vector.shape_cast %763 : vector<8x1xi1> to vector<8x1xi1>
    %783 = vector.broadcast %782 : vector<8x1xi1> to vector<8x128xi1>
    %784 = arith.select %783, %726, %679 : vector<8x128xi1>, vector<8x128xf32>
    %785 = vector.shape_cast %765 : vector<8x1xi1> to vector<8x1xi1>
    %786 = vector.broadcast %785 : vector<8x1xi1> to vector<8x128xi1>
    %787 = arith.select %786, %761, %682 : vector<8x128xi1>, vector<8x128xf32>
    %c7_i32_264 = arith.constant 7 : i32
    %c7_i32_265 = arith.constant 7 : i32
    %788 = arith.subi %c7_i32_265, %c7_i32_264 : i32
    %c8_i32_266 = arith.constant 8 : i32
    %789 = arith.muli %c7_i32_264, %c8_i32_266 : i32
    %790 = tpu.assume_multiple %789, 8 : i32
    %c8_i32_267 = arith.constant 8 : i32
    %791 = arith.muli %788, %c8_i32_267 : i32
    %792 = tpu.assume_multiple %791, 8 : i32
    %793 = arith.index_cast %790 : i32 to index
    %c0_268 = arith.constant 0 : index
    %794 = vector.load %arg21[%793, %c0_268] : memref<64x384xf32, #tpu.memory_space<vmem>>, vector<8x384xf32>
    %795 = arith.index_cast %792 : i32 to index
    %c0_269 = arith.constant 0 : index
    %796 = vector.load %arg22[%795, %c0_269] : memref<64x384xf32, #tpu.memory_space<vmem>>, vector<8x384xf32>
    %797 = arith.truncf %784 : vector<8x128xf32> to vector<8x128xbf16>
    %c0_270 = arith.constant 0 : index
    %c0_271 = arith.constant 0 : index
    %798 = vector.load %arg15[%c0_270, %c0_271] : memref<128x384xbf16, #tpu.memory_space<vmem>>, vector<128x384xbf16>
    %cst_272 = arith.constant dense<0.000000e+00> : vector<8x384xf32>
    %799 = tpu.matmul %797, %798, %cst_272 {dimension_numbers = #tpu.dot_dimension_numbers<[1], [0], [0], [1], [0, 0, 1, 1], [], []>} : vector<8x128xbf16>, vector<128x384xbf16>, vector<8x384xf32> -> vector<8x384xf32>
    %800 = vector.broadcast %51 : vector<1x384xf32> to vector<8x384xf32>
    %801 = arith.addf %799, %800 : vector<8x384xf32>
    %802 = vector.extract_strided_slice %794 {offsets = [0, 0], sizes = [8, 128], strides = [1, 1]} : vector<8x384xf32> to vector<8x128xf32>
    %803 = vector.extract_strided_slice %801 {offsets = [0, 0], sizes = [8, 128], strides = [1, 1]} : vector<8x384xf32> to vector<8x128xf32>
    %804 = arith.addf %802, %803 : vector<8x128xf32>
    %cst_273 = arith.constant 5.000000e-01 : f32
    %805 = vector.broadcast %cst_273 : f32 to vector<8x128xf32>
    %806 = arith.mulf %805, %804 : vector<8x128xf32>
    %807 = math.tanh %806 : vector<8x128xf32>
    %cst_274 = arith.constant 5.000000e-01 : f32
    %808 = vector.broadcast %cst_274 : f32 to vector<8x128xf32>
    %809 = arith.mulf %808, %807 : vector<8x128xf32>
    %cst_275 = arith.constant 5.000000e-01 : f32
    %810 = vector.broadcast %cst_275 : f32 to vector<8x128xf32>
    %811 = arith.addf %809, %810 : vector<8x128xf32>
    %812 = vector.extract_strided_slice %794 {offsets = [0, 128], sizes = [8, 128], strides = [1, 1]} : vector<8x384xf32> to vector<8x128xf32>
    %813 = vector.extract_strided_slice %801 {offsets = [0, 128], sizes = [8, 128], strides = [1, 1]} : vector<8x384xf32> to vector<8x128xf32>
    %814 = arith.addf %812, %813 : vector<8x128xf32>
    %cst_276 = arith.constant 5.000000e-01 : f32
    %815 = vector.broadcast %cst_276 : f32 to vector<8x128xf32>
    %816 = arith.mulf %815, %814 : vector<8x128xf32>
    %817 = math.tanh %816 : vector<8x128xf32>
    %cst_277 = arith.constant 5.000000e-01 : f32
    %818 = vector.broadcast %cst_277 : f32 to vector<8x128xf32>
    %819 = arith.mulf %818, %817 : vector<8x128xf32>
    %cst_278 = arith.constant 5.000000e-01 : f32
    %820 = vector.broadcast %cst_278 : f32 to vector<8x128xf32>
    %821 = arith.addf %819, %820 : vector<8x128xf32>
    %822 = vector.extract_strided_slice %794 {offsets = [0, 256], sizes = [8, 128], strides = [1, 1]} : vector<8x384xf32> to vector<8x128xf32>
    %823 = vector.extract_strided_slice %801 {offsets = [0, 256], sizes = [8, 128], strides = [1, 1]} : vector<8x384xf32> to vector<8x128xf32>
    %824 = arith.mulf %811, %823 : vector<8x128xf32>
    %825 = arith.addf %822, %824 : vector<8x128xf32>
    %826 = math.tanh %825 : vector<8x128xf32>
    %cst_279 = arith.constant 1.000000e+00 : f32
    %827 = vector.broadcast %cst_279 : f32 to vector<8x128xf32>
    %828 = arith.subf %827, %821 : vector<8x128xf32>
    %829 = arith.mulf %828, %826 : vector<8x128xf32>
    %830 = arith.mulf %821, %784 : vector<8x128xf32>
    %831 = arith.addf %829, %830 : vector<8x128xf32>
    %832 = arith.truncf %787 : vector<8x128xf32> to vector<8x128xbf16>
    %c0_280 = arith.constant 0 : index
    %c0_281 = arith.constant 0 : index
    %833 = vector.load %arg16[%c0_280, %c0_281] : memref<128x384xbf16, #tpu.memory_space<vmem>>, vector<128x384xbf16>
    %cst_282 = arith.constant dense<0.000000e+00> : vector<8x384xf32>
    %834 = tpu.matmul %832, %833, %cst_282 {dimension_numbers = #tpu.dot_dimension_numbers<[1], [0], [0], [1], [0, 0, 1, 1], [], []>} : vector<8x128xbf16>, vector<128x384xbf16>, vector<8x384xf32> -> vector<8x384xf32>
    %835 = vector.broadcast %52 : vector<1x384xf32> to vector<8x384xf32>
    %836 = arith.addf %834, %835 : vector<8x384xf32>
    %837 = vector.extract_strided_slice %796 {offsets = [0, 0], sizes = [8, 128], strides = [1, 1]} : vector<8x384xf32> to vector<8x128xf32>
    %838 = vector.extract_strided_slice %836 {offsets = [0, 0], sizes = [8, 128], strides = [1, 1]} : vector<8x384xf32> to vector<8x128xf32>
    %839 = arith.addf %837, %838 : vector<8x128xf32>
    %cst_283 = arith.constant 5.000000e-01 : f32
    %840 = vector.broadcast %cst_283 : f32 to vector<8x128xf32>
    %841 = arith.mulf %840, %839 : vector<8x128xf32>
    %842 = math.tanh %841 : vector<8x128xf32>
    %cst_284 = arith.constant 5.000000e-01 : f32
    %843 = vector.broadcast %cst_284 : f32 to vector<8x128xf32>
    %844 = arith.mulf %843, %842 : vector<8x128xf32>
    %cst_285 = arith.constant 5.000000e-01 : f32
    %845 = vector.broadcast %cst_285 : f32 to vector<8x128xf32>
    %846 = arith.addf %844, %845 : vector<8x128xf32>
    %847 = vector.extract_strided_slice %796 {offsets = [0, 128], sizes = [8, 128], strides = [1, 1]} : vector<8x384xf32> to vector<8x128xf32>
    %848 = vector.extract_strided_slice %836 {offsets = [0, 128], sizes = [8, 128], strides = [1, 1]} : vector<8x384xf32> to vector<8x128xf32>
    %849 = arith.addf %847, %848 : vector<8x128xf32>
    %cst_286 = arith.constant 5.000000e-01 : f32
    %850 = vector.broadcast %cst_286 : f32 to vector<8x128xf32>
    %851 = arith.mulf %850, %849 : vector<8x128xf32>
    %852 = math.tanh %851 : vector<8x128xf32>
    %cst_287 = arith.constant 5.000000e-01 : f32
    %853 = vector.broadcast %cst_287 : f32 to vector<8x128xf32>
    %854 = arith.mulf %853, %852 : vector<8x128xf32>
    %cst_288 = arith.constant 5.000000e-01 : f32
    %855 = vector.broadcast %cst_288 : f32 to vector<8x128xf32>
    %856 = arith.addf %854, %855 : vector<8x128xf32>
    %857 = vector.extract_strided_slice %796 {offsets = [0, 256], sizes = [8, 128], strides = [1, 1]} : vector<8x384xf32> to vector<8x128xf32>
    %858 = vector.extract_strided_slice %836 {offsets = [0, 256], sizes = [8, 128], strides = [1, 1]} : vector<8x384xf32> to vector<8x128xf32>
    %859 = arith.mulf %846, %858 : vector<8x128xf32>
    %860 = arith.addf %857, %859 : vector<8x128xf32>
    %861 = math.tanh %860 : vector<8x128xf32>
    %cst_289 = arith.constant 1.000000e+00 : f32
    %862 = vector.broadcast %cst_289 : f32 to vector<8x128xf32>
    %863 = arith.subf %862, %856 : vector<8x128xf32>
    %864 = arith.mulf %863, %861 : vector<8x128xf32>
    %865 = arith.mulf %856, %787 : vector<8x128xf32>
    %866 = arith.addf %864, %865 : vector<8x128xf32>
    %867 = vector.broadcast %c7_i32_264 : i32 to vector<8x1xi32>
    %868 = arith.cmpi sgt, %50, %867 : vector<8x1xi32>
    %869 = vector.broadcast %788 : i32 to vector<8x1xi32>
    %870 = arith.cmpi sgt, %50, %869 : vector<8x1xi32>
    %cst_290 = arith.constant 0.000000e+00 : f32
    %871 = vector.shape_cast %868 : vector<8x1xi1> to vector<8x1xi1>
    %872 = vector.broadcast %871 : vector<8x1xi1> to vector<8x128xi1>
    %873 = vector.broadcast %cst_290 : f32 to vector<8x128xf32>
    %874 = arith.select %872, %831, %873 : vector<8x128xi1>, vector<8x128xf32>
    %875 = arith.index_cast %c7_i32_264 : i32 to index
    %c0_291 = arith.constant 0 : index
    %c0_292 = arith.constant 0 : index
    %876 = vector.load %arg19[%875, %c0_291, %c0_292] : memref<8x8x256xf32, #tpu.memory_space<vmem>>, vector<1x8x128xf32>
    %877 = vector.shape_cast %876 : vector<1x8x128xf32> to vector<8x128xf32>
    %878 = vector.shape_cast %874 : vector<8x128xf32> to vector<1x8x128xf32>
    tpu.vector_store %arg19[%875, %c0_291, %c0_292], %878 {strides = array<i32>} : memref<8x8x256xf32, #tpu.memory_space<vmem>>, vector<1x8x128xf32>,
    %cst_293 = arith.constant 0.000000e+00 : f32
    %879 = vector.shape_cast %870 : vector<8x1xi1> to vector<8x1xi1>
    %880 = vector.broadcast %879 : vector<8x1xi1> to vector<8x128xi1>
    %881 = vector.broadcast %cst_293 : f32 to vector<8x128xf32>
    %882 = arith.select %880, %866, %881 : vector<8x128xi1>, vector<8x128xf32>
    %883 = arith.index_cast %788 : i32 to index
    %c0_294 = arith.constant 0 : index
    %c128_295 = arith.constant 128 : index
    %884 = vector.load %arg19[%883, %c0_294, %c128_295] : memref<8x8x256xf32, #tpu.memory_space<vmem>>, vector<1x8x128xf32>
    %885 = vector.shape_cast %884 : vector<1x8x128xf32> to vector<8x128xf32>
    %886 = vector.shape_cast %882 : vector<8x128xf32> to vector<1x8x128xf32>
    tpu.vector_store %arg19[%883, %c0_294, %c128_295], %886 {strides = array<i32>} : memref<8x8x256xf32, #tpu.memory_space<vmem>>, vector<1x8x128xf32>,
    %887 = vector.shape_cast %868 : vector<8x1xi1> to vector<8x1xi1>
    %888 = vector.broadcast %887 : vector<8x1xi1> to vector<8x128xi1>
    %889 = arith.select %888, %831, %784 : vector<8x128xi1>, vector<8x128xf32>
    %890 = vector.shape_cast %870 : vector<8x1xi1> to vector<8x1xi1>
    %891 = vector.broadcast %890 : vector<8x1xi1> to vector<8x128xi1>
    %892 = arith.select %891, %866, %787 : vector<8x128xi1>, vector<8x128xf32>
    %c8_i32_296 = arith.constant 8 : i32
    %c0_297 = arith.constant 0 : index
    %c0_298 = arith.constant 0 : index
    %c0_299 = arith.constant 0 : index
    %893 = vector.load %arg20[%c0_297, %c0_298, %c0_299] : memref<2x8x128xf32, #tpu.memory_space<vmem>>, vector<1x8x128xf32>
    %894 = vector.shape_cast %893 : vector<1x8x128xf32> to vector<8x128xf32>
    %895 = vector.shape_cast %889 : vector<8x128xf32> to vector<1x8x128xf32>
    tpu.vector_store %arg20[%c0_297, %c0_298, %c0_299], %895 {strides = array<i32>} : memref<2x8x128xf32, #tpu.memory_space<vmem>>, vector<1x8x128xf32>,
    %c1 = arith.constant 1 : index
    %c0_300 = arith.constant 0 : index
    %c0_301 = arith.constant 0 : index
    %896 = vector.load %arg20[%c1, %c0_300, %c0_301] : memref<2x8x128xf32, #tpu.memory_space<vmem>>, vector<1x8x128xf32>
    %897 = vector.shape_cast %896 : vector<1x8x128xf32> to vector<8x128xf32>
    %898 = vector.shape_cast %892 : vector<8x128xf32> to vector<1x8x128xf32>
    tpu.vector_store %arg20[%c1, %c0_300, %c0_301], %898 {strides = array<i32>} : memref<2x8x128xf32, #tpu.memory_space<vmem>>, vector<1x8x128xf32>,
    return
  }
  func.func @transform_0(%arg0: i32) -> (i32, i32, i32) {
    %c0_i32 = arith.constant 0 : i32
    %c0_i32_0 = arith.constant 0 : i32
    %c0_i32_1 = arith.constant 0 : i32
    return %arg0, %c0_i32, %c0_i32_0 : i32, i32, i32
  }
  func.func @transform_1(%arg0: i32) -> (i32, i32) {
    %c0_i32 = arith.constant 0 : i32
    %c0_i32_0 = arith.constant 0 : i32
    return %arg0, %c0_i32 : i32, i32
  }
  func.func @transform_2(%arg0: i32) -> (i32, i32) {
    %c0_i32 = arith.constant 0 : i32
    %c0_i32_0 = arith.constant 0 : i32
    return %arg0, %c0_i32 : i32, i32
  }
  func.func @transform_3(%arg0: i32) -> (i32, i32) {
    %c0_i32 = arith.constant 0 : i32
    %c0_i32_0 = arith.constant 0 : i32
    return %arg0, %c0_i32 : i32, i32
  }
  func.func @transform_4(%arg0: i32) -> (i32, i32) {
    %c0_i32 = arith.constant 0 : i32
    %c0_i32_0 = arith.constant 0 : i32
    %c0_i32_1 = arith.constant 0 : i32
    return %c0_i32, %c0_i32_0 : i32, i32
  }
  func.func @transform_5(%arg0: i32) -> (i32, i32) {
    %c0_i32 = arith.constant 0 : i32
    %c0_i32_0 = arith.constant 0 : i32
    %c0_i32_1 = arith.constant 0 : i32
    return %c0_i32, %c0_i32_0 : i32, i32
  }
  func.func @transform_6(%arg0: i32) -> (i32, i32) {
    %c0_i32 = arith.constant 0 : i32
    %c0_i32_0 = arith.constant 0 : i32
    %c0_i32_1 = arith.constant 0 : i32
    return %c0_i32, %c0_i32_0 : i32, i32
  }
  func.func @transform_7(%arg0: i32) -> (i32, i32) {
    %c0_i32 = arith.constant 0 : i32
    %c0_i32_0 = arith.constant 0 : i32
    %c0_i32_1 = arith.constant 0 : i32
    return %c0_i32, %c0_i32_0 : i32, i32
  }
  func.func @transform_8(%arg0: i32) -> (i32, i32) {
    %c0_i32 = arith.constant 0 : i32
    %c0_i32_0 = arith.constant 0 : i32
    %c0_i32_1 = arith.constant 0 : i32
    return %c0_i32, %c0_i32_0 : i32, i32
  }
  func.func @transform_9(%arg0: i32) -> (i32, i32) {
    %c0_i32 = arith.constant 0 : i32
    %c0_i32_0 = arith.constant 0 : i32
    %c0_i32_1 = arith.constant 0 : i32
    return %c0_i32, %c0_i32_0 : i32, i32
  }
  func.func @transform_10(%arg0: i32) -> (i32, i32) {
    %c0_i32 = arith.constant 0 : i32
    %c0_i32_0 = arith.constant 0 : i32
    %c0_i32_1 = arith.constant 0 : i32
    return %c0_i32, %c0_i32_0 : i32, i32
  }
  func.func @transform_11(%arg0: i32) -> (i32, i32) {
    %c0_i32 = arith.constant 0 : i32
    %c0_i32_0 = arith.constant 0 : i32
    %c0_i32_1 = arith.constant 0 : i32
    return %c0_i32, %c0_i32_0 : i32, i32
  }
  func.func @transform_12(%arg0: i32) -> (i32, i32) {
    %c0_i32 = arith.constant 0 : i32
    %c0_i32_0 = arith.constant 0 : i32
    %c0_i32_1 = arith.constant 0 : i32
    return %c0_i32, %c0_i32_0 : i32, i32
  }
  func.func @transform_13(%arg0: i32) -> (i32, i32) {
    %c0_i32 = arith.constant 0 : i32
    %c0_i32_0 = arith.constant 0 : i32
    %c0_i32_1 = arith.constant 0 : i32
    return %c0_i32, %c0_i32_0 : i32, i32
  }
  func.func @transform_14(%arg0: i32) -> (i32, i32) {
    %c0_i32 = arith.constant 0 : i32
    %c0_i32_0 = arith.constant 0 : i32
    %c0_i32_1 = arith.constant 0 : i32
    return %c0_i32, %c0_i32_0 : i32, i32
  }
  func.func @transform_15(%arg0: i32) -> (i32, i32) {
    %c0_i32 = arith.constant 0 : i32
    %c0_i32_0 = arith.constant 0 : i32
    %c0_i32_1 = arith.constant 0 : i32
    return %c0_i32, %c0_i32_0 : i32, i32
  }
  func.func @transform_16(%arg0: i32) -> (i32, i32) {
    %c0_i32 = arith.constant 0 : i32
    %c0_i32_0 = arith.constant 0 : i32
    %c0_i32_1 = arith.constant 0 : i32
    return %c0_i32, %c0_i32_0 : i32, i32
  }
  func.func @transform_17(%arg0: i32) -> (i32, i32) {
    %c0_i32 = arith.constant 0 : i32
    %c0_i32_0 = arith.constant 0 : i32
    %c0_i32_1 = arith.constant 0 : i32
    return %c0_i32, %c0_i32_0 : i32, i32
  }
  func.func @transform_18(%arg0: i32) -> (i32, i32, i32) {
    %c0_i32 = arith.constant 0 : i32
    %c0_i32_0 = arith.constant 0 : i32
    %c0_i32_1 = arith.constant 0 : i32
    return %c0_i32, %arg0, %c0_i32_0 : i32, i32, i32
  }
  func.func @transform_19(%arg0: i32) -> (i32, i32, i32) {
    %c0_i32 = arith.constant 0 : i32
    %c0_i32_0 = arith.constant 0 : i32
    %c0_i32_1 = arith.constant 0 : i32
    return %c0_i32, %arg0, %c0_i32_0 : i32, i32, i32
  }
}

</mosaic_0001>

<bundles_post_ra>
// kernel: encoder_gru_forward.1
= control target key start
LH: loop header
LB: loop body
LE: loop exit
PB: predicated region body
PF: predicated region fallthrough
CT: control target
= control target key end

     0   :  { %s9103_s0 = inlined_call_operand.vmem [shape: s32[1,64,1], index: 0, kind: input, shape index: {}]   ;;  %s9104_s1 = inlined_call_operand.vmem [shape: s32[8,1], index: 1, kind: input, shape index: {}]   ;;  %s9105_s2 = inlined_call_operand.vmem [shape: f32[8,96], index: 2, kind: input, shape index: {}]   ;;  %s9106_s3 = inlined_call_operand.vmem [shape: f32[8,16], index: 3, kind: input, shape index: {}]   ;;  %s9107_s4 = inlined_call_operand.hbm [shape: bf16[128,128], index: 4, kind: input, shape index: {}]   ;;  %s9108_s5 = inlined_call_operand.hbm [shape: f32[96,128], index: 5, kind: input, shape index: {}]   ;;  %s9109_s6 = inlined_call_operand.vmem [shape: f32[1,128], index: 6, kind: input, shape index: {}]   ;;  %s9110_s7 = inlined_call_operand.vmem [shape: f32[16,128], index: 7, kind: input, shape index: {}]   ;;  %s9111_s8 = inlined_call_operand.vmem [shape: f32[1,128], index: 8, kind: input, shape index: {}]   ;;  %s9112_s9 = inlined_call_operand.vmem [shape: f32[128,128], index: 9, kind: input, shape index: {}]   ;;  %s9113_s10 = inlined_call_operand.hbm [shape: f32[128,128], index: 10, kind: input, shape index: {}]   ;;  %s9114_s11 = inlined_call_operand.vmem [shape: f32[1,128], index: 11, kind: input, shape index: {}]   ;;  %s9115_s12 = inlined_call_operand.hbm [shape: bf16[128,768], index: 12, kind: input, shape index: {}]   ;;  %s9116_s13 = inlined_call_operand.vmem [shape: f32[1,768], index: 13, kind: input, shape index: {}]   ;;  %s9117_s14 = inlined_call_operand.hbm [shape: bf16[128,384], index: 14, kind: input, shape index: {}]   ;;  %s9118_s15 = inlined_call_operand.hbm [shape: bf16[128,384], index: 15, kind: input, shape index: {}]   ;;  %s9119_s16 = inlined_call_operand.vmem [shape: f32[1,384], index: 16, kind: input, shape index: {}]   ;;  %s9120_s17 = inlined_call_operand.vmem [shape: f32[1,384], index: 17, kind: input, shape index: {}]   ;;  %s9121_s18 = inlined_call_operand.vmem [shape: f32[8,8,256], index: 18, kind: output, shape index: {0}]   ;;  %s9122_s19 = inlined_call_operand.vmem [shape: f32[2,8,128], index: 19, kind: output, shape index: {1}]  }
   0x1   :  { %9142 = sst [smem:[#allocation55_spill]] %s9103_s0 }
   0x2   :  { %9143 = sst [smem:[#allocation56_spill]] %s9104_s1 }
   0x3   :  { %9144 = sst [smem:[#allocation57_spill]] %s9105_s2 }
   0x4   :  { %9145 = sst [smem:[#allocation58_spill]] %s9106_s3 }
   0x5   :  { %25 = vsyncpa [#allocation5], 0 }
   0x6   :  { %26 = vsyncpa [#allocation7], 0 }
   0x7   :  { %27 = vsyncpa [#allocation10], 0 }
   0x8   :  { %28 = vsyncpa [#allocation13], 0  ;;  %s7632_s0 = smov [#allocation6]   ;;  %s7492_s1 = scalar_lea.hbm %s9108_s5, 1536 }
   0x9   :  { %s54_s30 = sshll.u32 %s7632_s0, 4  ;;  %p7493_p0 = scmp.ne.s32.totalorder %s9108_s5, %s7492_s1  ;;  %s55_s30 = int_to_ptr.vmem [resolvable:$true] %s54_s30 }
   0xa   :  { %p7496_p1 = scmp.lt.u32.totalorder %s7492_s1, %s9108_s5 }
   0xc   :  { %p7498_p2 = pnand %p7496_p1, %p7493_p0 }
   0xe   :  { %7501 = shalt.err (!%p7498_p2)
}
   0xf   :  { %s7502_s25 = scalar_lea.vmem %s55_s30, 1536  ;;  %p7507_p4 = scmp.lt.s32.totalorder %s55_s30, %s55_s30 }
  0x10   :  { %p7503_p3 = scmp.ne.s32.totalorder %s55_s30, %s7502_s25  ;;  %p7508_p5 = scmp.lt.s32.totalorder %s7502_s25, %s7502_s25 }
  0x12   :  { %p7509_p6 = por %p7508_p5, %p7507_p4 }
  0x14   :  { %p7510_p7 = pnand %p7509_p6, %p7503_p3 }
  0x16   :  { %7513 = shalt.err (!%p7510_p7)
}
  0x17   :  { %s9124_s3 = smov 128   ;;  %s7634_s26 = smov 8  }
  0x18   :  { %60 = dma.hbm_to_vmem [thread:$0]  %s9108_s5, 1536, %s55_s30, [#allocation7], %s9124_s3, %s9124_s3, %s7634_s26  }
  0x19   :  { %s7635_s29 = smov [#allocation9]   ;;  %s7514_s1 = scalar_lea.hbm %s9115_s12, 6144 }
  0x1a   :  { %s88_s0 = sshll.u32 %s7635_s29, 4  ;;  %p7515_p8 = scmp.ne.s32.totalorder %s9115_s12, %s7514_s1  ;;  %s89_s0 = int_to_ptr.vmem [resolvable:$true] %s88_s0 }
  0x1b   :  { %p7518_p9 = scmp.lt.u32.totalorder %s7514_s1, %s9115_s12 }
  0x1d   :  { %p7520_p10 = pnand %p7518_p9, %p7515_p8 }
  0x1f   :  { %7523 = shalt.err (!%p7520_p10)
}
  0x20   :  { %s7524_s25 = scalar_lea.vmem %s89_s0, 6144  ;;  %p7529_p12 = scmp.lt.s32.totalorder %s89_s0, %s89_s0 }
  0x21   :  { %p7525_p11 = scmp.ne.s32.totalorder %s89_s0, %s7524_s25  ;;  %p7530_p13 = scmp.lt.s32.totalorder %s7524_s25, %s7524_s25 }
  0x23   :  { %p7531_p0 = por %p7530_p13, %p7529_p12 }
  0x25   :  { %p7532_p1 = pnand %p7531_p0, %p7525_p11 }
  0x27   :  { %7535 = shalt.err (!%p7532_p1)
}
  0x28   :  { %s7636_s5 = smov 384   ;;  %s7637_s30 = smov 24  }
  0x29   :  { %94 = dma.hbm_to_vmem [thread:$0]  %s9115_s12, 6144, %s89_s0, [#allocation10], %s7636_s5, %s7636_s5, %s7637_s30  }
  0x2a   :  { %s7638_s29 = smov [#allocation4]   ;;  %s7536_s22 = scalar_lea.hbm %s9107_s4, 1024 }
  0x2b   :  { %s42_s20 = sshll.u32 %s7638_s29, 4  ;;  %p7537_p2 = scmp.ne.s32.totalorder %s9107_s4, %s7536_s22  ;;  %s43_s20 = int_to_ptr.vmem [resolvable:$true] %s42_s20 }
  0x2c   :  { %p7540_p3 = scmp.lt.u32.totalorder %s7536_s22, %s9107_s4 }
  0x2e   :  { %p7542_p4 = pnand %p7540_p3, %p7537_p2 }
  0x30   :  { %7545 = shalt.err (!%p7542_p4)
}
  0x31   :  { %s7546_s3 = scalar_lea.vmem %s43_s20, 1024  ;;  %p7551_p6 = scmp.lt.s32.totalorder %s43_s20, %s43_s20 }
  0x32   :  { %p7547_p5 = scmp.ne.s32.totalorder %s43_s20, %s7546_s3  ;;  %p7552_p7 = scmp.lt.s32.totalorder %s7546_s3, %s7546_s3 }
  0x34   :  { %p7553_p8 = por %p7552_p7, %p7551_p6 }
  0x36   :  { %p7554_p9 = pnand %p7553_p8, %p7547_p5 }
  0x38   :  { %7557 = shalt.err (!%p7554_p9)
}
  0x39   :  { %s7639_s12 = smov 64   ;;  %s7640_s0 = smov 4  }
  0x3a   :  { %48 = dma.hbm_to_vmem [thread:$0]  %s9107_s4, 1024, %s43_s20, [#allocation5], %s7639_s12, %s7639_s12, %s7640_s0  }
  0x3b   :  { %s7641_s27 = smov [#allocation8]   ;;  %s7642_s29 = smov [#allocation11]  }
  0x3c   :  { %s74_s28 = sshll.u32 %s7641_s27, 4  ;;  %s102_s21 = sshll.u32 %s7642_s29, 4  ;;  %s75_s28 = int_to_ptr.vmem [resolvable:$true] %s74_s28  ;;  %s103_s21 = int_to_ptr.vmem [resolvable:$true] %s102_s21 }
  0x3d   :  { %s7558_s2 = scalar_lea.hbm %s9113_s10, 2048 }
  0x3e   :  { %p7559_p10 = scmp.ne.s32.totalorder %s9113_s10, %s7558_s2  ;;  %p7562_p11 = scmp.lt.u32.totalorder %s7558_s2, %s9113_s10 }
  0x40   :  { %p7564_p12 = pnand %p7562_p11, %p7559_p10 }
  0x42   :  { %7567 = shalt.err (!%p7564_p12)
}
  0x43   :  { %s7568_s4 = scalar_lea.vmem %s75_s28, 2048  ;;  %p7573_p0 = scmp.lt.s32.totalorder %s75_s28, %s75_s28 }
  0x44   :  { %p7569_p13 = scmp.ne.s32.totalorder %s75_s28, %s7568_s4  ;;  %p7574_p1 = scmp.lt.s32.totalorder %s7568_s4, %s7568_s4 }
  0x46   :  { %p7575_p2 = por %p7574_p1, %p7573_p0 }
  0x48   :  { %p7576_p3 = pnand %p7575_p2, %p7569_p13 }
  0x4a   :  { %7579 = shalt.err (!%p7576_p3)
}
  0x4b   :  { %s9146_s20 = smov 128   ;;  %s7580_s27 = scalar_lea.hbm %s9117_s14, 3072 }
  0x4c   :  { %80 = dma.hbm_to_vmem [thread:$0]  %s9113_s10, 2048, %s75_s28, [#allocation7], %s9146_s20, %s9146_s20, %s7634_s26  }
  0x4d   :  { %p7581_p4 = scmp.ne.s32.totalorder %s9117_s14, %s7580_s27  ;;  %p7584_p5 = scmp.lt.u32.totalorder %s7580_s27, %s9117_s14 }
  0x4f   :  { %p7586_p6 = pnand %p7584_p5, %p7581_p4 }
  0x51   :  { %7589 = shalt.err (!%p7586_p6)
}
  0x52   :  { %s7590_s23 = scalar_lea.vmem %s103_s21, 3072  ;;  %p7595_p8 = scmp.lt.s32.totalorder %s103_s21, %s103_s21 }
  0x53   :  { %p7591_p7 = scmp.ne.s32.totalorder %s103_s21, %s7590_s23  ;;  %p7596_p9 = scmp.lt.s32.totalorder %s7590_s23, %s7590_s23 }
  0x55   :  { %p7597_p10 = por %p7596_p9, %p7595_p8 }
  0x57   :  { %p7598_p11 = pnand %p7597_p10, %p7591_p7 }
  0x59   :  { %7601 = shalt.err (!%p7598_p11)
}
  0x5a   :  { %s7643_s10 = smov 192   ;;  %s7644_s26 = smov 12  }
  0x5b   :  { %108 = dma.hbm_to_vmem [thread:$0]  %s9117_s14, 3072, %s103_s21, [#allocation10], %s7643_s10, %s7643_s10, %s7644_s26  }
  0x5c   :  { %s7645_s24 = smov [#allocation12]   ;;  %s7602_s12 = scalar_lea.hbm %s9118_s15, 3072 }
  0x5d   :  { %s114_s25 = sshll.u32 %s7645_s24, 4  ;;  %p7603_p12 = scmp.ne.s32.totalorder %s9118_s15, %s7602_s12  ;;  %s115_s25 = int_to_ptr.vmem [resolvable:$true] %s114_s25 }
  0x5e   :  { %p7606_p13 = scmp.lt.u32.totalorder %s7602_s12, %s9118_s15 }
  0x60   :  { %p7608_p0 = pnand %p7606_p13, %p7603_p12 }
  0x62   :  { %7611 = shalt.err (!%p7608_p0)
}
  0x63   :  { %s7612_s29 = scalar_lea.vmem %s115_s25, 3072  ;;  %p7617_p2 = scmp.lt.s32.totalorder %s115_s25, %s115_s25 }
  0x64   :  { %p7613_p1 = scmp.ne.s32.totalorder %s115_s25, %s7612_s29  ;;  %p7618_p3 = scmp.lt.s32.totalorder %s7612_s29, %s7612_s29 }
  0x66   :  { %p7619_p4 = por %p7618_p3, %p7617_p2 }
  0x68   :  { %p7620_p5 = pnand %p7619_p4, %p7613_p1 }
  0x6a   :  { %7623 = shalt.err (!%p7620_p5)
}
  0x6b   :  { %120 = dma.hbm_to_vmem [thread:$0]  %s9118_s15, 3072, %s115_s25, [#allocation13], %s7643_s10, %s7643_s10, %s7644_s26  }
  0x6c   :  { %7624 = dma.done.wait [#allocation5], 1024  }
  0x6d   :  { %7625 = vsyncadd [#allocation5], 4294966272 }
  0x6e   :  { %7626 = dma.done.wait [#allocation7], 3584  }
  0x6f   :  { %7627 = vsyncadd [#allocation7], 4294963712 }
  0x70   :  { %7628 = dma.done.wait [#allocation10], 9216  }
  0x71   :  { %7629 = vsyncadd [#allocation10], 4294958080 }
  0x72   :  { %7630 = dma.done.wait [#allocation13], 3072  }
  0x73   :  { %7631 = vsyncadd [#allocation13], 4294964224  ;;  %v7646_v0 = vmov 0.0|0.0   ;;  %vm7647_vm0 = vmmov 0   ;;  %v9127_v1 = vmov 0.0   ;;  %v9125_v2 = vmov 0  }
  0x74   :  { %6962 = vmatprep.subr.bf16.mxu0 %v7646_v0  ;;  %6490 = vmatprep.mubr.msk.f32.mxu0 %vm7647_vm0, %v9127_v1  ;;  %v145_v3 = vld [vmem:[#allocation6] sm:$0xff]  ;;  %v146_v4 = vld [vmem:[#allocation6 + $0x8] sm:$0xff]  ;;  %v147_v5 = vld [vmem:[#allocation6 + $0x10] sm:$0xff]  ;;  %s9147_s22 = sld [smem:[#allocation55_spill]]  ;;  %s9148_s5 = sld [smem:[#allocation56_spill]]  ;;  %vm164_vm4 = vcmask 785408  }
  0x75   :  { %7050 = vset.pattern.permute.xlu0 %v9125_v2  ;;  %7051 = vset.pattern.permute.xlu1 %v9125_v2  ;;  %v6963_v6 = vpack.c.bf16 %v146_v4, %v145_v3  ;;  %v148_v7 = vld [vmem:[#allocation6 + $0x18] sm:$0xff]  ;;  %v149_v9 = vld [vmem:[#allocation6 + $0x20] sm:$0xff]  ;;  %v150_v10 = vld [vmem:[#allocation6 + $0x28] sm:$0xff]  ;;  %s9149_s23 = sld [smem:[#allocation57_spill]]  ;;  %s9150_s4 = sld [smem:[#allocation58_spill]]  ;;  %vm249_vm7 = vcmask 130048  }
  0x76   :  { %6983 = vmatprep.subr.bf16.mxu1 %v7646_v0  ;;  %6532 = vmatprep.mubr.msk.f32.mxu1 %vm7647_vm0, %v9127_v1  ;;  %v6966_v8 = vpack.c.bf16 %v148_v7, %v147_v5  ;;  %v6969_v13 = vpack.c.bf16 %v150_v10, %v149_v9  ;;  %v151_v16 = vld [vmem:[#allocation6 + $0x30] sm:$0xff]  ;;  %v152_v17 = vld [vmem:[#allocation6 + $0x38] sm:$0xff]  ;;  %v153_v18 = vld [vmem:[#allocation6 + $0x40] sm:$0xff] }
  0x77   :  { %6964 = vmatpush3.bf16.msra.mxu0 %v6963_v6  ;;  %v340_v19 = vld [vmem:[#allocation8] sm:$0xff]  ;;  %v341_v20 = vld [vmem:[#allocation8 + $0x8] sm:$0xff]  ;;  %v6972_v21 = vpack.c.bf16 %v152_v17, %v151_v16  ;;  %v342_v26 = vld [vmem:[#allocation8 + $0x10] sm:$0xff] }
  0x78   :  { %6965 = vmatprep.subr.bf16.mxu0 %v7646_v0  ;;  %v154_v22 = vld [vmem:[#allocation6 + $0x48] sm:$0xff]  ;;  %v343_v27 = vld [vmem:[#allocation8 + $0x18] sm:$0xff]  ;;  %v6984_v28 = vpack.c.bf16 %v341_v20, %v340_v19  ;;  %v155_v30 = vld [vmem:[#allocation6 + $0x50] sm:$0xff] }
  0x79   :  { %v6975_v29 = vpack.c.bf16 %v154_v22, %v153_v18  ;;  %v6987_v33 = vpack.c.bf16 %v343_v27, %v342_v26  ;;  %v156_v34 = vld [vmem:[#allocation6 + $0x58] sm:$0xff]  ;;  %v344_v35 = vld [vmem:[#allocation8 + $0x20] sm:$0xff]  ;;  %v345_v36 = vld [vmem:[#allocation8 + $0x28] sm:$0xff] }
  0x7a   :  { %v505_v11 = vld [vmem:[%s9147_s22] sm:$0xff]  ;;  %v507_v12 = vld [vmem:[%s9147_s22 + $0x10] sm:$0xff]  ;;  %v506_v14 = vld [vmem:[%s9147_s22 + $0x8] sm:$0xff]  ;;  %6985 = vmatpush3.bf16.msra.mxu1 %v6984_v28  ;;  %v6978_v42 = vpack.c.bf16 %v156_v34, %v155_v30  ;;  %v6990_v43 = vpack.c.bf16 %v345_v36, %v344_v35 }
  0x7b   :  { %516 = vperm.xlu0 %7050, %v505_v11   ;;  %522 = vperm.xlu1 %7051, %v507_v12   ;;  %v508_v15 = vld [vmem:[%s9147_s22 + $0x18] sm:$0xff]  ;;  %v509_v23 = vld [vmem:[%s9147_s22 + $0x20] sm:$0xff]  ;;  %v510_v24 = vld [vmem:[%s9147_s22 + $0x28] sm:$0xff] }
  0x7c   :  { %6967 = vmatpush3.bf16.msra.mxu0 %v6966_v8  ;;  %v7861_v25 = vld [vmem:[%s9148_s5] sm:$0xff]  ;;  %v511_v31 = vld [vmem:[%s9147_s22 + $0x30] sm:$0xff]  ;;  %v512_v32 = vld [vmem:[%s9147_s22 + $0x38] sm:$0xff]  ;;  %6986 = vmatprep.subr.bf16.mxu1 %v7646_v0 }
  0x7d   :  { %6968 = vmatprep.subr.bf16.mxu0 %v7646_v0  ;;  %vm1934_vm1 = vcmp.gt.s32.totalorder %v7861_v25, 0  ;;  %vm1935_vm2 = vcmp.gt.s32.totalorder %v7861_v25, 7  ;;  %vm2483_vm3 = vcmp.gt.s32.totalorder %v7861_v25, 1  ;;  %v240_v37 = vld [vmem:[%s9110_s7] sm:$0xff]  ;;  %v241_v38 = vld [vmem:[%s9110_s7 + $0x8] sm:$0xff]  ;;  %vm2484_vm5 = vcmp.gt.s32.totalorder %v7861_v25, 6 }
  0x7e   :  { %v1936_v39 = vsel %vm1934_vm1, 1, %v9125_v2  ;;  %v1943_v40 = vsel %vm1935_vm2, 1, %v9125_v2  ;;  %v2485_v41 = vsel %vm2483_vm3, 1, %v9125_v2  ;;  %6988 = vmatpush3.bf16.msra.mxu1 %v6987_v33  ;;  %v346_v44 = vld [vmem:[#allocation8 + $0x30] sm:$0xff]  ;;  %v347_v45 = vld [vmem:[#allocation8 + $0x38] sm:$0xff]  ;;  %v144_v46 = vld [vmem:[%s9149_s23] sm:$0xff]  ;;  %v6981_v49 = vpack.c.bf16 %v241_v38, %v240_v37 }
  0x7f   :  { %519 = vperm.xlu0 %7050, %v506_v14   ;;  %525 = vperm.xlu1 %7051, %v508_v15   ;;  %v324_v47 = vld [vmem:[%s9112_s9] sm:$0xff]  ;;  %v325_v48 = vld [vmem:[%s9112_s9 + $0x8] sm:$0xff]  ;;  %vm3033_vm6 = vcmp.gt.s32.totalorder %v7861_v25, 2  ;;  %v2493_v53 = vsel %vm2484_vm5, 1, %v9125_v2  ;;  %v6993_v54 = vpack.c.bf16 %v347_v45, %v346_v44  ;;  %vm3034_vm8 = vcmp.gt.s32.totalorder %v7861_v25, 5  ;;  %v326_v55 = vld [vmem:[%s9112_s9 + $0x10] sm:$0xff] }
  0x80   :  { %6970 = vmatpush3.bf16.msra.mxu0 %v6969_v13  ;;  %6989 = vmatprep.subr.bf16.mxu1 %v7646_v0  ;;  %v348_v50 = vld [vmem:[#allocation8 + $0x40] sm:$0xff]  ;;  %v349_v51 = vld [vmem:[#allocation8 + $0x48] sm:$0xff]  ;;  %v327_v56 = vld [vmem:[%s9112_s9 + $0x18] sm:$0xff]  ;;  %v3035_v57 = vsel %vm3033_vm6, 1, %v9125_v2  ;;  %v7008_v58 = vpack.c.bf16 %v325_v48, %v324_v47  ;;  %vm3583_vm9 = vcmp.gt.s32.totalorder %v7861_v25, 3  ;;  %v3043_v61 = vsel %vm3034_vm8, 1, %v9125_v2 }
  0x81   :  { %6971 = vmatprep.subr.bf16.mxu0 %v7646_v0  ;;  %v239_v52 = vld [vmem:[%s9150_s4] sm:$0xff]  ;;  %v350_v59 = vld [vmem:[#allocation8 + $0x50] sm:$0xff]  ;;  %v351_v60 = vld [vmem:[#allocation8 + $0x58] sm:$0xff]  ;;  %v6996_v62 = vpack.c.bf16 %v349_v51, %v348_v50  ;;  %vm3584_vm10 = vcmp.gt.s32.totalorder %v7861_v25, 4  ;;  %v3585_v4 = vsel %vm3583_vm9, 1, %v9125_v2  ;;  %v7011_v5 = vpack.c.bf16 %v327_v56, %v326_v55 }
  0x82   :  { %6991 = vmatpush3.bf16.msra.mxu1 %v6990_v43  ;;  %v328_v63 = vld [vmem:[%s9112_s9 + $0x20] sm:$0xff]  ;;  %v329_v3 = vld [vmem:[%s9112_s9 + $0x28] sm:$0xff]  ;;  %v3593_v6 = vsel %vm3584_vm10, 1, %v9125_v2  ;;  %v6999_v7 = vpack.c.bf16 %v351_v60, %v350_v59  ;;  %v330_v8 = vld [vmem:[%s9112_s9 + $0x30] sm:$0xff]  ;;  %v7650_v45 = vmov 1.0|1.0  }
  0x83   :  { %528 = vperm.xlu0 %7050, %v509_v23   ;;  %531 = vperm.xlu1 %7051, %v510_v24   ;;  %v331_v9 = vld [vmem:[%s9112_s9 + $0x38] sm:$0xff]  ;;  %v7014_v10 = vpack.c.bf16 %v329_v3, %v328_v63  ;;  %v332_v11 = vld [vmem:[%s9112_s9 + $0x40] sm:$0xff]  ;;  %v333_v12 = vld [vmem:[%s9112_s9 + $0x48] sm:$0xff] }
  0x84   :  { %6973 = vmatpush3.bf16.msra.mxu0 %v6972_v21  ;;  %6992 = vmatprep.subr.bf16.mxu1 %v7646_v0  ;;  %v7017_v13 = vpack.c.bf16 %v331_v9, %v330_v8  ;;  %v334_v14 = vld [vmem:[%s9112_s9 + $0x50] sm:$0xff]  ;;  %v335_v15 = vld [vmem:[%s9112_s9 + $0x58] sm:$0xff]  ;;  %v7020_v16 = vpack.c.bf16 %v333_v12, %v332_v11  ;;  %v336_v17 = vld [vmem:[%s9112_s9 + $0x60] sm:$0xff] }
  0x85   :  { %6974 = vmatprep.subr.bf16.mxu0 %v7646_v0  ;;  %v337_v18 = vld [vmem:[%s9112_s9 + $0x68] sm:$0xff]  ;;  %v7023_v19 = vpack.c.bf16 %v335_v15, %v334_v14  ;;  %v352_v21 = vld [vmem:[#allocation8 + $0x60] sm:$0xff]  ;;  %v338_v24 = vld [vmem:[%s9112_s9 + $0x70] sm:$0xff] }
  0x86   :  { %6994 = vmatpush3.bf16.msra.mxu1 %v6993_v54  ;;  %v7026_v20 = vpack.c.bf16 %v337_v18, %v336_v17  ;;  %v353_v22 = vld [vmem:[#allocation8 + $0x68] sm:$0xff]  ;;  %v339_v25 = vld [vmem:[%s9112_s9 + $0x78] sm:$0xff]  ;;  %v354_v27 = vld [vmem:[#allocation8 + $0x70] sm:$0xff] }
  0x87   :  { %534 = vperm.xlu0 %7050, %v511_v31   ;;  %537 = vperm.xlu1 %7051, %v512_v32   ;;  %v7002_v23 = vpack.c.bf16 %v353_v22, %v352_v21  ;;  %v7029_v26 = vpack.c.bf16 %v339_v25, %v338_v24  ;;  %v355_v28 = vld [vmem:[#allocation8 + $0x78] sm:$0xff]  ;;  %v7052_v30 = vld [vmem:[#allocation4] sm:$0xff]   ;;  %v513_v31 = vlaneseq  ;;  %v7053_v44 = vld [vmem:[#allocation4 + $0x8] sm:$0xff]  }
  0x88   :  { %6976 = vmatpush3.bf16.msra.mxu0 %v6975_v29  ;;  %6995 = vmatprep.subr.bf16.mxu1 %v7646_v0  ;;  %v7005_v29 = vpack.c.bf16 %v355_v28, %v354_v27  ;;  %v5768_v33 = vld [vmem:[%s9109_s6] ss:$0 sm:$0xff]  ;;  %v7055_v47 = vld [vmem:[#allocation4 + $0x18] sm:$0xff]   ;;  %v7058_v51 = vld [vmem:[#allocation4 + $0x30] sm:$0xff]  }
  0x89   :  { %6977 = vmatprep.subr.bf16.mxu0 %v7646_v0  ;;  %v514_v35 = vand.u32 127, %v513_v31  ;;  %v7056_v48 = vld [vmem:[#allocation4 + $0x20] sm:$0xff]   ;;  %v7064_v63 = vld [vmem:[#allocation9 + $0x30] ss:$24 sps:$4 sm:$0xff]   ;;  %v7082_v12 = vld [vmem:[#allocation9 + $0xf4] ss:$24 sps:$4 sm:$0xff]  }
  0x8a   :  { %6997 = vmatpush3.bf16.msra.mxu1 %v6996_v62  ;;  %v7060_v59 = vld [vmem:[#allocation9] ss:$24 sps:$4 sm:$0xff]   ;;  %v7070_v3 = vld [vmem:[#allocation9 + $0x64] ss:$24 sps:$4 sm:$0xff]   ;;  %v7072_v8 = vld [vmem:[#allocation9 + $0x90] ss:$24 sps:$4 sm:$0xff]  }
  0x8b   :  { %1938 = vperm.xlu0 %7050, %v1936_v39   ;;  %1945 = vperm.xlu1 %7051, %v1943_v40   ;;  %v7063_v60 = vld [vmem:[#allocation9 + $0x8] ss:$24 sps:$4 sm:$0xff]   ;;  %v7067_v62 = vld [vmem:[#allocation9 + $0x38] ss:$24 sps:$4 sm:$0xff]   ;;  %v7078_v9 = vld [vmem:[#allocation9 + $0xc4] ss:$24 sps:$4 sm:$0xff]  }
  0x8c   :  { %6979 = vmatpush3.bf16.msra.mxu0 %v6978_v42  ;;  %6998 = vmatprep.subr.bf16.mxu1 %v7646_v0  ;;  %v7076_v11 = vld [vmem:[#allocation9 + $0xc0] ss:$24 sps:$4 sm:$0xff]   ;;  %v7080_v14 = vld [vmem:[#allocation9 + $0xf0] ss:$24 sps:$4 sm:$0xff]   ;;  %v7086_v15 = vld [vmem:[#allocation9 + $0x124] ss:$24 sps:$4 sm:$0xff]  }
  0x8d   :  { %6980 = vmatprep.subr.bf16.mxu0 %v7646_v0  ;;  %v7084_v17 = vld [vmem:[#allocation9 + $0x120] ss:$24 sps:$4 sm:$0xff]   ;;  %v7090_v18 = vld [vmem:[#allocation9 + $0x154] ss:$24 sps:$4 sm:$0xff]   ;;  %v7094_v21 = vld [vmem:[#allocation9 + $0x10] ss:$24 sps:$4 sm:$0xff]  }
  0x8e   :  { %7000 = vmatpush3.bf16.msra.mxu1 %v6999_v7  ;;  %v7075_v7 = vld [vmem:[#allocation9 + $0x98] ss:$24 sps:$4 sm:$0xff]   ;;  %v7095_v22 = vld [vmem:[#allocation9 + $0x14] ss:$24 sps:$4 sm:$0xff]  }
  0x8f   :  { %6491 = vmatmul.mubr.msk.f32.vlgmr.msra.gmra.mrb[0].mxu0 %vm164_vm4, %v144_v46  ;;  %2487 = vperm.xlu0 %7050, %v2485_v41   ;;  %v7054_v46 = vld [vmem:[#allocation4 + $0x10] sm:$0xff]  }
  0x90   :  { %6982 = vmatpush3.bf16.msra.mxu0 %v6981_v49  ;;  %6497 = vmatprep.mubr.msk.f32.mxu0 %vm7647_vm0, %v9127_v1  ;;  %v7057_v49 = vld [vmem:[#allocation4 + $0x28] sm:$0xff]  }
  0x91   :  { %2495 = vperm.xlu1 %7051, %v2493_v53   ;;  %7007 = vmatprep.subr.bf16.mxu0 %v7646_v0  ;;  %v7059_v53 = vld [vmem:[#allocation4 + $0x38] sm:$0xff]  }
  0x92   :  { %7001 = vmatprep.subr.bf16.mxu1 %v7646_v0 }
  0x93   :  { %6498 = vmatmul.mubr.msk.f32.vlgmr.msra.gmra.mrb[2].mxu0 %vm249_vm7, %v239_v52  ;;  %3037 = vperm.xlu0 %7050, %v3035_v57  }
  0x94   :  { %7009 = vmatpush3.bf16.msra.mxu0 %v7008_v58  ;;  %6567 = vmatprep.mubr.msk.f32.mxu0 %vm7647_vm0, %v9127_v1  ;;  %v7062_v58 = vld [vmem:[#allocation9 + $0x4] ss:$24 sps:$4 sm:$0xff]  }
  0x95   :  { %3045 = vperm.xlu1 %7051, %v3043_v61   ;;  %7010 = vmatprep.subr.bf16.mxu0 %v7646_v0  ;;  %v7066_v61 = vld [vmem:[#allocation9 + $0x34] ss:$24 sps:$4 sm:$0xff]  }
  0x96   :  { %7003 = vmatpush3.bf16.msra.mxu1 %v7002_v23 }
  0x97   :  { %3587 = vperm.xlu0 %7050, %v3585_v4   ;;  %7004 = vmatprep.subr.bf16.mxu1 %v7646_v0  ;;  %v7071_v4 = vld [vmem:[#allocation9 + $0x68] ss:$24 sps:$4 sm:$0xff]  }
  0x98   :  { %7012 = vmatpush3.bf16.msra.mxu0 %v7011_v5  ;;  %v7068_v5 = vld [vmem:[#allocation9 + $0x60] ss:$24 sps:$4 sm:$0xff]  }
  0x99   :  { %3595 = vperm.xlu1 %7051, %v3593_v6   ;;  %7013 = vmatprep.subr.bf16.mxu0 %v7646_v0  ;;  %v7074_v6 = vld [vmem:[#allocation9 + $0x94] ss:$24 sps:$4 sm:$0xff]  }
  0x9a   :  { %7006 = vmatpush3.bf16.msra.mxu1 %v7005_v29 }
  0x9b   :  { %6570 = vmatprep.subr.bf16.mxu1 %v7052_v30 }
  0x9c   :  { %7015 = vmatpush3.bf16.msra.mxu0 %v7014_v10  ;;  %v7079_v10 = vld [vmem:[#allocation9 + $0xc8] ss:$24 sps:$4 sm:$0xff]  }
  0x9d   :  { %7016 = vmatprep.subr.bf16.mxu0 %v7646_v0 }
  0xa0   :  { %7018 = vmatpush3.bf16.msra.mxu0 %v7017_v13  ;;  %v7083_v13 = vld [vmem:[#allocation9 + $0xf8] ss:$24 sps:$4 sm:$0xff]  }
  0xa1   :  { %7019 = vmatprep.subr.bf16.mxu0 %v7646_v0 }
  0xa4   :  { %7021 = vmatpush3.bf16.msra.mxu0 %v7020_v16  ;;  %v7087_v16 = vld [vmem:[#allocation9 + $0x128] ss:$24 sps:$4 sm:$0xff]  }
  0xa5   :  { %7022 = vmatprep.subr.bf16.mxu0 %v7646_v0 }
  0xa8   :  { %7024 = vmatpush3.bf16.msra.mxu0 %v7023_v19  ;;  %v7088_v19 = vld [vmem:[#allocation9 + $0x150] ss:$24 sps:$4 sm:$0xff]  }
  0xa9   :  { %7025 = vmatprep.subr.bf16.mxu0 %v7646_v0 }
  0xac   :  { %7027 = vmatpush3.bf16.msra.mxu0 %v7026_v20  ;;  %v7091_v20 = vld [vmem:[#allocation9 + $0x158] ss:$24 sps:$4 sm:$0xff]  }
  0xad   :  { %7028 = vmatprep.subr.bf16.mxu0 %v7646_v0  ;;  %v5770_v0 = vld [vmem:[%s9111_s8] ss:$0 sm:$0xff] }
  0xb0   :  { %7030 = vmatpush3.bf16.msra.mxu0 %v7029_v26 }
  0xb1   :  { %869 = vmatprep.subr.bf16.mxu0 %v7062_v58  ;;  %v7116_v58 = vld [vmem:[#allocation9 + $0x12c] ss:$24 sps:$4 sm:$0xff]  }
  0xfa   :  { %v517_v32 = vpop.permute.xlu0 %516  ;;  %v523_v50 = vpop.permute.xlu1 %522 }
  0xfb   :  { %vm539_vm11 = vcmp.eq.s32.totalorder %v514_v35, %v517_v32  ;;  %vm541_vm14 = vcmp.eq.s32.totalorder %v514_v35, %v523_v50  ;;  %v7110_v50 = vld [vmem:[#allocation9 + $0xd0] ss:$24 sps:$4 sm:$0xff]  }
  0xfe   :  { %v520_v39 = vpop.permute.xlu0 %519  ;;  %v526_v52 = vpop.permute.xlu1 %525 }
  0xff   :  { %vm540_vm12 = vcmp.eq.s32.totalorder %v514_v35, %v520_v39  ;;  %vm542_vm15 = vcmp.eq.s32.totalorder %v514_v35, %v526_v52  ;;  %v7102_v39 = vld [vmem:[#allocation9 + $0x70] ss:$24 sps:$4 sm:$0xff]   ;;  %v7108_v52 = vld [vmem:[#allocation9 + $0xcc] ss:$24 sps:$4 sm:$0xff]  }
 0x100   :  { %vm5781_vm13 = vmpackc.low %vm540_vm12, %vm539_vm11 }
 0x101   :  { %vm5783_vm3 = vmpackc.low %vm542_vm15, %vm541_vm14 }
 0x102   :  { %v529_v54 = vpop.permute.xlu0 %528  ;;  %v532_v55 = vpop.permute.xlu1 %531 }
 0x103   :  { %vm543_vm1 = vcmp.eq.s32.totalorder %v514_v35, %v529_v54  ;;  %vm544_vm2 = vcmp.eq.s32.totalorder %v514_v35, %v532_v55  ;;  %v7115_v54 = vld [vmem:[#allocation9 + $0x104] ss:$24 sps:$4 sm:$0xff]  }
 0x104   :  { %vm5785_vm4 = vmpackc.low %vm544_vm2, %vm543_vm1  ;;  %v7112_v55 = vld [vmem:[#allocation9 + $0xfc] ss:$24 sps:$4 sm:$0xff]  }
 0x106   :  { %v535_v56 = vpop.permute.xlu0 %534  ;;  %v538_v57 = vpop.permute.xlu1 %537 }
 0x107   :  { %vm545_vm5 = vcmp.eq.s32.totalorder %v514_v35, %v535_v56  ;;  %vm546_vm6 = vcmp.eq.s32.totalorder %v514_v35, %v538_v57  ;;  %v7118_v56 = vld [vmem:[#allocation9 + $0x130] ss:$24 sps:$4 sm:$0xff]   ;;  %v7119_v57 = vld [vmem:[#allocation9 + $0x134] ss:$24 sps:$4 sm:$0xff]  }
 0x108   :  { %vm5787_vm7 = vmpackc.low %vm546_vm6, %vm545_vm5 }
 0x162   :  { %v234_v34 = vpop.f32.mrb[0].mxu0 }
 0x163   :  { %v235_v36 = vadd.f32 %v5768_v33, %v234_v34  ;;  %v6492_v37 = vpop.f32.mrb[1].mxu0  ;;  %v7092_v34 = vld [vmem:[#allocation9 + $0xc] ss:$24 sps:$4 sm:$0xff]  }
 0x164   :  { %v7099_v37 = vld [vmem:[#allocation9 + $0x44] ss:$24 sps:$4 sm:$0xff]  }
 0x165   :  { %v238_v38 = vmax.f32 %v235_v36, 0.0  ;;  %v7098_v36 = vld [vmem:[#allocation9 + $0x40] ss:$24 sps:$4 sm:$0xff]  }
 0x166   :  { %v319_v40 = vpop.f32.mrb[2].mxu0 }
 0x167   :  { %v320_v41 = vadd.f32 %v5770_v0, %v319_v40  ;;  %v6499_v42 = vpop.f32.mrb[3].mxu0  ;;  %6568 = vmatmul.mubr.f32.vlgmr.msra.gmra.mrb[4].mxu0 %v238_v38  ;;  %v7096_v0 = vld [vmem:[#allocation9 + $0x3c] ss:$24 sps:$4 sm:$0xff]  }
 0x168   :  { %901 = vmatprep.mubr.bf16.mxu0 %v9125_v2  ;;  %870 = vmatpush1.bf16.msra.mxu0 %v7060_v59  ;;  %v7122_v59 = vld [vmem:[#allocation9 + $0x160] ss:$24 sps:$4 sm:$0xff]  }
 0x169   :  { %v323_v43 = vmax.f32 %v320_v41, 0.0  ;;  %871 = vmatprep.subr.bf16.mxu0 %v7066_v61  ;;  %v7103_v41 = vld [vmem:[#allocation9 + $0x74] ss:$24 sps:$4 sm:$0xff]  }
 0x16a   :  { %v7120_v61 = vld [vmem:[#allocation9 + $0x15c] ss:$24 sps:$4 sm:$0xff]  }
 0x16b   :  { %6533 = vmatmul.mubr.f32.vlgmr.msra.gmra.mrb[0].mxu1 %v323_v43 }
 0x16c   :  { %6571 = vmatpush3.bf16.msra.mxu1 %v7052_v30  ;;  %6586 = vmatprep.mubr.msk.bf16.mxu1 %vm5781_vm13, %v7650_v45 }
 0x16d   :  { %6572 = vmatprep.subr.bf16.mxu1 %v7053_v44  ;;  %872 = vmatpush1.bf16.msra.mxu0 %v7064_v63  ;;  %v8004_v63 = vld [vmem:[#allocation11] ss:$12 sps:$4 sm:$0xff]  }
 0x16e   :  { %873 = vmatprep.subr.bf16.mxu0 %v7070_v3  ;;  %v7127_v3 = vld [vmem:[#allocation11 + $0x8] ss:$12 sps:$4 sm:$0xff]  }
 0x170   :  { %6573 = vmatpush3.bf16.msra.mxu1 %v7053_v44 }
 0x171   :  { %6574 = vmatprep.subr.bf16.mxu1 %v7054_v46  ;;  %874 = vmatpush1.bf16.msra.mxu0 %v7068_v5  ;;  %v8013_v5 = vld [vmem:[#allocation11 + $0x18] ss:$12 sps:$4 sm:$0xff]  }
 0x172   :  { %875 = vmatprep.subr.bf16.mxu0 %v7074_v6  ;;  %v7131_v6 = vld [vmem:[#allocation11 + $0x20] ss:$12 sps:$4 sm:$0xff]  }
 0x174   :  { %6575 = vmatpush3.bf16.msra.mxu1 %v7054_v46 }
 0x175   :  { %6576 = vmatprep.subr.bf16.mxu1 %v7055_v47  ;;  %876 = vmatpush1.bf16.msra.mxu0 %v7072_v8  ;;  %v8022_v8 = vld [vmem:[#allocation11 + $0x30] ss:$12 sps:$4 sm:$0xff]  }
 0x176   :  { %877 = vmatprep.subr.bf16.mxu0 %v7078_v9  ;;  %v7135_v9 = vld [vmem:[#allocation11 + $0x38] ss:$12 sps:$4 sm:$0xff]  }
 0x178   :  { %6577 = vmatpush3.bf16.msra.mxu1 %v7055_v47  ;;  %v7106_v47 = vld [vmem:[#allocation9 + $0xa0] ss:$24 sps:$4 sm:$0xff]  }
 0x179   :  { %6578 = vmatprep.subr.bf16.mxu1 %v7056_v48  ;;  %878 = vmatpush1.bf16.msra.mxu0 %v7076_v11  ;;  %v8031_v11 = vld [vmem:[#allocation11 + $0x48] ss:$12 sps:$4 sm:$0xff]  }
 0x17a   :  { %879 = vmatprep.subr.bf16.mxu0 %v7082_v12  ;;  %v7139_v12 = vld [vmem:[#allocation11 + $0x50] ss:$12 sps:$4 sm:$0xff]  }
 0x17c   :  { %6579 = vmatpush3.bf16.msra.mxu1 %v7056_v48  ;;  %v7107_v48 = vld [vmem:[#allocation9 + $0xa4] ss:$24 sps:$4 sm:$0xff]  }
 0x17d   :  { %6580 = vmatprep.subr.bf16.mxu1 %v7057_v49  ;;  %880 = vmatpush1.bf16.msra.mxu0 %v7080_v14  ;;  %v8041_v14 = vld [vmem:[#allocation11 + $0x60] ss:$12 sps:$4 sm:$0xff]  }
 0x17e   :  { %881 = vmatprep.subr.bf16.mxu0 %v7086_v15  ;;  %v7143_v15 = vld [vmem:[#allocation11 + $0x68] ss:$12 sps:$4 sm:$0xff]  }
 0x180   :  { %6581 = vmatpush3.bf16.msra.mxu1 %v7057_v49  ;;  %v7104_v49 = vld [vmem:[#allocation9 + $0x9c] ss:$24 sps:$4 sm:$0xff]  }
 0x181   :  { %6582 = vmatprep.subr.bf16.mxu1 %v7058_v51  ;;  %882 = vmatpush1.bf16.msra.mxu0 %v7084_v17  ;;  %v8049_v17 = vld [vmem:[#allocation11 + $0x78] ss:$12 sps:$4 sm:$0xff]  }
 0x182   :  { %883 = vmatprep.subr.bf16.mxu0 %v7090_v18  ;;  %v7147_v18 = vld [vmem:[#allocation11 + $0x80] ss:$12 sps:$4 sm:$0xff]  }
 0x184   :  { %6583 = vmatpush3.bf16.msra.mxu1 %v7058_v51  ;;  %v7111_v51 = vld [vmem:[#allocation9 + $0xd4] ss:$24 sps:$4 sm:$0xff]  }
 0x185   :  { %6584 = vmatprep.subr.bf16.mxu1 %v7059_v53  ;;  %884 = vmatpush1.bf16.msra.mxu0 %v7088_v19  ;;  %v8053_v19 = vld [vmem:[#allocation11 + $0x94] ss:$12 sps:$4 sm:$0xff]  }
 0x186   :  { %1208 = vmatprep.subr.bf16.mxu0 %v7094_v21  ;;  %v8060_v21 = vld [vmem:[#allocation11 + $0x90] ss:$12 sps:$4 sm:$0xff]  }
 0x188   :  { %6585 = vmatpush3.bf16.msra.mxu1 %v7059_v53  ;;  %v7114_v53 = vld [vmem:[#allocation9 + $0x100] ss:$24 sps:$4 sm:$0xff]  }
 0x189   :  { %6594 = vmatprep.subr.bf16.mxu1 %v7063_v60 }
 0x18b   :  { %6587 = vmatmul.mubr.msk.bf16.vlgmr.msra.gmra.mrb[4].mxu1 %vm5783_vm3, %v7650_v45 }
 0x18c   :  { %6590 = vmatprep.mubr.msk.bf16.mxu1 %vm5785_vm4, %v7650_v45  ;;  %6595 = vmatpush3.bf16.msra.mxu1 %v7063_v60  ;;  %v7123_v60 = vld [vmem:[#allocation9 + $0x164] ss:$24 sps:$4 sm:$0xff]  }
 0x18d   :  { %6596 = vmatprep.subr.bf16.mxu1 %v7067_v62 }
 0x190   :  { %6597 = vmatpush3.bf16.msra.mxu1 %v7067_v62  ;;  %v8002_v62 = vld [vmem:[#allocation11 + $0x4] ss:$12 sps:$4 sm:$0xff]  }
 0x191   :  { %6598 = vmatprep.subr.bf16.mxu1 %v7071_v4 }
 0x193   :  { %6591 = vmatmul.mubr.msk.bf16.gmra.mrb[8].mxu1 %vm5787_vm7, %v7650_v45  ;;  %v7100_v45 = vld [vmem:[#allocation9 + $0x6c] ss:$24 sps:$4 sm:$0xff]  }
 0x194   :  { %6599 = vmatpush3.bf16.msra.mxu1 %v7071_v4  ;;  %v8008_v4 = vld [vmem:[#allocation11 + $0x1c] ss:$12 sps:$4 sm:$0xff]  }
 0x195   :  { %6600 = vmatprep.subr.bf16.mxu1 %v7075_v7 }
 0x198   :  { %6601 = vmatpush3.bf16.msra.mxu1 %v7075_v7  ;;  %v8016_v7 = vld [vmem:[#allocation11 + $0x34] ss:$12 sps:$4 sm:$0xff]  }
 0x199   :  { %6602 = vmatprep.subr.bf16.mxu1 %v7079_v10 }
 0x19c   :  { %6603 = vmatpush3.bf16.msra.mxu1 %v7079_v10  ;;  %v8025_v10 = vld [vmem:[#allocation11 + $0x4c] ss:$12 sps:$4 sm:$0xff]  }
 0x19d   :  { %6604 = vmatprep.subr.bf16.mxu1 %v7083_v13 }
 0x1a0   :  { %6605 = vmatpush3.bf16.msra.mxu1 %v7083_v13  ;;  %v8034_v13 = vld [vmem:[#allocation11 + $0x64] ss:$12 sps:$4 sm:$0xff]  }
 0x1a1   :  { %6606 = vmatprep.subr.bf16.mxu1 %v7087_v16 }
 0x1a4   :  { %6607 = vmatpush3.bf16.msra.mxu1 %v7087_v16  ;;  %v8044_v16 = vld [vmem:[#allocation11 + $0x7c] ss:$12 sps:$4 sm:$0xff]  }
 0x1a5   :  { %6608 = vmatprep.subr.bf16.mxu1 %v7091_v20 }
 0x1a8   :  { %6609 = vmatpush3.bf16.msra.mxu1 %v7091_v20  ;;  %v5772_v20 = vld [vmem:[%s9114_s11] ss:$0 sm:$0xff] }
 0x1a9   :  { %6618 = vmatprep.subr.bf16.mxu1 %v7095_v22 }
 0x23a   :  { %v492_v23 = vpop.f32.mrb[4].mxu0 }
 0x23b   :  { %v6569_v24 = vpop.f32.mrb[5].mxu0 }
 0x23c   :  { %v8064_v24 = vld [vmem:[#allocation11 + $0xac] ss:$12 sps:$4 sm:$0xff]  }
 0x23e   :  { %v422_v25 = vpop.f32.mrb[0].mxu1 }
 0x23f   :  { %v7979_v26 = vadd.f32 %v492_v23, %v422_v25  ;;  %v6534_v27 = vpop.f32.mrb[1].mxu1  ;;  %v7151_v23 = vld [vmem:[#allocation11 + $0x98] ss:$12 sps:$4 sm:$0xff]   ;;  %v8069_v25 = vld [vmem:[#allocation11 + $0xa8] ss:$12 sps:$4 sm:$0xff]  }
 0x25e   :  { %v6588_v28 = vpop.f32.mrb[4].mxu1 }
 0x25f   :  { %v657_v29 = vpop.f32.mrb[5].mxu1 }
 0x260   :  { %v6589_v30 = vpop.f32.mrb[6].mxu1 }
 0x261   :  { %v7981_v32 = vpack.c.bf16 %v6589_v30, %v6588_v28  ;;  %v660_v33 = vpop.f32.mrb[7].mxu1  ;;  %v8075_v28 = vld [vmem:[#allocation12 + $0x4] ss:$12 sps:$4 sm:$0xff]  }
 0x262   :  { %v7983_v35 = vpack.c.bf16 %v660_v33, %v657_v29  ;;  %v8079_v29 = vld [vmem:[#allocation12] ss:$12 sps:$4 sm:$0xff]   ;;  %v8084_v33 = vld [vmem:[#allocation12 + $0x1c] ss:$12 sps:$4 sm:$0xff]  }
 0x264   :  { %902 = vmatmul.mubr.bf16.vlgmr.msra.gmra.mrb[8].mxu0 %v7983_v35  ;;  %6610 = vmatprep.mubr.bf16.mxu1 %v7983_v35 }
 0x265   :  { %1209 = vmatpush1.bf16.msra.mxu0 %v7092_v34  ;;  %6611 = vmatmul.mubr.bf16.vlgmr.msra.gmra.mrb[12].mxu1 %v7981_v32  ;;  %v8088_v34 = vld [vmem:[#allocation12 + $0x18] ss:$12 sps:$4 sm:$0xff]  }
 0x266   :  { %6619 = vmatpush3.bf16.msra.mxu1 %v7095_v22  ;;  %v6592_v38 = vpop.f32.mrb[8].mxu1  ;;  %1210 = vmatprep.subr.bf16.mxu0 %v7098_v36  ;;  %v503_v22 = vadd.f32 %v5772_v20, %v7979_v26  ;;  %v7155_v26 = vld [vmem:[#allocation11 + $0xb0] ss:$12 sps:$4 sm:$0xff]   ;;  %v8091_v36 = vld [vmem:[#allocation12 + $0x34] ss:$12 sps:$4 sm:$0xff]  }
 0x267   :  { %v673_v40 = vpop.f32.mrb[9].mxu1  ;;  %6620 = vmatprep.subr.bf16.mxu1 %v7099_v37  ;;  %911 = vmatprep.mubr.bf16.mxu0 %v9125_v2 }
 0x268   :  { %v6593_v42 = vpop.f32.mrb[10].mxu1  ;;  %v8072_v27 = vmax.f32 %v503_v22, 0.0 }
 0x269   :  { %v7989_v43 = vpack.c.bf16 %v6593_v42, %v6592_v38  ;;  %1211 = vmatpush1.bf16.msra.mxu0 %v7096_v0  ;;  %v676_v44 = vpop.f32.mrb[11].mxu1  ;;  %v7167_v0 = vld [vmem:[#allocation12 + $0x38] ss:$12 sps:$4 sm:$0xff]   ;;  %v8112_v42 = vld [vmem:[#allocation12 + $0x60] ss:$12 sps:$4 sm:$0xff]  }
 0x26a   :  { %v7991_v46 = vpack.c.bf16 %v676_v44, %v673_v40  ;;  %6621 = vmatpush3.bf16.msra.mxu1 %v7099_v37  ;;  %1212 = vmatprep.subr.bf16.mxu0 %v7102_v39  ;;  %v1385_v30 = vpack.c.bf16 %v8072_v27, %v8072_v27  ;;  %v8098_v37 = vld [vmem:[#allocation12 + $0x30] ss:$12 sps:$4 sm:$0xff]   ;;  %v8101_v38 = vld [vmem:[#allocation12 + $0x4c] ss:$12 sps:$4 sm:$0xff]   ;;  %v8105_v39 = vld [vmem:[#allocation12 + $0x48] ss:$12 sps:$4 sm:$0xff]  }
 0x26b   :  { %6622 = vmatprep.subr.bf16.mxu1 %v7103_v41  ;;  %v7171_v40 = vld [vmem:[#allocation12 + $0x50] ss:$12 sps:$4 sm:$0xff]  }
 0x26c   :  { %912 = vmatmul.mubr.bf16.gmra.mrb[12].mxu0 %v7981_v32  ;;  %6614 = vmatprep.mubr.bf16.mxu1 %v7991_v46  ;;  %v8115_v44 = vld [vmem:[#allocation12 + $0x7c] ss:$12 sps:$4 sm:$0xff]  }
 0x26d   :  { %1213 = vmatpush1.bf16.msra.mxu0 %v7100_v45  ;;  %6615 = vmatmul.mubr.bf16.gmra.mrb[16].mxu1 %v7989_v43  ;;  %v8119_v45 = vld [vmem:[#allocation12 + $0x78] ss:$12 sps:$4 sm:$0xff]  }
 0x26e   :  { %6623 = vmatpush3.bf16.msra.mxu1 %v7103_v41  ;;  %6634 = vmatprep.mubr.bf16.mxu1 %v7983_v35  ;;  %v8108_v41 = vld [vmem:[#allocation12 + $0x64] ss:$12 sps:$4 sm:$0xff]  }
 0x26f   :  { %1214 = vmatprep.subr.bf16.mxu0 %v7106_v47  ;;  %6624 = vmatprep.subr.bf16.mxu1 %v7107_v48  ;;  %v8122_v47 = vld [vmem:[#allocation12 + $0x94] ss:$12 sps:$4 sm:$0xff]  }
 0x270   :  { %921 = vmatprep.mubr.bf16.mxu0 %v9125_v2 }
 0x271   :  { %1215 = vmatpush1.bf16.msra.mxu0 %v7104_v49  ;;  %v7183_v49 = vld [vmem:[#allocation12 + $0x98] ss:$12 sps:$4 sm:$0xff]  }
 0x272   :  { %6625 = vmatpush3.bf16.msra.mxu1 %v7107_v48  ;;  %1216 = vmatprep.subr.bf16.mxu0 %v7110_v50  ;;  %v8126_v48 = vld [vmem:[#allocation12 + $0x90] ss:$12 sps:$4 sm:$0xff]   ;;  %v8129_v50 = vld [vmem:[#allocation12 + $0xac] ss:$12 sps:$4 sm:$0xff]  }
 0x273   :  { %6626 = vmatprep.subr.bf16.mxu1 %v7111_v51 }
 0x274   :  { %922 = vmatmul.mubr.bf16.gmra.mrb[16].mxu0 %v7991_v46 }
 0x275   :  { %1217 = vmatpush1.bf16.msra.mxu0 %v7108_v52  ;;  %931 = vmatprep.mubr.bf16.mxu0 %v9125_v2  ;;  %v7187_v52 = vld [vmem:[#allocation12 + $0xb0] ss:$12 sps:$4 sm:$0xff]  }
 0x276   :  { %6627 = vmatpush3.bf16.msra.mxu1 %v7111_v51  ;;  %1218 = vmatprep.subr.bf16.mxu0 %v7114_v53  ;;  %v8133_v51 = vld [vmem:[#allocation12 + $0xa8] ss:$12 sps:$4 sm:$0xff]  }
 0x277   :  { %6628 = vmatprep.subr.bf16.mxu1 %v7115_v54  ;;  %v7188_v53 = vld [vmem:[#allocation11 + $0x8] ss:$12 sps:$4 sm:$0xff]  }
 0x279   :  { %1219 = vmatpush1.bf16.msra.mxu0 %v7112_v55  ;;  %v7190_v55 = vld [vmem:[#allocation11 + $0x38] ss:$12 sps:$4 sm:$0xff]  }
 0x27a   :  { %6629 = vmatpush3.bf16.msra.mxu1 %v7115_v54  ;;  %1220 = vmatprep.subr.bf16.mxu0 %v7118_v56  ;;  %v7189_v54 = vld [vmem:[#allocation11 + $0x20] ss:$12 sps:$4 sm:$0xff]   ;;  %v7191_v56 = vld [vmem:[#allocation11 + $0x50] ss:$12 sps:$4 sm:$0xff]  }
 0x27b   :  { %6630 = vmatprep.subr.bf16.mxu1 %v7119_v57 }
 0x27c   :  { %932 = vmatmul.mubr.bf16.gmra.mrb[20].mxu0 %v7989_v43 }
 0x27d   :  { %1221 = vmatpush1.bf16.msra.mxu0 %v7116_v58  ;;  %1240 = vmatprep.mubr.bf16.mxu0 %v9125_v2  ;;  %v7193_v58 = vld [vmem:[#allocation11 + $0x80] ss:$12 sps:$4 sm:$0xff]  }
 0x27e   :  { %6631 = vmatpush3.bf16.msra.mxu1 %v7119_v57  ;;  %1222 = vmatprep.subr.bf16.mxu0 %v7122_v59  ;;  %v7192_v57 = vld [vmem:[#allocation11 + $0x68] ss:$12 sps:$4 sm:$0xff]   ;;  %v7194_v59 = vld [vmem:[#allocation11 + $0x98] ss:$12 sps:$4 sm:$0xff]  }
 0x27f   :  { %6632 = vmatprep.subr.bf16.mxu1 %v7123_v60 }
 0x281   :  { %1223 = vmatpush1.bf16.msra.mxu0 %v7120_v61  ;;  %v727_v61 = vshrl.u32 %v513_v31, 7 }
 0x282   :  { %6633 = vmatpush3.bf16.msra.mxu1 %v7123_v60  ;;  %1562 = vmatprep.subr.bf16.mxu0 %v8002_v62  ;;  %v7195_v60 = vld [vmem:[#allocation11 + $0xb0] ss:$12 sps:$4 sm:$0xff]  }
 0x283   :  { %6642 = vmatprep.subr.bf16.mxu1 %v9127_v1 }
 0x284   :  { %1241 = vmatmul.mubr.bf16.vlgmr.msra.gmra.mrb[24].mxu0 %v7983_v35  ;;  %v7163_v35 = vld [vmem:[#allocation12 + $0x20] ss:$12 sps:$4 sm:$0xff]  }
 0x285   :  { %6635 = vmatmul.mubr.bf16.vlgmr.msra.gmra.mrb[20].mxu1 %v7981_v32  ;;  %1563 = vmatpush1.bf16.msra.mxu0 %v8004_v63 }
 0x286   :  { %6638 = vmatprep.mubr.bf16.mxu1 %v7991_v46  ;;  %6643 = vmatpush3.bf16.msra.mxu1 %v7127_v3  ;;  %v8173_v3 = vsub.s32 1, %v727_v61 }
 0x287   :  { %1564 = vmatprep.subr.bf16.mxu0 %v8008_v4  ;;  %6644 = vmatprep.subr.bf16.mxu1 %v9127_v1 }
 0x288   :  { %1250 = vmatprep.mubr.bf16.mxu0 %v9125_v2 }
 0x289   :  { %1565 = vmatpush1.bf16.msra.mxu0 %v8013_v5 }
 0x28a   :  { %6645 = vmatpush3.bf16.msra.mxu1 %v7131_v6  ;;  %1566 = vmatprep.subr.bf16.mxu0 %v8016_v7 }
 0x28b   :  { %6646 = vmatprep.subr.bf16.mxu1 %v9127_v1 }
 0x28c   :  { %1251 = vmatmul.mubr.bf16.gmra.mrb[28].mxu0 %v7981_v32  ;;  %v7159_v32 = vld [vmem:[#allocation12 + $0x8] ss:$12 sps:$4 sm:$0xff]  }
 0x28d   :  { %6639 = vmatmul.mubr.bf16.gmra.mrb[24].mxu1 %v7989_v43  ;;  %1567 = vmatpush1.bf16.msra.mxu0 %v8022_v8 }
 0x28e   :  { %6647 = vmatpush3.bf16.msra.mxu1 %v7135_v9  ;;  %1568 = vmatprep.subr.bf16.mxu0 %v8025_v10 }
 0x28f   :  { %6648 = vmatprep.subr.bf16.mxu1 %v9127_v1  ;;  %1260 = vmatprep.mubr.bf16.mxu0 %v9125_v2 }
 0x290   :  { %6658 = vmatprep.mubr.msk.bf16.mxu1 %vm7647_vm0, %v9127_v1 }
 0x291   :  { %1569 = vmatpush1.bf16.msra.mxu0 %v8031_v11 }
 0x292   :  { %6649 = vmatpush3.bf16.msra.mxu1 %v7139_v12  ;;  %1570 = vmatprep.subr.bf16.mxu0 %v8034_v13 }
 0x293   :  { %6650 = vmatprep.subr.bf16.mxu1 %v9127_v1 }
 0x294   :  { %1261 = vmatmul.mubr.bf16.gmra.mrb[32].mxu0 %v7991_v46  ;;  %v7179_v46 = vld [vmem:[#allocation12 + $0x80] ss:$12 sps:$4 sm:$0xff]  }
 0x295   :  { %1571 = vmatpush1.bf16.msra.mxu0 %v8041_v14  ;;  %1270 = vmatprep.mubr.bf16.mxu0 %v9125_v2 }
 0x296   :  { %6651 = vmatpush3.bf16.msra.mxu1 %v7143_v15  ;;  %1572 = vmatprep.subr.bf16.mxu0 %v8044_v16 }
 0x297   :  { %6652 = vmatprep.subr.bf16.mxu1 %v9127_v1 }
 0x299   :  { %1573 = vmatpush1.bf16.msra.mxu0 %v8049_v17 }
 0x29a   :  { %6653 = vmatpush3.bf16.msra.mxu1 %v7147_v18  ;;  %1574 = vmatprep.subr.bf16.mxu0 %v8053_v19 }
 0x29b   :  { %6654 = vmatprep.subr.bf16.mxu1 %v9127_v1 }
 0x29c   :  { %1271 = vmatmul.mubr.bf16.gmra.mrb[36].mxu0 %v7989_v43  ;;  %v7175_v43 = vld [vmem:[#allocation12 + $0x68] ss:$12 sps:$4 sm:$0xff]  }
 0x29d   :  { %1575 = vmatpush1.bf16.msra.mxu0 %v8060_v21  ;;  %1594 = vmatprep.mubr.bf16.mxu0 %v9125_v2 }
 0x29e   :  { %6655 = vmatpush3.bf16.msra.mxu1 %v7151_v23  ;;  %1576 = vmatprep.subr.bf16.mxu0 %v8064_v24 }
 0x29f   :  { %6656 = vmatprep.subr.bf16.mxu1 %v9127_v1 }
 0x2a1   :  { %1577 = vmatpush1.bf16.msra.mxu0 %v8069_v25 }
 0x2a2   :  { %6657 = vmatpush3.bf16.msra.mxu1 %v7155_v26  ;;  %1836 = vmatprep.subr.bf16.mxu0 %v8075_v28 }
 0x2a3   :  { %6662 = vmatprep.subr.bf16.mxu1 %v9127_v1 }
 0x2a4   :  { %1595 = vmatmul.mubr.bf16.vlgmr.msra.gmra.mrb[40].mxu0 %v1385_v30 }
 0x2a5   :  { %6659 = vmatmul.mubr.bf16.vlgmr.msra.gmra.mrb[28].mxu1 %v1385_v30  ;;  %1837 = vmatpush1.bf16.msra.mxu0 %v8079_v29 }
 0x2a6   :  { %6663 = vmatpush3.bf16.msra.mxu1 %v7159_v32  ;;  %1838 = vmatprep.subr.bf16.mxu0 %v8084_v33 }
 0x2a7   :  { %6664 = vmatprep.subr.bf16.mxu1 %v9127_v1  ;;  %1868 = vmatprep.mubr.bf16.mxu0 %v9125_v2 }
 0x2a8   :  { %6678 = vmatprep.mubr.msk.bf16.mxu1 %vm7647_vm0, %v9127_v1 }
 0x2a9   :  { %1839 = vmatpush1.bf16.msra.mxu0 %v8088_v34 }
 0x2aa   :  { %6665 = vmatpush3.bf16.msra.mxu1 %v7163_v35  ;;  %1840 = vmatprep.subr.bf16.mxu0 %v8091_v36 }
 0x2ab   :  { %6666 = vmatprep.subr.bf16.mxu1 %v9127_v1 }
 0x2ad   :  { %1841 = vmatpush1.bf16.msra.mxu0 %v8098_v37 }
 0x2ae   :  { %6667 = vmatpush3.bf16.msra.mxu1 %v7167_v0  ;;  %1842 = vmatprep.subr.bf16.mxu0 %v8101_v38 }
 0x2af   :  { %6668 = vmatprep.subr.bf16.mxu1 %v9127_v1 }
 0x2b1   :  { %1843 = vmatpush1.bf16.msra.mxu0 %v8105_v39 }
 0x2b2   :  { %6669 = vmatpush3.bf16.msra.mxu1 %v7171_v40  ;;  %1844 = vmatprep.subr.bf16.mxu0 %v8108_v41 }
 0x2b3   :  { %6670 = vmatprep.subr.bf16.mxu1 %v9127_v1 }
 0x2b5   :  { %1845 = vmatpush1.bf16.msra.mxu0 %v8112_v42 }
 0x2b6   :  { %6671 = vmatpush3.bf16.msra.mxu1 %v7175_v43  ;;  %1846 = vmatprep.subr.bf16.mxu0 %v8115_v44 }
 0x2b7   :  { %6672 = vmatprep.subr.bf16.mxu1 %v9127_v1 }
 0x2b9   :  { %1847 = vmatpush1.bf16.msra.mxu0 %v8119_v45 }
 0x2ba   :  { %6673 = vmatpush3.bf16.msra.mxu1 %v7179_v46  ;;  %1848 = vmatprep.subr.bf16.mxu0 %v8122_v47 }
 0x2bb   :  { %6674 = vmatprep.subr.bf16.mxu1 %v9127_v1 }
 0x2bd   :  { %1849 = vmatpush1.bf16.msra.mxu0 %v8126_v48 }
 0x2be   :  { %6675 = vmatpush3.bf16.msra.mxu1 %v7183_v49  ;;  %1850 = vmatprep.subr.bf16.mxu0 %v8129_v50 }
 0x2bf   :  { %6676 = vmatprep.subr.bf16.mxu1 %v9127_v1 }
 0x2c1   :  { %1851 = vmatpush1.bf16.msra.mxu0 %v8133_v51 }
 0x2c2   :  { %6677 = vmatpush3.bf16.msra.mxu1 %v7187_v52  ;;  %2126 = vmatprep.subr.bf16.mxu0 %v8002_v62  ;;  %v8168_v62 = vsub.s32 0, %v727_v61 }
 0x2c3   :  { %6682 = vmatprep.subr.bf16.mxu1 %v9127_v1 }
 0x2c4   :  { %1869 = vmatmul.mubr.bf16.vlgmr.msra.gmra.mrb[44].mxu0 %v1385_v30 }
 0x2c5   :  { %6679 = vmatmul.mubr.bf16.vlgmr.msra.gmra.mrb[32].mxu1 %v1385_v30  ;;  %2127 = vmatpush1.bf16.msra.mxu0 %v8004_v63  ;;  %v724_v63 = vld [vmem:[%s9116_s13] sm:$0x7] }
 0x2c6   :  { %2128 = vmatprep.subr.bf16.mxu0 %v8008_v4  ;;  %2158 = vmatprep.mubr.bf16.mxu0 %v9125_v2  ;;  %v8175_v4 = vsub.s32 2, %v727_v61  ;;  %v733_v6 = vrot.slane %v724_v63, %v8173_v3 }
 0x2c7   :  { %6698 = vmatprep.mubr.msk.bf16.mxu1 %vm7647_vm0, %v9127_v1  ;;  %6683 = vmatpush3.bf16.msra.mxu1 %v7188_v53 }
 0x2c8   :  { %6684 = vmatprep.subr.bf16.mxu1 %v9127_v1 }
 0x2c9   :  { %2129 = vmatpush1.bf16.msra.mxu0 %v8013_v5  ;;  %v729_v5 = vrot.slane %v724_v63, %v8168_v62 }
 0x2ca   :  { %2130 = vmatprep.subr.bf16.mxu0 %v8016_v7  ;;  %v737_v7 = vrot.slane %v724_v63, %v8175_v4 }
 0x2cb   :  { %6685 = vmatpush3.bf16.msra.mxu1 %v7189_v54 }
 0x2cc   :  { %6686 = vmatprep.subr.bf16.mxu1 %v9127_v1 }
 0x2cd   :  { %2131 = vmatpush1.bf16.msra.mxu0 %v8022_v8 }
 0x2ce   :  { %2132 = vmatprep.subr.bf16.mxu0 %v8025_v10 }
 0x2cf   :  { %6687 = vmatpush3.bf16.msra.mxu1 %v7190_v55 }
 0x2d0   :  { %6688 = vmatprep.subr.bf16.mxu1 %v9127_v1 }
 0x2d1   :  { %2133 = vmatpush1.bf16.msra.mxu0 %v8031_v11 }
 0x2d2   :  { %2134 = vmatprep.subr.bf16.mxu0 %v8034_v13 }
 0x2d3   :  { %6689 = vmatpush3.bf16.msra.mxu1 %v7191_v56 }
 0x2d4   :  { %6690 = vmatprep.subr.bf16.mxu1 %v9127_v1 }
 0x2d5   :  { %2135 = vmatpush1.bf16.msra.mxu0 %v8041_v14 }
 0x2d6   :  { %2136 = vmatprep.subr.bf16.mxu0 %v8044_v16 }
 0x2d7   :  { %6691 = vmatpush3.bf16.msra.mxu1 %v7192_v57 }
 0x2d8   :  { %6692 = vmatprep.subr.bf16.mxu1 %v9127_v1 }
 0x2d9   :  { %2137 = vmatpush1.bf16.msra.mxu0 %v8049_v17 }
 0x2da   :  { %2138 = vmatprep.subr.bf16.mxu0 %v8053_v19 }
 0x2db   :  { %6693 = vmatpush3.bf16.msra.mxu1 %v7193_v58 }
 0x2dc   :  { %6694 = vmatprep.subr.bf16.mxu1 %v9127_v1 }
 0x2dd   :  { %2139 = vmatpush1.bf16.msra.mxu0 %v8060_v21 }
 0x2de   :  { %2140 = vmatprep.subr.bf16.mxu0 %v8064_v24 }
 0x2df   :  { %6695 = vmatpush3.bf16.msra.mxu1 %v7194_v59 }
 0x2e0   :  { %6696 = vmatprep.subr.bf16.mxu1 %v9127_v1 }
 0x2e1   :  { %2141 = vmatpush1.bf16.msra.mxu0 %v8069_v25 }
 0x2e2   :  { %2385 = vmatprep.subr.bf16.mxu0 %v8075_v28 }
 0x2e3   :  { %6697 = vmatpush3.bf16.msra.mxu1 %v7195_v60 }
 0x2e4   :  { %6702 = vmatprep.subr.bf16.mxu1 %v9127_v1 }
 0x337   :  { %v903_v8 = vpop.f32.mrb[8].mxu0 }
 0x338   :  { %v8180_v9 = vadd.f32 %v903_v8, %v729_v5  ;;  %v905_v31 = vpop.f32.mrb[9].mxu0  ;;  %v6612_v10 = vpop.f32.mrb[12].mxu1 }
 0x339   :  { %v8182_v11 = vadd.f32 %v905_v31, %v733_v6  ;;  %v8184_v12 = vadd.f32 %v6612_v10, %v737_v7  ;;  %v907_v13 = vpop.f32.mrb[10].mxu0  ;;  %v976_v14 = vpop.f32.mrb[13].mxu1 }
 0x33a   :  { %v8186_v15 = vadd.f32 %v907_v13, %v729_v5  ;;  %v8188_v16 = vadd.f32 %v976_v14, %v737_v7  ;;  %v909_v17 = vpop.f32.mrb[11].mxu0  ;;  %v6613_v18 = vpop.f32.mrb[14].mxu1  ;;  %v1063_v14 = vld [vmem:[%s9116_s13 + $0x3] sm:$0x7] }
 0x33b   :  { %v8190_v19 = vadd.f32 %v909_v17, %v733_v6  ;;  %v8192_v20 = vadd.f32 %v6613_v18, %v737_v7  ;;  %v979_v21 = vpop.f32.mrb[15].mxu1 }
 0x33c   :  { %v8194_v22 = vadd.f32 %v979_v21, %v737_v7 }
 0x33d   :  { %9151 = vst [vmem:[#allocation18_spill] sm:$0xff] %v8192_v20 }
 0x33f   :  { %v913_v23 = vpop.f32.mrb[12].mxu0 }
 0x340   :  { %v8196_v24 = vadd.f32 %v913_v23, %v729_v5  ;;  %v915_v25 = vpop.f32.mrb[13].mxu0  ;;  %v6616_v26 = vpop.f32.mrb[16].mxu1  ;;  %v1068_v23 = vrot.slane %v1063_v14, %v8168_v62 }
 0x341   :  { %v8198_v28 = vadd.f32 %v915_v25, %v733_v6  ;;  %v8200_v30 = vadd.f32 %v6616_v26, %v737_v7  ;;  %v917_v32 = vpop.f32.mrb[14].mxu0  ;;  %v992_v35 = vpop.f32.mrb[17].mxu1  ;;  %v1076_v25 = vrot.slane %v1063_v14, %v8175_v4  ;;  %v1072_v26 = vrot.slane %v1063_v14, %v8173_v3 }
 0x342   :  { %v8202_v0 = vadd.f32 %v917_v32, %v729_v5  ;;  %v8204_v40 = vadd.f32 %v992_v35, %v737_v7  ;;  %v919_v43 = vpop.f32.mrb[15].mxu0  ;;  %v6617_v46 = vpop.f32.mrb[18].mxu1 }
 0x343   :  { %9152 = vst [vmem:[#allocation19_spill] sm:$0xff] %v8200_v30  ;;  %v8206_v49 = vadd.f32 %v919_v43, %v733_v6  ;;  %v8208_v52 = vadd.f32 %v6617_v46, %v737_v7  ;;  %v995_v53 = vpop.f32.mrb[19].mxu1 }
 0x344   :  { %9153 = vst [vmem:[#allocation20_spill] sm:$0xff] %v8202_v0  ;;  %9154 = vst [vmem:[#allocation21_spill] sm:$0xff] %v8204_v40  ;;  %v8210_v54 = vadd.f32 %v995_v53, %v737_v7 }
 0x345   :  { %9155 = vst [vmem:[#allocation22_spill] sm:$0xff] %v8206_v49  ;;  %9156 = vst [vmem:[#allocation23_spill] sm:$0xff] %v8208_v52 }
 0x346   :  { %9157 = vst [vmem:[#allocation24_spill] sm:$0xff] %v8210_v54 }
 0x347   :  { %v923_v55 = vpop.f32.mrb[16].mxu0 }
 0x348   :  { %v8212_v56 = vadd.f32 %v923_v55, %v729_v5  ;;  %v925_v57 = vpop.f32.mrb[17].mxu0 }
 0x349   :  { %v8214_v58 = vadd.f32 %v925_v57, %v733_v6  ;;  %v927_v59 = vpop.f32.mrb[18].mxu0 }
 0x34a   :  { %9158 = vst [vmem:[#allocation25_spill] sm:$0xff] %v8212_v56  ;;  %v8216_v60 = vadd.f32 %v927_v59, %v729_v5  ;;  %v929_v61 = vpop.f32.mrb[19].mxu0 }
 0x34b   :  { %9159 = vst [vmem:[#allocation26_spill] sm:$0xff] %v8214_v58  ;;  %v8218_v63 = vadd.f32 %v929_v61, %v733_v6 }
 0x34c   :  { %9160 = vst [vmem:[#allocation27_spill] sm:$0xff] %v8216_v60 }
 0x34d   :  { %9161 = vst [vmem:[#allocation28_spill] sm:$0xff] %v8218_v63 }
 0x34f   :  { %v933_v8 = vpop.f32.mrb[20].mxu0 }
 0x350   :  { %v8220_v31 = vadd.f32 %v933_v8, %v729_v5  ;;  %v935_v10 = vpop.f32.mrb[21].mxu0 }
 0x351   :  { %v8222_v13 = vadd.f32 %v935_v10, %v733_v6  ;;  %v937_v7 = vpop.f32.mrb[22].mxu0 }
 0x352   :  { %9162 = vst [vmem:[#allocation29_spill] sm:$0xff] %v8220_v31  ;;  %v8227_v17 = vadd.f32 %v937_v7, %v729_v5  ;;  %v939_v18 = vpop.f32.mrb[23].mxu0 }
 0x353   :  { %9163 = vst [vmem:[#allocation30_spill] sm:$0xff] %v8222_v13  ;;  %v8229_v21 = vadd.f32 %v939_v18, %v733_v6 }
 0x354   :  { %9164 = vst [vmem:[#allocation31_spill] sm:$0xff] %v8227_v17 }
 0x355   :  { %9165 = vst [vmem:[#allocation32_spill] sm:$0xff] %v8229_v21 }
 0x357   :  { %v1242_v32 = vpop.f32.mrb[24].mxu0 }
 0x358   :  { %v8234_v35 = vadd.f32 %v1242_v32, %v1068_v23  ;;  %v6636_v43 = vpop.f32.mrb[20].mxu1  ;;  %v1244_v46 = vpop.f32.mrb[25].mxu0 }
 0x359   :  { %v8236_v53 = vadd.f32 %v6636_v43, %v1076_v25  ;;  %v8238_v55 = vadd.f32 %v1244_v46, %v1072_v26  ;;  %v1315_v5 = vpop.f32.mrb[21].mxu1  ;;  %v1246_v57 = vpop.f32.mrb[26].mxu0 }
 0x35a   :  { %9166 = vst [vmem:[#allocation33_spill] sm:$0xff] %v8234_v35  ;;  %v8240_v59 = vadd.f32 %v1315_v5, %v1076_v25  ;;  %v8242_v6 = vadd.f32 %v1246_v57, %v1068_v23  ;;  %v6637_v61 = vpop.f32.mrb[22].mxu1  ;;  %v1248_v8 = vpop.f32.mrb[27].mxu0 }
 0x35b   :  { %9167 = vst [vmem:[#allocation34_spill] sm:$0xff] %v8236_v53  ;;  %9168 = vst [vmem:[#allocation35_spill] sm:$0xff] %v8238_v55  ;;  %v8244_v10 = vadd.f32 %v6637_v61, %v1076_v25  ;;  %v8246_v7 = vadd.f32 %v1248_v8, %v1072_v26  ;;  %v1318_v14 = vpop.f32.mrb[23].mxu1 }
 0x35c   :  { %9169 = vst [vmem:[#allocation36_spill] sm:$0xff] %v8240_v59  ;;  %9170 = vst [vmem:[#allocation37_spill] sm:$0xff] %v8242_v6  ;;  %v8248_v18 = vadd.f32 %v1318_v14, %v1076_v25 }
 0x35d   :  { %9171 = vst [vmem:[#allocation38_spill] sm:$0xff] %v8244_v10  ;;  %9172 = vst [vmem:[#allocation39_spill] sm:$0xff] %v8246_v7 }
 0x35e   :  { %9173 = vst [vmem:[#allocation40_spill] sm:$0xff] %v8248_v18 }
 0x35f   :  { %v1252_v32 = vpop.f32.mrb[28].mxu0 }
 0x360   :  { %v8250_v43 = vadd.f32 %v1252_v32, %v1068_v23  ;;  %v6640_v46 = vpop.f32.mrb[24].mxu1  ;;  %v1254_v2 = vpop.f32.mrb[29].mxu0 }
 0x361   :  { %v8252_v1 = vadd.f32 %v6640_v46, %v1076_v25  ;;  %v8254_v5 = vadd.f32 %v1254_v2, %v1072_v26  ;;  %v1331_v57 = vpop.f32.mrb[25].mxu1  ;;  %v1256_v59 = vpop.f32.mrb[30].mxu0 }
 0x362   :  { %9174 = vst [vmem:[#allocation41_spill] sm:$0xff] %v8250_v43  ;;  %v8256_v55 = vadd.f32 %v1331_v57, %v1076_v25  ;;  %v8258_v61 = vadd.f32 %v1256_v59, %v1068_v23  ;;  %v6641_v8 = vpop.f32.mrb[26].mxu1  ;;  %v1258_v35 = vpop.f32.mrb[31].mxu0 }
 0x363   :  { %9175 = vst [vmem:[#allocation42_spill] sm:$0xff] %v8254_v5  ;;  %v8260_v52 = vadd.f32 %v6641_v8, %v1076_v25  ;;  %v8262_v14 = vadd.f32 %v1258_v35, %v1072_v26  ;;  %v1334_v32 = vpop.f32.mrb[27].mxu1 }
 0x364   :  { %9176 = vst [vmem:[#allocation43_spill] sm:$0xff] %v8256_v55  ;;  %9177 = vst [vmem:[#allocation44_spill] sm:$0xff] %v8258_v61  ;;  %v8264_v21 = vadd.f32 %v1334_v32, %v1076_v25 }
 0x365   :  { %9178 = vst [vmem:[#allocation45_spill] sm:$0xff] %v8262_v14 }
 0x367   :  { %v1262_v17 = vpop.f32.mrb[32].mxu0 }
 0x368   :  { %v8266_v46 = vadd.f32 %v1262_v17, %v1068_v23  ;;  %v1264_v2 = vpop.f32.mrb[33].mxu0  ;;  %v1371_v17 = vld [vmem:[%s9119_s16] sm:$0x7] }
 0x369   :  { %v8268_v18 = vadd.f32 %v1264_v2, %v1072_v26  ;;  %v1266_v7 = vpop.f32.mrb[34].mxu0  ;;  %v8292_v61 = vrot.slane %v1371_v17, %v8175_v4 }
 0x36a   :  { %9179 = vst [vmem:[#allocation46_spill] sm:$0xff] %v8266_v46  ;;  %v8270_v57 = vadd.f32 %v1266_v7, %v1068_v23  ;;  %v1268_v59 = vpop.f32.mrb[35].mxu0  ;;  %v8282_v7 = vrot.slane %v1371_v17, %v8168_v62 }
 0x36b   :  { %9180 = vst [vmem:[#allocation47_spill] sm:$0xff] %v8268_v18  ;;  %v8272_v6 = vadd.f32 %v1268_v59, %v1072_v26  ;;  %v8285_v59 = vrot.slane %v1371_v17, %v8173_v3  ;;  %9182 = vst [vmem:[#allocation49_spill] sm:$0xff] %v8292_v61 }
 0x36c   :  { %9181 = vst [vmem:[#allocation48_spill] sm:$0xff] %v8282_v7 }
 0x36f   :  { %v1272_v30 = vpop.f32.mrb[36].mxu0 }
 0x370   :  { %v8274_v8 = vadd.f32 %v1272_v30, %v1068_v23  ;;  %v1274_v35 = vpop.f32.mrb[37].mxu0 }
 0x371   :  { %v8276_v13 = vadd.f32 %v1274_v35, %v1072_v26  ;;  %v1276_v25 = vpop.f32.mrb[38].mxu0 }
 0x372   :  { %v1277_v32 = vadd.f32 %v1276_v25, %v1068_v23  ;;  %v1278_v2 = vpop.f32.mrb[39].mxu0 }
 0x373   :  { %v1279_v31 = vadd.f32 %v1278_v2, %v1072_v26 }
 0x377   :  { %v1596_v53 = vpop.f32.mrb[40].mxu0 }
 0x378   :  { %v1597_v30 = vadd.f32 %v1596_v53, %v8282_v7  ;;  %v1637_v5 = vpop.f32.mrb[28].mxu1  ;;  %v1598_v35 = vpop.f32.mrb[41].mxu0 }
 0x379   :  { %v1599_v43 = vadd.f32 %v1598_v35, %v8285_v59  ;;  %v6660_v54 = vpop.f32.mrb[29].mxu1  ;;  %v1600_v63 = vpop.f32.mrb[42].mxu0  ;;  %v1638_v35 = vadd.f32 %v1637_v5, %v8292_v61 }
 0x37a   :  { %v1643_v60 = vadd.f32 %v1597_v30, %v8180_v9  ;;  %v1640_v23 = vpop.f32.mrb[30].mxu1  ;;  %v1601_v25 = vpop.f32.mrb[43].mxu0 }
 0x37b   :  { %v1648_v26 = vadd.f32 %v1599_v43, %v8182_v11  ;;  %v6661_v2 = vpop.f32.mrb[31].mxu1  ;;  %v1372_v11 = vld [vmem:[%s9120_s17] sm:$0x7] }
 0x37c   :  { %v1644_v10 = vmul.f32 0.5, %v1643_v60  ;;  %v8303_v43 = vrot.slane %v1372_v11, %v8173_v3 }
 0x37d   :  { %v1649_v14 = vmul.f32 0.5, %v1648_v26 }
 0x37e   :  { %7396 = vtanh.f32 %v1644_v10  ;;  %v8300_v10 = vrot.slane %v1372_v11, %v8168_v62 }
 0x37f   :  { %7398 = vtanh.f32 %v1649_v14 }
 0x388   :  { %v7397_v53 = vpop.eup %7396 }
 0x389   :  { %v1646_v40 = vmul.f32 0.5, %v7397_v53  ;;  %v7399_v58 = vpop.eup %7398 }
 0x38a   :  { %v1651_v60 = vmul.f32 0.5, %v7399_v58 }
 0x38b   :  { %v1647_v54 = vadd.f32 0.5, %v1646_v40 }
 0x38c   :  { %v1652_v14 = vadd.f32 0.5, %v1651_v60  ;;  %v8308_v60 = vpop.permute.xlu0 %1938 }
 0x38d   :  { %v1653_v63 = vmul.f32 %v1647_v54, %v1638_v35  ;;  %9183 = vst [vmem:[#allocation50_spill] sm:$0xff] %v8308_v60  ;;  %vm1940_vm8 = vcmp.eq.s32.totalorder %v8308_v60, 1 }
 0x38e   :  { %v1656_v26 = vsub.f32 1.0, %v1652_v14  ;;  %v1658_v3 = vmul.f32 %v1652_v14, %v8072_v27 }
 0x38f   :  { %v1654_v9 = vadd.f32 %v1653_v63, %v8188_v16 }
 0x391   :  { %7400 = vtanh.f32 %v1654_v9 }
 0x397   :  { %v1870_v17 = vpop.f32.mrb[44].mxu0 }
 0x398   :  { %v1871_v40 = vadd.f32 %v1870_v17, %v8300_v10  ;;  %v1872_v5 = vpop.f32.mrb[45].mxu0  ;;  %v1911_v30 = vpop.f32.mrb[32].mxu1 }
 0x399   :  { %v1873_v16 = vadd.f32 %v1872_v5, %v8303_v43  ;;  %v1874_v23 = vpop.f32.mrb[46].mxu0  ;;  %v6680_v25 = vpop.f32.mrb[33].mxu1 }
 0x39a   :  { %v1917_v2 = vadd.f32 %v1871_v40, %v1277_v32  ;;  %v1875_v53 = vpop.f32.mrb[47].mxu0  ;;  %v1914_v58 = vpop.f32.mrb[34].mxu1  ;;  %v9184_v23 = vmov 0.0   ;;  %v9185_v25 = vmov 0  }
 0x39b   :  { %v7401_v35 = vpop.eup %7400  ;;  %v1922_v62 = vadd.f32 %v1873_v16, %v1279_v31  ;;  %v6681_v54 = vpop.f32.mrb[35].mxu1  ;;  %v7196_v31 = vld [vmem:[#allocation12 + $0x8] ss:$12 sps:$4 sm:$0xff]   ;;  %v7197_v16 = vld [vmem:[#allocation12 + $0x20] ss:$12 sps:$4 sm:$0xff]  }
 0x39c   :  { %v1657_v63 = vmul.f32 %v7401_v35, %v1656_v26  ;;  %v1918_v9 = vmul.f32 0.5, %v1917_v2  ;;  %v8330_v26 = vrot.slane %v1372_v11, %v8175_v4  ;;  %v7199_v35 = vld [vmem:[#allocation12 + $0x50] ss:$12 sps:$4 sm:$0xff]   ;;  %v7201_v11 = vld [vmem:[#allocation12 + $0x80] ss:$12 sps:$4 sm:$0xff]  }
 0x39d   :  { %v1923_v14 = vmul.f32 0.5, %v1922_v62 }
 0x39e   :  { %v1659_v17 = vadd.f32 %v1658_v3, %v1657_v63  ;;  %7402 = vtanh.f32 %v1918_v9  ;;  %v7207_v63 = vld [vmem:[#allocation11 + $0x8] ss:$12 sps:$4 sm:$0xff]   ;;  %v8382_v9 = vld [vmem:[#allocation11 + $0x18] ss:$12 sps:$4 sm:$0xff]  }
 0x39f   :  { %7404 = vtanh.f32 %v1923_v14  ;;  %v8379_v3 = vld [vmem:[#allocation11 + $0x1c] ss:$12 sps:$4 sm:$0xff]   ;;  %v7215_v14 = vld [vmem:[#allocation11 + $0x38] ss:$12 sps:$4 sm:$0xff]  }
 0x3a0   :  { %v1941_v5 = vsel %vm1940_vm8, %v1659_v17, 0.0  ;;  %v8316_v32 = vsel %vm1940_vm8, %v1659_v17, %v8072_v27  ;;  %v7211_v17 = vld [vmem:[#allocation11 + $0x20] ss:$12 sps:$4 sm:$0xff]  }
 0x3a1   :  { %1942 = vst [vmem:[%s9121_s18] sm:$0xff] %v1941_v5  ;;  %v1965_v40 = vpack.c.bf16 %v8316_v32, %v8316_v32  ;;  %v8386_v5 = vld [vmem:[#allocation11 + $0x34] ss:$12 sps:$4 sm:$0xff]  }
 0x3a3   :  { %2159 = vmatmul.mubr.bf16.vlgmr.msra.gmra.mrb[48].mxu0 %v1965_v40  ;;  %6699 = vmatmul.mubr.bf16.vlgmr.msra.gmra.mrb[36].mxu1 %v1965_v40  ;;  %v8393_v40 = vld [vmem:[#allocation11 + $0x4c] ss:$12 sps:$4 sm:$0xff]  }
 0x3a4   :  { %2386 = vmatpush1.bf16.msra.mxu0 %v8079_v29  ;;  %6703 = vmatpush3.bf16.msra.mxu1 %v7196_v31  ;;  %v7198_v29 = vld [vmem:[#allocation12 + $0x38] ss:$12 sps:$4 sm:$0xff]   ;;  %v8389_v31 = vld [vmem:[#allocation11 + $0x30] ss:$12 sps:$4 sm:$0xff]  }
 0x3a5   :  { %2387 = vmatprep.subr.bf16.mxu0 %v8084_v33  ;;  %6704 = vmatprep.subr.bf16.mxu1 %v9184_v23  ;;  %v1912_v33 = vadd.f32 %v1911_v30, %v8330_v26 }
 0x3a6   :  { %2417 = vmatprep.mubr.bf16.mxu0 %v9185_v25  ;;  %6718 = vmatprep.mubr.msk.bf16.mxu1 %vm7647_vm0, %v9184_v23 }
 0x3a8   :  { %v7403_v2 = vpop.eup %7402  ;;  %2388 = vmatpush1.bf16.msra.mxu0 %v8088_v34  ;;  %6705 = vmatpush3.bf16.msra.mxu1 %v7197_v16  ;;  %v8396_v16 = vld [vmem:[#allocation11 + $0x48] ss:$12 sps:$4 sm:$0xff]  }
 0x3a9   :  { %v1920_v53 = vmul.f32 0.5, %v7403_v2  ;;  %2389 = vmatprep.subr.bf16.mxu0 %v8091_v36  ;;  %6706 = vmatprep.subr.bf16.mxu1 %v9184_v23  ;;  %v7405_v34 = vpop.eup %7404  ;;  %v7200_v36 = vld [vmem:[#allocation12 + $0x68] ss:$12 sps:$4 sm:$0xff]   ;;  %v7219_v2 = vld [vmem:[#allocation11 + $0x50] ss:$12 sps:$4 sm:$0xff]  }
 0x3ab   :  { %v1921_v58 = vadd.f32 0.5, %v1920_v53  ;;  %v8403_v53 = vld [vmem:[#allocation11 + $0x60] ss:$12 sps:$4 sm:$0xff]  }
 0x3ac   :  { %2390 = vmatpush1.bf16.msra.mxu0 %v8098_v37  ;;  %6707 = vmatpush3.bf16.msra.mxu1 %v7198_v29  ;;  %v1925_v37 = vmul.f32 0.5, %v7405_v34  ;;  %v8400_v29 = vld [vmem:[#allocation11 + $0x64] ss:$12 sps:$4 sm:$0xff]   ;;  %v8414_v34 = vld [vmem:[#allocation11 + $0x94] ss:$12 sps:$4 sm:$0xff]  }
 0x3ad   :  { %v1927_v62 = vmul.f32 %v1921_v58, %v1912_v33  ;;  %2391 = vmatprep.subr.bf16.mxu0 %v8101_v38  ;;  %6708 = vmatprep.subr.bf16.mxu1 %v9184_v23  ;;  %v7223_v33 = vld [vmem:[#allocation11 + $0x68] ss:$12 sps:$4 sm:$0xff]  }
 0x3ae   :  { %v1926_v38 = vadd.f32 0.5, %v1925_v37  ;;  %v8407_v58 = vld [vmem:[#allocation11 + $0x7c] ss:$12 sps:$4 sm:$0xff]   ;;  %v8421_v37 = vld [vmem:[#allocation11 + $0xac] ss:$12 sps:$4 sm:$0xff]  }
 0x3af   :  { %v1928_v4 = vadd.f32 %v1927_v62, %v8260_v52  ;;  %v7227_v62 = vld [vmem:[#allocation11 + $0x80] ss:$12 sps:$4 sm:$0xff]  }
 0x3b0   :  { %2392 = vmatpush1.bf16.msra.mxu0 %v8105_v39  ;;  %6709 = vmatpush3.bf16.msra.mxu1 %v7199_v35  ;;  %v7202_v39 = vld [vmem:[#allocation12 + $0x98] ss:$12 sps:$4 sm:$0xff]   ;;  %v1932_v30 = vmul.f32 %v1926_v38, %v8072_v27 }
 0x3b1   :  { %7406 = vtanh.f32 %v1928_v4  ;;  %2393 = vmatprep.subr.bf16.mxu0 %v8108_v41  ;;  %6710 = vmatprep.subr.bf16.mxu1 %v9184_v23  ;;  %v1930_v41 = vsub.f32 1.0, %v1926_v38  ;;  %v8410_v35 = vld [vmem:[#allocation11 + $0x78] ss:$12 sps:$4 sm:$0xff]   ;;  %v8417_v4 = vld [vmem:[#allocation11 + $0x90] ss:$12 sps:$4 sm:$0xff]  }
 0x3b2   :  { %v7235_v38 = vld [vmem:[#allocation11 + $0xb0] ss:$12 sps:$4 sm:$0xff]  }
 0x3b4   :  { %2394 = vmatpush1.bf16.msra.mxu0 %v8112_v42  ;;  %6711 = vmatpush3.bf16.msra.mxu1 %v7200_v36  ;;  %v7231_v36 = vld [vmem:[#allocation11 + $0x98] ss:$12 sps:$4 sm:$0xff]  }
 0x3b5   :  { %2395 = vmatprep.subr.bf16.mxu0 %v8115_v44  ;;  %6712 = vmatprep.subr.bf16.mxu1 %v9184_v23  ;;  %v7203_v44 = vld [vmem:[#allocation12 + $0xb0] ss:$12 sps:$4 sm:$0xff]  }
 0x3b8   :  { %2396 = vmatpush1.bf16.msra.mxu0 %v8119_v45  ;;  %6713 = vmatpush3.bf16.msra.mxu1 %v7201_v11  ;;  %v8353_v45 = vpop.permute.xlu1 %1945  ;;  %v8424_v11 = vld [vmem:[#allocation11 + $0xa8] ss:$12 sps:$4 sm:$0xff]  }
 0x3b9   :  { %2397 = vmatprep.subr.bf16.mxu0 %v8122_v47  ;;  %6714 = vmatprep.subr.bf16.mxu1 %v9184_v23  ;;  %9186 = vst [vmem:[#allocation51_spill] sm:$0xff] %v8353_v45  ;;  %vm1947_vm9 = vcmp.eq.s32.totalorder %v8353_v45, 1 }
 0x3bb   :  { %v7407_v52 = vpop.eup %7406 }
 0x3bc   :  { %v1931_v42 = vmul.f32 %v7407_v52, %v1930_v41  ;;  %2398 = vmatpush1.bf16.msra.mxu0 %v8126_v48  ;;  %6715 = vmatpush3.bf16.msra.mxu1 %v7202_v39  ;;  %v8428_v39 = vld [vmem:[#allocation12 + $0x4] ss:$12 sps:$4 sm:$0xff]  }
 0x3bd   :  { %2399 = vmatprep.subr.bf16.mxu0 %v8129_v50  ;;  %6716 = vmatprep.subr.bf16.mxu1 %v9184_v23  ;;  %9187 = vst [vmem:[#allocation52_spill] sm:$0xff] %v8428_v39 }
 0x3be   :  { %v1933_v54 = vadd.f32 %v1932_v30, %v1931_v42 }
 0x3c0   :  { %2400 = vmatpush1.bf16.msra.mxu0 %v8133_v51  ;;  %6717 = vmatpush3.bf16.msra.mxu1 %v7203_v44  ;;  %v1948_v47 = vsel %vm1947_vm9, %v1933_v54, 0.0  ;;  %v8362_v48 = vsel %vm1947_vm9, %v1933_v54, %v8072_v27  ;;  %v8373_v51 = vld [vmem:[#allocation11 + $0x4] ss:$12 sps:$4 sm:$0xff]   ;;  %v8375_v27 = vld [vmem:[#allocation11] ss:$12 sps:$4 sm:$0xff]  }
 0x3c1   :  { %5885 = vst [vmem:[%s9121_s18 + $0x78] sm:$0xff] %v1948_v47  ;;  %v2224_v50 = vpack.c.bf16 %v8362_v48, %v8362_v48  ;;  %6722 = vmatprep.subr.bf16.mxu1 %v9184_v23  ;;  %2676 = vmatprep.subr.bf16.mxu0 %v8373_v51 }
 0x3c3   :  { %2418 = vmatmul.mubr.bf16.vlgmr.msra.gmra.mrb[52].mxu0 %v2224_v50  ;;  %6719 = vmatmul.mubr.bf16.vlgmr.msra.gmra.mrb[40].mxu1 %v2224_v50 }
 0x3c4   :  { %2708 = vmatprep.mubr.bf16.mxu0 %v9185_v25  ;;  %6738 = vmatprep.mubr.msk.bf16.mxu1 %vm7647_vm0, %v9184_v23 }
 0x3c5   :  { %2677 = vmatpush1.bf16.msra.mxu0 %v8375_v27  ;;  %6723 = vmatpush3.bf16.msra.mxu1 %v7207_v63 }
 0x3c6   :  { %6724 = vmatprep.subr.bf16.mxu1 %v9184_v23  ;;  %2678 = vmatprep.subr.bf16.mxu0 %v8379_v3 }
 0x3c9   :  { %2679 = vmatpush1.bf16.msra.mxu0 %v8382_v9  ;;  %6725 = vmatpush3.bf16.msra.mxu1 %v7211_v17 }
 0x3ca   :  { %6726 = vmatprep.subr.bf16.mxu1 %v9184_v23  ;;  %2680 = vmatprep.subr.bf16.mxu0 %v8386_v5 }
 0x3cd   :  { %2681 = vmatpush1.bf16.msra.mxu0 %v8389_v31  ;;  %6727 = vmatpush3.bf16.msra.mxu1 %v7215_v14 }
 0x3ce   :  { %6728 = vmatprep.subr.bf16.mxu1 %v9184_v23  ;;  %2682 = vmatprep.subr.bf16.mxu0 %v8393_v40 }
 0x3d1   :  { %2683 = vmatpush1.bf16.msra.mxu0 %v8396_v16  ;;  %6729 = vmatpush3.bf16.msra.mxu1 %v7219_v2 }
 0x3d2   :  { %6730 = vmatprep.subr.bf16.mxu1 %v9184_v23  ;;  %2684 = vmatprep.subr.bf16.mxu0 %v8400_v29 }
 0x3d5   :  { %2685 = vmatpush1.bf16.msra.mxu0 %v8403_v53  ;;  %6731 = vmatpush3.bf16.msra.mxu1 %v7223_v33 }
 0x3d6   :  { %6732 = vmatprep.subr.bf16.mxu1 %v9184_v23  ;;  %2686 = vmatprep.subr.bf16.mxu0 %v8407_v58 }
 0x3d9   :  { %2687 = vmatpush1.bf16.msra.mxu0 %v8410_v35  ;;  %6733 = vmatpush3.bf16.msra.mxu1 %v7227_v62 }
 0x3da   :  { %6734 = vmatprep.subr.bf16.mxu1 %v9184_v23  ;;  %2688 = vmatprep.subr.bf16.mxu0 %v8414_v34 }
 0x3dd   :  { %2689 = vmatpush1.bf16.msra.mxu0 %v8417_v4  ;;  %6735 = vmatpush3.bf16.msra.mxu1 %v7231_v36 }
 0x3de   :  { %6736 = vmatprep.subr.bf16.mxu1 %v9184_v23  ;;  %2690 = vmatprep.subr.bf16.mxu0 %v8421_v37 }
 0x3e1   :  { %2691 = vmatpush1.bf16.msra.mxu0 %v8424_v11  ;;  %6737 = vmatpush3.bf16.msra.mxu1 %v7235_v38 }
 0x3e2   :  { %6742 = vmatprep.subr.bf16.mxu1 %v9184_v23  ;;  %2935 = vmatprep.subr.bf16.mxu0 %v8428_v39 }
 0x476   :  { %v2160_v41 = vpop.f32.mrb[48].mxu0  ;;  %v2201_v52 = vpop.f32.mrb[36].mxu1 }
 0x477   :  { %v2161_v30 = vadd.f32 %v2160_v41, %v8282_v7  ;;  %v2162_v42 = vpop.f32.mrb[49].mxu0  ;;  %v6700_v44 = vpop.f32.mrb[37].mxu1  ;;  %v2202_v41 = vadd.f32 %v2201_v52, %v8292_v61 }
 0x478   :  { %v2163_v54 = vadd.f32 %v2162_v42, %v8285_v59  ;;  %v2164_v47 = vpop.f32.mrb[50].mxu0  ;;  %v2204_v50 = vpop.f32.mrb[38].mxu1 }
 0x479   :  { %v2207_v63 = vadd.f32 %v2161_v30, %v8186_v15  ;;  %v2165_v17 = vpop.f32.mrb[51].mxu0  ;;  %v6701_v14 = vpop.f32.mrb[39].mxu1 }
 0x47a   :  { %v2212_v2 = vadd.f32 %v2163_v54, %v8190_v19 }
 0x47b   :  { %v2208_v33 = vmul.f32 0.5, %v2207_v63 }
 0x47c   :  { %v2213_v62 = vmul.f32 0.5, %v2212_v2 }
 0x47d   :  { %7408 = vtanh.f32 %v2208_v33 }
 0x47e   :  { %7410 = vtanh.f32 %v2213_v62 }
 0x487   :  { %v7409_v36 = vpop.eup %7408 }
 0x488   :  { %v2210_v38 = vmul.f32 0.5, %v7409_v36  ;;  %v7411_v45 = vpop.eup %7410 }
 0x489   :  { %v2215_v47 = vmul.f32 0.5, %v7411_v45 }
 0x48a   :  { %v2211_v60 = vadd.f32 0.5, %v2210_v38 }
 0x48b   :  { %v2216_v15 = vadd.f32 0.5, %v2215_v47 }
 0x48c   :  { %v2217_v44 = vmul.f32 %v2211_v60, %v2202_v41 }
 0x48d   :  { %v2220_v33 = vsub.f32 1.0, %v2216_v15  ;;  %v2222_v38 = vmul.f32 %v2216_v15, %v8316_v32 }
 0x48e   :  { %v2218_v42 = vadd.f32 %v2217_v44, %v8194_v22  ;;  %v8443_v44 = vpop.permute.xlu0 %2487 }
 0x48f   :  { %9188 = vst [vmem:[#allocation53_spill] sm:$0xff] %v8443_v44  ;;  %vm2489_vm10 = vcmp.eq.s32.totalorder %v8443_v44, 1 }
 0x490   :  { %7412 = vtanh.f32 %v2218_v42 }
 0x496   :  { %v2419_v30 = vpop.f32.mrb[52].mxu0  ;;  %v2460_v50 = vpop.f32.mrb[40].mxu1 }
 0x497   :  { %v2420_v19 = vadd.f32 %v2419_v30, %v8300_v10  ;;  %v2421_v54 = vpop.f32.mrb[53].mxu0  ;;  %v6720_v63 = vpop.f32.mrb[41].mxu1  ;;  %v8448_v30 = vld [vmem:[#allocation12] ss:$12 sps:$4 sm:$0xff]  }
 0x498   :  { %v2422_v17 = vadd.f32 %v2421_v54, %v8303_v43  ;;  %v2423_v14 = vpop.f32.mrb[54].mxu0  ;;  %v2463_v2 = vpop.f32.mrb[42].mxu1  ;;  %v8460_v54 = vld [vmem:[#allocation12 + $0x1c] ss:$12 sps:$4 sm:$0xff]   ;;  %v8463_v63 = vld [vmem:[#allocation12 + $0x18] ss:$12 sps:$4 sm:$0xff]  }
 0x499   :  { %v2466_v52 = vadd.f32 %v2420_v19, %v8274_v8  ;;  %v2424_v60 = vpop.f32.mrb[55].mxu0  ;;  %v6721_v62 = vpop.f32.mrb[43].mxu1  ;;  %v8473_v2 = vld [vmem:[#allocation12 + $0x30] ss:$12 sps:$4 sm:$0xff]  }
 0x49a   :  { %v7413_v36 = vpop.eup %7412  ;;  %v2471_v22 = vadd.f32 %v2422_v17, %v8276_v13  ;;  %v7239_v13 = vld [vmem:[#allocation12 + $0x8] ss:$12 sps:$4 sm:$0xff]   ;;  %v8477_v60 = vld [vmem:[#allocation12 + $0x4c] ss:$12 sps:$4 sm:$0xff]   ;;  %v2461_v62 = vadd.f32 %v2460_v50, %v8330_v26 }
 0x49b   :  { %v2221_v45 = vmul.f32 %v7413_v36, %v2220_v33  ;;  %v2467_v41 = vmul.f32 0.5, %v2466_v52  ;;  %v8467_v17 = vld [vmem:[#allocation12 + $0x34] ss:$12 sps:$4 sm:$0xff]   ;;  %v7247_v33 = vld [vmem:[#allocation12 + $0x38] ss:$12 sps:$4 sm:$0xff]  }
 0x49c   :  { %v2472_v15 = vmul.f32 0.5, %v2471_v22  ;;  %v8481_v22 = vld [vmem:[#allocation12 + $0x48] ss:$12 sps:$4 sm:$0xff]   ;;  %v8489_v50 = vld [vmem:[#allocation12 + $0x60] ss:$12 sps:$4 sm:$0xff]  }
 0x49d   :  { %v2223_v42 = vadd.f32 %v2222_v38, %v2221_v45  ;;  %7414 = vtanh.f32 %v2467_v41  ;;  %v7251_v45 = vld [vmem:[#allocation12 + $0x50] ss:$12 sps:$4 sm:$0xff]  }
 0x49e   :  { %7416 = vtanh.f32 %v2472_v15  ;;  %v8485_v41 = vld [vmem:[#allocation12 + $0x64] ss:$12 sps:$4 sm:$0xff]   ;;  %v8493_v15 = vld [vmem:[#allocation12 + $0x7c] ss:$12 sps:$4 sm:$0xff]  }
 0x49f   :  { %v2490_v47 = vsel %vm2489_vm10, %v2223_v42, 0.0  ;;  %v8453_v8 = vsel %vm2489_vm10, %v2223_v42, %v8316_v32  ;;  %v7243_v32 = vld [vmem:[#allocation12 + $0x20] ss:$12 sps:$4 sm:$0xff]  }
 0x4a0   :  { %5934 = vst [vmem:[%s9121_s18 + $0x10] sm:$0xff] %v2490_v47  ;;  %v2515_v19 = vpack.c.bf16 %v8453_v8, %v8453_v8 }
 0x4a2   :  { %2709 = vmatmul.mubr.bf16.vlgmr.msra.gmra.mrb[56].mxu0 %v2515_v19  ;;  %6739 = vmatmul.mubr.bf16.vlgmr.msra.gmra.mrb[44].mxu1 %v2515_v19 }
 0x4a3   :  { %2936 = vmatpush1.bf16.msra.mxu0 %v8448_v30  ;;  %6743 = vmatpush3.bf16.msra.mxu1 %v7239_v13  ;;  %v7255_v13 = vld [vmem:[#allocation12 + $0x68] ss:$12 sps:$4 sm:$0xff]  }
 0x4a4   :  { %2937 = vmatprep.subr.bf16.mxu0 %v8460_v54  ;;  %6744 = vmatprep.subr.bf16.mxu1 %v9184_v23 }
 0x4a5   :  { %2967 = vmatprep.mubr.bf16.mxu0 %v9185_v25  ;;  %6758 = vmatprep.mubr.msk.bf16.mxu1 %vm7647_vm0, %v9184_v23 }
 0x4a7   :  { %v7415_v14 = vpop.eup %7414  ;;  %2938 = vmatpush1.bf16.msra.mxu0 %v8463_v63  ;;  %6745 = vmatpush3.bf16.msra.mxu1 %v7243_v32  ;;  %v8496_v32 = vld [vmem:[#allocation12 + $0x78] ss:$12 sps:$4 sm:$0xff]  }
 0x4a8   :  { %v2469_v52 = vmul.f32 0.5, %v7415_v14  ;;  %2939 = vmatprep.subr.bf16.mxu0 %v8467_v17  ;;  %6746 = vmatprep.subr.bf16.mxu1 %v9184_v23  ;;  %v7417_v42 = vpop.eup %7416  ;;  %v8500_v14 = vld [vmem:[#allocation12 + $0x94] ss:$12 sps:$4 sm:$0xff]  }
 0x4a9   :  { %v2474_v19 = vmul.f32 0.5, %v7417_v42 }
 0x4aa   :  { %v2470_v36 = vadd.f32 0.5, %v2469_v52  ;;  %v8503_v52 = vld [vmem:[#allocation12 + $0x90] ss:$12 sps:$4 sm:$0xff]  }
 0x4ab   :  { %2940 = vmatpush1.bf16.msra.mxu0 %v8473_v2  ;;  %6747 = vmatpush3.bf16.msra.mxu1 %v7247_v33  ;;  %v2475_v33 = vadd.f32 0.5, %v2474_v19  ;;  %v7267_v19 = vld [vmem:[#allocation12 + $0xb0] ss:$12 sps:$4 sm:$0xff]  }
 0x4ac   :  { %v2476_v38 = vmul.f32 %v2470_v36, %v2461_v62  ;;  %2941 = vmatprep.subr.bf16.mxu0 %v8477_v60  ;;  %6748 = vmatprep.subr.bf16.mxu1 %v9184_v23  ;;  %v7263_v62 = vld [vmem:[#allocation12 + $0x98] ss:$12 sps:$4 sm:$0xff]  }
 0x4ad   :  { %v8507_v36 = vld [vmem:[#allocation12 + $0xac] ss:$12 sps:$4 sm:$0xff]  }
 0x4ae   :  { %v2477_v47 = vadd.f32 %v2476_v38, %v8252_v1  ;;  %v7259_v1 = vld [vmem:[#allocation12 + $0x80] ss:$12 sps:$4 sm:$0xff]  }
 0x4af   :  { %2942 = vmatpush1.bf16.msra.mxu0 %v8481_v22  ;;  %6749 = vmatpush3.bf16.msra.mxu1 %v7251_v45  ;;  %v2479_v45 = vsub.f32 1.0, %v2475_v33 }
 0x4b0   :  { %7418 = vtanh.f32 %v2477_v47  ;;  %2943 = vmatprep.subr.bf16.mxu0 %v8485_v41  ;;  %6750 = vmatprep.subr.bf16.mxu1 %v9184_v23  ;;  %v2481_v47 = vmul.f32 %v2475_v33, %v8362_v48 }
 0x4b3   :  { %2944 = vmatpush1.bf16.msra.mxu0 %v8489_v50  ;;  %6751 = vmatpush3.bf16.msra.mxu1 %v7255_v13  ;;  %v8511_v13 = vld [vmem:[#allocation12 + $0xa8] ss:$12 sps:$4 sm:$0xff]  }
 0x4b4   :  { %2945 = vmatprep.subr.bf16.mxu0 %v8493_v15  ;;  %6752 = vmatprep.subr.bf16.mxu1 %v9184_v23 }
 0x4b7   :  { %2946 = vmatpush1.bf16.msra.mxu0 %v8496_v32  ;;  %6753 = vmatpush3.bf16.msra.mxu1 %v7259_v1  ;;  %v8515_v1 = vpop.permute.xlu1 %2495 }
 0x4b8   :  { %2947 = vmatprep.subr.bf16.mxu0 %v8500_v14  ;;  %6754 = vmatprep.subr.bf16.mxu1 %v9184_v23  ;;  %9189 = vst [vmem:[#allocation54_spill] sm:$0xff] %v8515_v1  ;;  %vm2497_vm11 = vcmp.eq.s32.totalorder %v8515_v1, 1 }
 0x4ba   :  { %v7419_v38 = vpop.eup %7418 }
 0x4bb   :  { %v2480_v42 = vmul.f32 %v7419_v38, %v2479_v45  ;;  %2948 = vmatpush1.bf16.msra.mxu0 %v8503_v52  ;;  %6755 = vmatpush3.bf16.msra.mxu1 %v7263_v62  ;;  %v7270_v38 = vld [vmem:[#allocation11 + $0x38] ss:$12 sps:$4 sm:$0xff]  }
 0x4bc   :  { %2949 = vmatprep.subr.bf16.mxu0 %v8507_v36  ;;  %6756 = vmatprep.subr.bf16.mxu1 %v9184_v23 }
 0x4bd   :  { %v2482_v44 = vadd.f32 %v2481_v47, %v2480_v42  ;;  %v7271_v42 = vld [vmem:[#allocation11 + $0x50] ss:$12 sps:$4 sm:$0xff]   ;;  %v7272_v47 = vld [vmem:[#allocation11 + $0x68] ss:$12 sps:$4 sm:$0xff]  }
 0x4bf   :  { %v2498_v45 = vsel %vm2497_vm11, %v2482_v44, 0.0  ;;  %2950 = vmatpush1.bf16.msra.mxu0 %v8511_v13  ;;  %6757 = vmatpush3.bf16.msra.mxu1 %v7267_v19  ;;  %v8524_v33 = vsel %vm2497_vm11, %v2482_v44, %v8362_v48  ;;  %v7268_v48 = vld [vmem:[#allocation11 + $0x8] ss:$12 sps:$4 sm:$0xff]   ;;  %v7269_v44 = vld [vmem:[#allocation11 + $0x20] ss:$12 sps:$4 sm:$0xff]  }
 0x4c0   :  { %5935 = vst [vmem:[%s9121_s18 + $0x68] sm:$0xff] %v2498_v45  ;;  %v2774_v62 = vpack.c.bf16 %v8524_v33, %v8524_v33  ;;  %3226 = vmatprep.subr.bf16.mxu0 %v8373_v51  ;;  %6762 = vmatprep.subr.bf16.mxu1 %v9184_v23  ;;  %v7273_v19 = vld [vmem:[#allocation11 + $0x80] ss:$12 sps:$4 sm:$0xff]   ;;  %v7274_v45 = vld [vmem:[#allocation11 + $0x98] ss:$12 sps:$4 sm:$0xff]  }
 0x4c2   :  { %2968 = vmatmul.mubr.bf16.vlgmr.msra.gmra.mrb[60].mxu0 %v2774_v62  ;;  %6759 = vmatmul.mubr.bf16.vlgmr.msra.gmra.mrb[48].mxu1 %v2774_v62  ;;  %v7275_v62 = vld [vmem:[#allocation11 + $0xb0] ss:$12 sps:$4 sm:$0xff]  }
 0x4c3   :  { %3227 = vmatpush1.bf16.msra.mxu0 %v8375_v27  ;;  %3258 = vmatprep.mubr.bf16.mxu0 %v9185_v25 }
 0x4c4   :  { %3228 = vmatprep.subr.bf16.mxu0 %v8379_v3  ;;  %6778 = vmatprep.mubr.msk.bf16.mxu1 %vm7647_vm0, %v9184_v23 }
 0x4c5   :  { %6763 = vmatpush3.bf16.msra.mxu1 %v7268_v48 }
 0x4c6   :  { %6764 = vmatprep.subr.bf16.mxu1 %v9184_v23 }
 0x4c7   :  { %3229 = vmatpush1.bf16.msra.mxu0 %v8382_v9 }
 0x4c8   :  { %3230 = vmatprep.subr.bf16.mxu0 %v8386_v5 }
 0x4c9   :  { %6765 = vmatpush3.bf16.msra.mxu1 %v7269_v44 }
 0x4ca   :  { %6766 = vmatprep.subr.bf16.mxu1 %v9184_v23 }
 0x4cb   :  { %3231 = vmatpush1.bf16.msra.mxu0 %v8389_v31 }
 0x4cc   :  { %3232 = vmatprep.subr.bf16.mxu0 %v8393_v40 }
 0x4cd   :  { %6767 = vmatpush3.bf16.msra.mxu1 %v7270_v38 }
 0x4ce   :  { %6768 = vmatprep.subr.bf16.mxu1 %v9184_v23 }
 0x4cf   :  { %3233 = vmatpush1.bf16.msra.mxu0 %v8396_v16 }
 0x4d0   :  { %3234 = vmatprep.subr.bf16.mxu0 %v8400_v29 }
 0x4d1   :  { %6769 = vmatpush3.bf16.msra.mxu1 %v7271_v42 }
 0x4d2   :  { %6770 = vmatprep.subr.bf16.mxu1 %v9184_v23 }
 0x4d3   :  { %3235 = vmatpush1.bf16.msra.mxu0 %v8403_v53 }
 0x4d4   :  { %3236 = vmatprep.subr.bf16.mxu0 %v8407_v58 }
 0x4d5   :  { %6771 = vmatpush3.bf16.msra.mxu1 %v7272_v47 }
 0x4d6   :  { %6772 = vmatprep.subr.bf16.mxu1 %v9184_v23 }
 0x4d7   :  { %3237 = vmatpush1.bf16.msra.mxu0 %v8410_v35 }
 0x4d8   :  { %3238 = vmatprep.subr.bf16.mxu0 %v8414_v34 }
 0x4d9   :  { %6773 = vmatpush3.bf16.msra.mxu1 %v7273_v19 }
 0x4da   :  { %6774 = vmatprep.subr.bf16.mxu1 %v9184_v23 }
 0x4db   :  { %3239 = vmatpush1.bf16.msra.mxu0 %v8417_v4 }
 0x4dc   :  { %3240 = vmatprep.subr.bf16.mxu0 %v8421_v37 }
 0x4dd   :  { %6775 = vmatpush3.bf16.msra.mxu1 %v7274_v45 }
 0x4de   :  { %6776 = vmatprep.subr.bf16.mxu1 %v9184_v23 }
 0x4df   :  { %3241 = vmatpush1.bf16.msra.mxu0 %v8424_v11 }
 0x4e0   :  { %3485 = vmatprep.subr.bf16.mxu0 %v8428_v39 }
 0x4e1   :  { %6777 = vmatpush3.bf16.msra.mxu1 %v7275_v62 }
 0x4e2   :  { %6782 = vmatprep.subr.bf16.mxu1 %v9184_v23 }
 0x575   :  { %v2710_v48 = vpop.f32.mrb[56].mxu0  ;;  %v2751_v44 = vpop.f32.mrb[44].mxu1 }
 0x576   :  { %v2711_v38 = vadd.f32 %v2710_v48, %v8282_v7  ;;  %v2712_v42 = vpop.f32.mrb[57].mxu0  ;;  %v6740_v47 = vpop.f32.mrb[45].mxu1  ;;  %v2752_v48 = vadd.f32 %v2751_v44, %v8292_v61 }
 0x577   :  { %v2713_v1 = vadd.f32 %v2712_v42, %v8285_v59  ;;  %v2714_v56 = vpop.f32.mrb[58].mxu0  ;;  %v2754_v19 = vpop.f32.mrb[46].mxu1 }
 0x578   :  { %v2757_v55 = vadd.f32 %v2711_v38, %v8196_v24  ;;  %v2715_v18 = vpop.f32.mrb[59].mxu0  ;;  %v6741_v45 = vpop.f32.mrb[47].mxu1 }
 0x579   :  { %v2762_v46 = vadd.f32 %v2713_v1, %v8198_v28 }
 0x57a   :  { %v2758_v20 = vmul.f32 0.5, %v2757_v55 }
 0x57b   :  { %v2763_v62 = vmul.f32 0.5, %v2762_v46 }
 0x57c   :  { %7420 = vtanh.f32 %v2758_v20 }
 0x57d   :  { %7422 = vtanh.f32 %v2763_v62 }
 0x586   :  { %v7421_v49 = vpop.eup %7420 }
 0x587   :  { %v2760_v0 = vmul.f32 0.5, %v7421_v49  ;;  %v7423_v39 = vpop.eup %7422 }
 0x588   :  { %v2765_v42 = vmul.f32 0.5, %v7423_v39 }
 0x589   :  { %v2761_v7 = vadd.f32 0.5, %v2760_v0 }
 0x58a   :  { %v2766_v24 = vadd.f32 0.5, %v2765_v42 }
 0x58b   :  { %v2767_v47 = vmul.f32 %v2761_v7, %v2752_v48 }
 0x58c   :  { %v2770_v19 = vsub.f32 1.0, %v2766_v24  ;;  %v2772_v62 = vmul.f32 %v2766_v24, %v8453_v8 }
 0x58d   :  { %v2768_v56 = vadd.f32 %v2767_v47, %v8184_v12  ;;  %v8571_v47 = vpop.permute.xlu0 %3037 }
 0x58e   :  { %vm3039_vm12 = vcmp.eq.s32.totalorder %v8571_v47, 1  ;;  %v7380_v47 = vld [vmem:[#allocation11 + $0x8] ss:$12 sps:$4 sm:$0xff]  }
 0x58f   :  { %7424 = vtanh.f32 %v2768_v56 }
 0x595   :  { %v2969_v18 = vpop.f32.mrb[60].mxu0  ;;  %v3010_v38 = vpop.f32.mrb[48].mxu1 }
 0x596   :  { %v2970_v28 = vadd.f32 %v2969_v18, %v8300_v10  ;;  %v2971_v55 = vpop.f32.mrb[61].mxu0  ;;  %v6760_v20 = vpop.f32.mrb[49].mxu1  ;;  %v7276_v18 = vld [vmem:[#allocation12 + $0x8] ss:$12 sps:$4 sm:$0xff]  }
 0x597   :  { %v2972_v46 = vadd.f32 %v2971_v55, %v8303_v43  ;;  %v2973_v1 = vpop.f32.mrb[62].mxu0  ;;  %v3013_v49 = vpop.f32.mrb[50].mxu1  ;;  %v7278_v55 = vld [vmem:[#allocation12 + $0x38] ss:$12 sps:$4 sm:$0xff]  }
 0x598   :  { %v3016_v0 = vadd.f32 %v2970_v28, %v8270_v57  ;;  %v2974_v7 = vpop.f32.mrb[63].mxu0  ;;  %v6761_v44 = vpop.f32.mrb[51].mxu1  ;;  %v7277_v28 = vld [vmem:[#allocation12 + $0x20] ss:$12 sps:$4 sm:$0xff]   ;;  %v7279_v49 = vld [vmem:[#allocation12 + $0x50] ss:$12 sps:$4 sm:$0xff]  }
 0x599   :  { %v7425_v45 = vpop.eup %7424  ;;  %v3021_v12 = vadd.f32 %v2972_v46, %v8272_v6  ;;  %v3011_v46 = vadd.f32 %v3010_v38, %v8330_v26  ;;  %v7280_v44 = vld [vmem:[#allocation12 + $0x68] ss:$12 sps:$4 sm:$0xff]  }
 0x59a   :  { %v2771_v39 = vmul.f32 %v7425_v45, %v2770_v19  ;;  %v3017_v48 = vmul.f32 0.5, %v3016_v0  ;;  %v7281_v45 = vld [vmem:[#allocation12 + $0x80] ss:$12 sps:$4 sm:$0xff]  }
 0x59b   :  { %v3022_v6 = vmul.f32 0.5, %v3021_v12 }
 0x59c   :  { %v2773_v56 = vadd.f32 %v2772_v62, %v2771_v39  ;;  %7426 = vtanh.f32 %v3017_v48 }
 0x59d   :  { %7428 = vtanh.f32 %v3022_v6 }
 0x59e   :  { %v3040_v42 = vsel %vm3039_vm12, %v2773_v56, 0.0  ;;  %v8579_v57 = vsel %vm3039_vm12, %v2773_v56, %v8453_v8 }
 0x59f   :  { %5984 = vst [vmem:[%s9121_s18 + $0x20] sm:$0xff] %v3040_v42  ;;  %v3065_v24 = vpack.c.bf16 %v8579_v57, %v8579_v57  ;;  %v7283_v42 = vld [vmem:[#allocation12 + $0xb0] ss:$12 sps:$4 sm:$0xff]  }
 0x5a1   :  { %3259 = vmatmul.mubr.bf16.vlgmr.msra.gmra.mrb[64].mxu0 %v3065_v24  ;;  %6779 = vmatmul.mubr.bf16.vlgmr.msra.gmra.mrb[52].mxu1 %v3065_v24 }
 0x5a2   :  { %3486 = vmatpush1.bf16.msra.mxu0 %v8448_v30  ;;  %6783 = vmatpush3.bf16.msra.mxu1 %v7276_v18  ;;  %v8613_v18 = vpop.permute.xlu1 %3045 }
 0x5a3   :  { %3487 = vmatprep.subr.bf16.mxu0 %v8460_v54  ;;  %6784 = vmatprep.subr.bf16.mxu1 %v9184_v23  ;;  %vm3047_vm13 = vcmp.eq.s32.totalorder %v8613_v18, 1  ;;  %v7374_v18 = vld [vmem:[#allocation12 + $0x38] ss:$12 sps:$4 sm:$0xff]  }
 0x5a4   :  { %3517 = vmatprep.mubr.bf16.mxu0 %v9185_v25  ;;  %6798 = vmatprep.mubr.msk.bf16.mxu1 %vm7647_vm0, %v9184_v23 }
 0x5a6   :  { %v7427_v8 = vpop.eup %7426  ;;  %3488 = vmatpush1.bf16.msra.mxu0 %v8463_v63  ;;  %6785 = vmatpush3.bf16.msra.mxu1 %v7277_v28 }
 0x5a7   :  { %v3019_v20 = vmul.f32 0.5, %v7427_v8  ;;  %3489 = vmatprep.subr.bf16.mxu0 %v8467_v17  ;;  %6786 = vmatprep.subr.bf16.mxu1 %v9184_v23  ;;  %v7429_v0 = vpop.eup %7428 }
 0x5a8   :  { %v3024_v38 = vmul.f32 0.5, %v7429_v0 }
 0x5a9   :  { %v3020_v1 = vadd.f32 0.5, %v3019_v20  ;;  %v9192_v20 = vld [vmem:[#allocation20_spill] sm:$0xff] }
 0x5aa   :  { %3490 = vmatpush1.bf16.msra.mxu0 %v8473_v2  ;;  %6787 = vmatpush3.bf16.msra.mxu1 %v7278_v55  ;;  %v3025_v12 = vadd.f32 0.5, %v3024_v38 }
 0x5ab   :  { %v3026_v19 = vmul.f32 %v3020_v1, %v3011_v46  ;;  %3491 = vmatprep.subr.bf16.mxu0 %v8477_v60  ;;  %6788 = vmatprep.subr.bf16.mxu1 %v9184_v23 }
 0x5ac   :  { %v3029_v39 = vsub.f32 1.0, %v3025_v12  ;;  %v3031_v56 = vmul.f32 %v3025_v12, %v8524_v33 }
 0x5ad   :  { %v3027_v7 = vadd.f32 %v3026_v19, %v8264_v21  ;;  %v7282_v21 = vld [vmem:[#allocation12 + $0x98] ss:$12 sps:$4 sm:$0xff]  }
 0x5ae   :  { %3492 = vmatpush1.bf16.msra.mxu0 %v8481_v22  ;;  %6789 = vmatpush3.bf16.msra.mxu1 %v7279_v49  ;;  %v9193_v19 = vld [vmem:[#allocation22_spill] sm:$0xff] }
 0x5af   :  { %7430 = vtanh.f32 %v3027_v7  ;;  %3493 = vmatprep.subr.bf16.mxu0 %v8485_v41  ;;  %6790 = vmatprep.subr.bf16.mxu1 %v9184_v23 }
 0x5b2   :  { %3494 = vmatpush1.bf16.msra.mxu0 %v8489_v50  ;;  %6791 = vmatpush3.bf16.msra.mxu1 %v7280_v44 }
 0x5b3   :  { %3495 = vmatprep.subr.bf16.mxu0 %v8493_v15  ;;  %6792 = vmatprep.subr.bf16.mxu1 %v9184_v23 }
 0x5b6   :  { %3496 = vmatpush1.bf16.msra.mxu0 %v8496_v32  ;;  %6793 = vmatpush3.bf16.msra.mxu1 %v7281_v45 }
 0x5b7   :  { %3497 = vmatprep.subr.bf16.mxu0 %v8500_v14  ;;  %6794 = vmatprep.subr.bf16.mxu1 %v9184_v23 }
 0x5b9   :  { %v7431_v62 = vpop.eup %7430 }
 0x5ba   :  { %v3030_v48 = vmul.f32 %v7431_v62, %v3029_v39  ;;  %3498 = vmatpush1.bf16.msra.mxu0 %v8503_v52  ;;  %6795 = vmatpush3.bf16.msra.mxu1 %v7282_v21 }
 0x5bb   :  { %3499 = vmatprep.subr.bf16.mxu0 %v8507_v36  ;;  %6796 = vmatprep.subr.bf16.mxu1 %v9184_v23 }
 0x5bc   :  { %v3032_v6 = vadd.f32 %v3031_v56, %v3030_v48  ;;  %v9194_v48 = vld [vmem:[#allocation18_spill] sm:$0xff] }
 0x5be   :  { %v3048_v24 = vsel %vm3047_vm13, %v3032_v6, 0.0  ;;  %3500 = vmatpush1.bf16.msra.mxu0 %v8511_v13  ;;  %6797 = vmatpush3.bf16.msra.mxu1 %v7283_v42  ;;  %v8622_v28 = vsel %vm3047_vm13, %v3032_v6, %v8524_v33 }
 0x5bf   :  { %5985 = vst [vmem:[%s9121_s18 + $0x58] sm:$0xff] %v3048_v24  ;;  %v3324_v8 = vpack.c.bf16 %v8622_v28, %v8622_v28  ;;  %3774 = vmatprep.subr.bf16.mxu0 %v8373_v51  ;;  %6802 = vmatprep.subr.bf16.mxu1 %v9184_v23  ;;  %v9190_v51 = vld [vmem:[#allocation52_spill] sm:$0xff] }
 0x5c1   :  { %3518 = vmatmul.mubr.bf16.vlgmr.msra.gmra.mrb[68].mxu0 %v3324_v8  ;;  %6799 = vmatmul.mubr.bf16.vlgmr.msra.gmra.mrb[56].mxu1 %v3324_v8 }
 0x5c2   :  { %3775 = vmatpush1.bf16.msra.mxu0 %v8375_v27  ;;  %3806 = vmatprep.mubr.bf16.mxu0 %v9185_v25  ;;  %v7284_v27 = vld [vmem:[#allocation11 + $0x8] ss:$12 sps:$4 sm:$0xff]  }
 0x5c3   :  { %3776 = vmatprep.subr.bf16.mxu0 %v8379_v3  ;;  %6818 = vmatprep.mubr.msk.bf16.mxu1 %vm7647_vm0, %v9184_v23  ;;  %v7285_v3 = vld [vmem:[#allocation11 + $0x20] ss:$12 sps:$4 sm:$0xff]  }
 0x5c4   :  { %6803 = vmatpush3.bf16.msra.mxu1 %v7284_v27 }
 0x5c5   :  { %6804 = vmatprep.subr.bf16.mxu1 %v9184_v23 }
 0x5c6   :  { %3777 = vmatpush1.bf16.msra.mxu0 %v8382_v9  ;;  %v7286_v9 = vld [vmem:[#allocation11 + $0x38] ss:$12 sps:$4 sm:$0xff]  }
 0x5c7   :  { %3778 = vmatprep.subr.bf16.mxu0 %v8386_v5  ;;  %v7287_v5 = vld [vmem:[#allocation11 + $0x50] ss:$12 sps:$4 sm:$0xff]  }
 0x5c8   :  { %6805 = vmatpush3.bf16.msra.mxu1 %v7285_v3 }
 0x5c9   :  { %6806 = vmatprep.subr.bf16.mxu1 %v9184_v23 }
 0x5ca   :  { %3779 = vmatpush1.bf16.msra.mxu0 %v8389_v31  ;;  %v7288_v31 = vld [vmem:[#allocation11 + $0x68] ss:$12 sps:$4 sm:$0xff]  }
 0x5cb   :  { %3780 = vmatprep.subr.bf16.mxu0 %v8393_v40  ;;  %v7289_v40 = vld [vmem:[#allocation11 + $0x80] ss:$12 sps:$4 sm:$0xff]  }
 0x5cc   :  { %6807 = vmatpush3.bf16.msra.mxu1 %v7286_v9 }
 0x5cd   :  { %6808 = vmatprep.subr.bf16.mxu1 %v9184_v23 }
 0x5ce   :  { %3781 = vmatpush1.bf16.msra.mxu0 %v8396_v16  ;;  %v7290_v16 = vld [vmem:[#allocation11 + $0x98] ss:$12 sps:$4 sm:$0xff]  }
 0x5cf   :  { %3782 = vmatprep.subr.bf16.mxu0 %v8400_v29  ;;  %v7291_v29 = vld [vmem:[#allocation11 + $0xb0] ss:$12 sps:$4 sm:$0xff]  }
 0x5d0   :  { %6809 = vmatpush3.bf16.msra.mxu1 %v7287_v5 }
 0x5d1   :  { %6810 = vmatprep.subr.bf16.mxu1 %v9184_v23 }
 0x5d2   :  { %3783 = vmatpush1.bf16.msra.mxu0 %v8403_v53 }
 0x5d3   :  { %3784 = vmatprep.subr.bf16.mxu0 %v8407_v58 }
 0x5d4   :  { %6811 = vmatpush3.bf16.msra.mxu1 %v7288_v31 }
 0x5d5   :  { %6812 = vmatprep.subr.bf16.mxu1 %v9184_v23 }
 0x5d6   :  { %3785 = vmatpush1.bf16.msra.mxu0 %v8410_v35  ;;  %v9191_v35 = vld [vmem:[#allocation48_spill] sm:$0xff] }
 0x5d7   :  { %3786 = vmatprep.subr.bf16.mxu0 %v8414_v34 }
 0x5d8   :  { %6813 = vmatpush3.bf16.msra.mxu1 %v7289_v40 }
 0x5d9   :  { %6814 = vmatprep.subr.bf16.mxu1 %v9184_v23 }
 0x5da   :  { %3787 = vmatpush1.bf16.msra.mxu0 %v8417_v4 }
 0x5db   :  { %3788 = vmatprep.subr.bf16.mxu0 %v8421_v37 }
 0x5dc   :  { %6815 = vmatpush3.bf16.msra.mxu1 %v7290_v16  ;;  %v9195_v16 = vld [vmem:[#allocation46_spill] sm:$0xff] }
 0x5dd   :  { %6816 = vmatprep.subr.bf16.mxu1 %v9184_v23 }
 0x5de   :  { %3789 = vmatpush1.bf16.msra.mxu0 %v8424_v11 }
 0x5df   :  { %4033 = vmatprep.subr.bf16.mxu0 %v9190_v51 }
 0x5e0   :  { %6817 = vmatpush3.bf16.msra.mxu1 %v7291_v29 }
 0x5e1   :  { %6822 = vmatprep.subr.bf16.mxu1 %v9184_v23 }
 0x674   :  { %v3260_v53 = vpop.f32.mrb[64].mxu0  ;;  %v3301_v58 = vpop.f32.mrb[52].mxu1 }
 0x675   :  { %v3261_v34 = vadd.f32 %v3260_v53, %v9191_v35  ;;  %v3262_v4 = vpop.f32.mrb[65].mxu0  ;;  %v6780_v37 = vpop.f32.mrb[53].mxu1  ;;  %v3302_v12 = vadd.f32 %v3301_v58, %v8292_v61 }
 0x676   :  { %v3263_v11 = vadd.f32 %v3262_v4, %v8285_v59  ;;  %v3264_v33 = vpop.f32.mrb[66].mxu0  ;;  %v3304_v55 = vpop.f32.mrb[54].mxu1  ;;  %v9196_v4 = vld [vmem:[#allocation47_spill] sm:$0xff] }
 0x677   :  { %v3307_v46 = vadd.f32 %v3261_v34, %v9192_v20  ;;  %v3265_v1 = vpop.f32.mrb[67].mxu0  ;;  %v6781_v49 = vpop.f32.mrb[55].mxu1 }
 0x678   :  { %v3312_v0 = vadd.f32 %v3263_v11, %v9193_v19  ;;  %v8668_v11 = vpop.permute.xlu0 %3587  ;;  %v7292_v19 = vld [vmem:[#allocation12 + $0x8] ss:$12 sps:$4 sm:$0xff]  }
 0x679   :  { %v3308_v7 = vmul.f32 0.5, %v3307_v46  ;;  %vm3589_vm14 = vcmp.eq.s32.totalorder %v8668_v11, 1  ;;  %v7364_v11 = vld [vmem:[#allocation11 + $0x8] ss:$12 sps:$4 sm:$0xff]  }
 0x67a   :  { %v3313_v44 = vmul.f32 0.5, %v3312_v0 }
 0x67b   :  { %7432 = vtanh.f32 %v3308_v7 }
 0x67c   :  { %7434 = vtanh.f32 %v3313_v44  ;;  %v7293_v44 = vld [vmem:[#allocation12 + $0x20] ss:$12 sps:$4 sm:$0xff]  }
 0x685   :  { %v7433_v38 = vpop.eup %7432 }
 0x686   :  { %v3310_v45 = vmul.f32 0.5, %v7433_v38  ;;  %v7435_v62 = vpop.eup %7434  ;;  %v7294_v38 = vld [vmem:[#allocation12 + $0x38] ss:$12 sps:$4 sm:$0xff]  }
 0x687   :  { %v3315_v42 = vmul.f32 0.5, %v7435_v62 }
 0x688   :  { %v3311_v21 = vadd.f32 0.5, %v3310_v45 }
 0x689   :  { %v3316_v6 = vadd.f32 0.5, %v3315_v42  ;;  %v8707_v42 = vpop.permute.xlu1 %3595 }
 0x68a   :  { %v3317_v39 = vmul.f32 %v3311_v21, %v3302_v12  ;;  %v7295_v12 = vld [vmem:[#allocation12 + $0x50] ss:$12 sps:$4 sm:$0xff]   ;;  %vm3597_vm15 = vcmp.eq.s32.totalorder %v8707_v42, 1  ;;  %v8822_v42 = vld [vmem:[#allocation12 + $0x34] ss:$12 sps:$4 sm:$0xff]  }
 0x68b   :  { %v3320_v40 = vsub.f32 1.0, %v3316_v6  ;;  %v3322_v55 = vmul.f32 %v3316_v6, %v8579_v57 }
 0x68c   :  { %v3318_v56 = vadd.f32 %v3317_v39, %v9194_v48  ;;  %v9197_v39 = vld [vmem:[#allocation43_spill] sm:$0xff] }
 0x68d   :  { %v7297_v48 = vld [vmem:[#allocation12 + $0x80] ss:$12 sps:$4 sm:$0xff]  }
 0x68e   :  { %7436 = vtanh.f32 %v3318_v56 }
 0x694   :  { %v3519_v24 = vpop.f32.mrb[68].mxu0  ;;  %v3560_v8 = vpop.f32.mrb[56].mxu1 }
 0x695   :  { %v3520_v51 = vadd.f32 %v3519_v24, %v8300_v10  ;;  %v3521_v27 = vpop.f32.mrb[69].mxu0  ;;  %v6800_v3 = vpop.f32.mrb[57].mxu1 }
 0x696   :  { %v3522_v9 = vadd.f32 %v3521_v27, %v8303_v43  ;;  %v3523_v5 = vpop.f32.mrb[70].mxu0  ;;  %v3563_v31 = vpop.f32.mrb[58].mxu1  ;;  %v7307_v27 = vld [vmem:[#allocation11 + $0x20] ss:$12 sps:$4 sm:$0xff]  }
 0x697   :  { %v3566_v29 = vadd.f32 %v3520_v51, %v9195_v16  ;;  %v3524_v53 = vpop.f32.mrb[71].mxu0  ;;  %v6801_v58 = vpop.f32.mrb[59].mxu1  ;;  %v8740_v51 = vld [vmem:[#allocation11 + $0x18] ss:$12 sps:$4 sm:$0xff]   ;;  %v8744_v3 = vld [vmem:[#allocation11 + $0x34] ss:$12 sps:$4 sm:$0xff]  }
 0x698   :  { %v7437_v34 = vpop.eup %7436  ;;  %v3571_v37 = vadd.f32 %v3522_v9, %v9196_v4  ;;  %v8747_v9 = vld [vmem:[#allocation11 + $0x30] ss:$12 sps:$4 sm:$0xff]   ;;  %v7311_v5 = vld [vmem:[#allocation11 + $0x38] ss:$12 sps:$4 sm:$0xff]   ;;  %v8761_v53 = vld [vmem:[#allocation11 + $0x60] ss:$12 sps:$4 sm:$0xff]  }
 0x699   :  { %v3321_v33 = vmul.f32 %v7437_v34, %v3320_v40  ;;  %v3567_v20 = vmul.f32 0.5, %v3566_v29  ;;  %v8751_v31 = vld [vmem:[#allocation11 + $0x4c] ss:$12 sps:$4 sm:$0xff]   ;;  %v8754_v40 = vld [vmem:[#allocation11 + $0x48] ss:$12 sps:$4 sm:$0xff]  }
 0x69a   :  { %v3572_v0 = vmul.f32 0.5, %v3571_v37  ;;  %v7315_v16 = vld [vmem:[#allocation11 + $0x50] ss:$12 sps:$4 sm:$0xff]   ;;  %v7319_v58 = vld [vmem:[#allocation11 + $0x68] ss:$12 sps:$4 sm:$0xff]  }
 0x69b   :  { %v3323_v46 = vadd.f32 %v3322_v55, %v3321_v33  ;;  %7438 = vtanh.f32 %v3567_v20  ;;  %v8758_v29 = vld [vmem:[#allocation11 + $0x64] ss:$12 sps:$4 sm:$0xff]   ;;  %v8765_v34 = vld [vmem:[#allocation11 + $0x7c] ss:$12 sps:$4 sm:$0xff]   ;;  %v7323_v37 = vld [vmem:[#allocation11 + $0x80] ss:$12 sps:$4 sm:$0xff]  }
 0x69c   :  { %7440 = vtanh.f32 %v3572_v0  ;;  %v8768_v4 = vld [vmem:[#allocation11 + $0x78] ss:$12 sps:$4 sm:$0xff]   ;;  %v8772_v33 = vld [vmem:[#allocation11 + $0x94] ss:$12 sps:$4 sm:$0xff]   ;;  %v8775_v55 = vld [vmem:[#allocation11 + $0x90] ss:$12 sps:$4 sm:$0xff]  }
 0x69d   :  { %v3590_v1 = vsel %vm3589_vm14, %v3323_v46, 0.0  ;;  %v8677_v49 = vsel %vm3589_vm14, %v3323_v46, %v8579_v57  ;;  %v7327_v20 = vld [vmem:[#allocation11 + $0x98] ss:$12 sps:$4 sm:$0xff]  }
 0x69e   :  { %6034 = vst [vmem:[%s9121_s18 + $0x30] sm:$0xff] %v3590_v1  ;;  %v3613_v7 = vpack.c.bf16 %v8677_v49, %v8677_v49  ;;  %v8779_v46 = vld [vmem:[#allocation11 + $0xac] ss:$12 sps:$4 sm:$0xff]   ;;  %v8782_v1 = vld [vmem:[#allocation11 + $0xa8] ss:$12 sps:$4 sm:$0xff]  }
 0x69f   :  { %v8786_v0 = vld [vmem:[#allocation12 + $0x4] ss:$12 sps:$4 sm:$0xff]  }
 0x6a0   :  { %3807 = vmatmul.mubr.bf16.vlgmr.msra.gmra.mrb[72].mxu0 %v3613_v7  ;;  %6819 = vmatmul.mubr.bf16.vlgmr.msra.gmra.mrb[60].mxu1 %v3613_v7 }
 0x6a1   :  { %4034 = vmatpush1.bf16.msra.mxu0 %v8448_v30  ;;  %6823 = vmatpush3.bf16.msra.mxu1 %v7292_v19  ;;  %v3561_v30 = vadd.f32 %v3560_v8, %v8330_v26  ;;  %v8737_v8 = vld [vmem:[#allocation11 + $0x1c] ss:$12 sps:$4 sm:$0xff]  }
 0x6a2   :  { %4035 = vmatprep.subr.bf16.mxu0 %v8460_v54  ;;  %6824 = vmatprep.subr.bf16.mxu1 %v9184_v23  ;;  %v7331_v19 = vld [vmem:[#allocation11 + $0xb0] ss:$12 sps:$4 sm:$0xff]  }
 0x6a3   :  { %4065 = vmatprep.mubr.bf16.mxu0 %v9185_v25  ;;  %6838 = vmatprep.mubr.msk.bf16.mxu1 %vm7647_vm0, %v9184_v23 }
 0x6a5   :  { %v7439_v57 = vpop.eup %7438  ;;  %4036 = vmatpush1.bf16.msra.mxu0 %v8463_v63  ;;  %6825 = vmatpush3.bf16.msra.mxu1 %v7293_v44 }
 0x6a6   :  { %v3569_v45 = vmul.f32 0.5, %v7439_v57  ;;  %4037 = vmatprep.subr.bf16.mxu0 %v8467_v17  ;;  %6826 = vmatprep.subr.bf16.mxu1 %v9184_v23  ;;  %v7441_v63 = vpop.eup %7440  ;;  %v7296_v17 = vld [vmem:[#allocation12 + $0x68] ss:$12 sps:$4 sm:$0xff]  }
 0x6a8   :  { %v3570_v54 = vadd.f32 0.5, %v3569_v45 }
 0x6a9   :  { %4038 = vmatpush1.bf16.msra.mxu0 %v8473_v2  ;;  %6827 = vmatpush3.bf16.msra.mxu1 %v7294_v38  ;;  %v3574_v2 = vmul.f32 0.5, %v7441_v63 }
 0x6aa   :  { %v3576_v21 = vmul.f32 %v3570_v54, %v3561_v30  ;;  %4039 = vmatprep.subr.bf16.mxu0 %v8477_v60  ;;  %6828 = vmatprep.subr.bf16.mxu1 %v9184_v23 }
 0x6ab   :  { %v3575_v60 = vadd.f32 0.5, %v3574_v2 }
 0x6ac   :  { %v3577_v62 = vadd.f32 %v3576_v21, %v9197_v39  ;;  %v9198_v21 = vld [vmem:[#allocation25_spill] sm:$0xff] }
 0x6ad   :  { %4040 = vmatpush1.bf16.msra.mxu0 %v8481_v22  ;;  %6829 = vmatpush3.bf16.msra.mxu1 %v7295_v12  ;;  %v7298_v22 = vld [vmem:[#allocation12 + $0x98] ss:$12 sps:$4 sm:$0xff]   ;;  %v3581_v6 = vmul.f32 %v3575_v60, %v8622_v28 }
 0x6ae   :  { %7442 = vtanh.f32 %v3577_v62  ;;  %4041 = vmatprep.subr.bf16.mxu0 %v8485_v41  ;;  %6830 = vmatprep.subr.bf16.mxu1 %v9184_v23  ;;  %v3579_v41 = vsub.f32 1.0, %v3575_v60 }
 0x6b1   :  { %4042 = vmatpush1.bf16.msra.mxu0 %v8489_v50  ;;  %6831 = vmatpush3.bf16.msra.mxu1 %v7296_v17  ;;  %v9199_v17 = vld [vmem:[#allocation26_spill] sm:$0xff] }
 0x6b2   :  { %4043 = vmatprep.subr.bf16.mxu0 %v8493_v15  ;;  %6832 = vmatprep.subr.bf16.mxu1 %v9184_v23  ;;  %v7299_v15 = vld [vmem:[#allocation12 + $0xb0] ss:$12 sps:$4 sm:$0xff]  }
 0x6b5   :  { %4044 = vmatpush1.bf16.msra.mxu0 %v8496_v32  ;;  %6833 = vmatpush3.bf16.msra.mxu1 %v7297_v48 }
 0x6b6   :  { %4045 = vmatprep.subr.bf16.mxu0 %v8500_v14  ;;  %6834 = vmatprep.subr.bf16.mxu1 %v9184_v23 }
 0x6b8   :  { %v7443_v56 = vpop.eup %7442 }
 0x6b9   :  { %v3580_v50 = vmul.f32 %v7443_v56, %v3579_v41  ;;  %4046 = vmatpush1.bf16.msra.mxu0 %v8503_v52  ;;  %6835 = vmatpush3.bf16.msra.mxu1 %v7298_v22 }
 0x6ba   :  { %4047 = vmatprep.subr.bf16.mxu0 %v8507_v36  ;;  %6836 = vmatprep.subr.bf16.mxu1 %v9184_v23  ;;  %v8731_v36 = vld [vmem:[#allocation11 + $0x4] ss:$12 sps:$4 sm:$0xff]  }
 0x6bb   :  { %v3582_v32 = vadd.f32 %v3581_v6, %v3580_v50 }
 0x6bd   :  { %v3598_v14 = vsel %vm3597_vm15, %v3582_v32, 0.0  ;;  %4048 = vmatpush1.bf16.msra.mxu0 %v8511_v13  ;;  %6837 = vmatpush3.bf16.msra.mxu1 %v7299_v15  ;;  %v8720_v24 = vsel %vm3597_vm15, %v3582_v32, %v8622_v28  ;;  %v8733_v13 = vld [vmem:[#allocation11] ss:$12 sps:$4 sm:$0xff]   ;;  %v7303_v28 = vld [vmem:[#allocation11 + $0x8] ss:$12 sps:$4 sm:$0xff]   ;;  %v9200_v32 = vld [vmem:[#allocation21_spill] sm:$0xff] }
 0x6be   :  { %6035 = vst [vmem:[%s9121_s18 + $0x48] sm:$0xff] %v3598_v14  ;;  %v3872_v52 = vpack.c.bf16 %v8720_v24, %v8720_v24  ;;  %6842 = vmatprep.subr.bf16.mxu1 %v9184_v23  ;;  %4308 = vmatprep.subr.bf16.mxu0 %v8731_v36 }
 0x6c0   :  { %4066 = vmatmul.mubr.bf16.vlgmr.msra.gmra.mrb[76].mxu0 %v3872_v52  ;;  %6839 = vmatmul.mubr.bf16.vlgmr.msra.gmra.mrb[64].mxu1 %v3872_v52 }
 0x6c1   :  { %4340 = vmatprep.mubr.bf16.mxu0 %v9185_v25  ;;  %6858 = vmatprep.mubr.msk.bf16.mxu1 %vm7647_vm0, %v9184_v23 }
 0x6c2   :  { %4309 = vmatpush1.bf16.msra.mxu0 %v8733_v13  ;;  %6843 = vmatpush3.bf16.msra.mxu1 %v7303_v28 }
 0x6c3   :  { %6844 = vmatprep.subr.bf16.mxu1 %v9184_v23  ;;  %4310 = vmatprep.subr.bf16.mxu0 %v8737_v8 }
 0x6c6   :  { %4311 = vmatpush1.bf16.msra.mxu0 %v8740_v51  ;;  %6845 = vmatpush3.bf16.msra.mxu1 %v7307_v27 }
 0x6c7   :  { %6846 = vmatprep.subr.bf16.mxu1 %v9184_v23  ;;  %4312 = vmatprep.subr.bf16.mxu0 %v8744_v3 }
 0x6ca   :  { %4313 = vmatpush1.bf16.msra.mxu0 %v8747_v9  ;;  %6847 = vmatpush3.bf16.msra.mxu1 %v7311_v5 }
 0x6cb   :  { %6848 = vmatprep.subr.bf16.mxu1 %v9184_v23  ;;  %4314 = vmatprep.subr.bf16.mxu0 %v8751_v31 }
 0x6ce   :  { %4315 = vmatpush1.bf16.msra.mxu0 %v8754_v40  ;;  %6849 = vmatpush3.bf16.msra.mxu1 %v7315_v16 }
 0x6cf   :  { %6850 = vmatprep.subr.bf16.mxu1 %v9184_v23  ;;  %4316 = vmatprep.subr.bf16.mxu0 %v8758_v29 }
 0x6d2   :  { %4317 = vmatpush1.bf16.msra.mxu0 %v8761_v53  ;;  %6851 = vmatpush3.bf16.msra.mxu1 %v7319_v58 }
 0x6d3   :  { %6852 = vmatprep.subr.bf16.mxu1 %v9184_v23  ;;  %4318 = vmatprep.subr.bf16.mxu0 %v8765_v34 }
 0x6d6   :  { %4319 = vmatpush1.bf16.msra.mxu0 %v8768_v4  ;;  %6853 = vmatpush3.bf16.msra.mxu1 %v7323_v37 }
 0x6d7   :  { %6854 = vmatprep.subr.bf16.mxu1 %v9184_v23  ;;  %4320 = vmatprep.subr.bf16.mxu0 %v8772_v33 }
 0x6da   :  { %4321 = vmatpush1.bf16.msra.mxu0 %v8775_v55  ;;  %6855 = vmatpush3.bf16.msra.mxu1 %v7327_v20 }
 0x6db   :  { %6856 = vmatprep.subr.bf16.mxu1 %v9184_v23  ;;  %4322 = vmatprep.subr.bf16.mxu0 %v8779_v46 }
 0x6de   :  { %4323 = vmatpush1.bf16.msra.mxu0 %v8782_v1  ;;  %6857 = vmatpush3.bf16.msra.mxu1 %v7331_v19 }
 0x6df   :  { %6862 = vmatprep.subr.bf16.mxu1 %v9184_v23  ;;  %4567 = vmatprep.subr.bf16.mxu0 %v8786_v0 }
 0x773   :  { %v3808_v7 = vpop.f32.mrb[72].mxu0  ;;  %v3849_v44 = vpop.f32.mrb[60].mxu1 }
 0x774   :  { %v3809_v57 = vadd.f32 %v3808_v7, %v9191_v35  ;;  %v3810_v38 = vpop.f32.mrb[73].mxu0  ;;  %v6820_v45 = vpop.f32.mrb[61].mxu1  ;;  %v3850_v56 = vadd.f32 %v3849_v44, %v8292_v61  ;;  %v9201_v44 = vld [vmem:[#allocation44_spill] sm:$0xff] }
 0x775   :  { %v3811_v30 = vadd.f32 %v3810_v38, %v8285_v59  ;;  %v3812_v54 = vpop.f32.mrb[74].mxu0  ;;  %v3852_v12 = vpop.f32.mrb[62].mxu1 }
 0x776   :  { %v3855_v63 = vadd.f32 %v3809_v57, %v9198_v21  ;;  %v3813_v39 = vpop.f32.mrb[75].mxu0  ;;  %v6821_v62 = vpop.f32.mrb[63].mxu1  ;;  %v9202_v12 = vld [vmem:[#allocation45_spill] sm:$0xff] }
 0x777   :  { %v3860_v2 = vadd.f32 %v3811_v30, %v9199_v17 }
 0x778   :  { %v3856_v48 = vmul.f32 0.5, %v3855_v63 }
 0x779   :  { %v3861_v60 = vmul.f32 0.5, %v3860_v2 }
 0x77a   :  { %7444 = vtanh.f32 %v3856_v48  ;;  %v8803_v48 = vld [vmem:[#allocation12] ss:$12 sps:$4 sm:$0xff]  }
 0x77b   :  { %7446 = vtanh.f32 %v3861_v60 }
 0x784   :  { %v7445_v22 = vpop.eup %7444 }
 0x785   :  { %v3858_v41 = vmul.f32 0.5, %v7445_v22  ;;  %v7447_v15 = vpop.eup %7446  ;;  %v7335_v22 = vld [vmem:[#allocation12 + $0x8] ss:$12 sps:$4 sm:$0xff]  }
 0x786   :  { %v3863_v52 = vmul.f32 0.5, %v7447_v15 }
 0x787   :  { %v3859_v50 = vadd.f32 0.5, %v3858_v41 }
 0x788   :  { %v3864_v28 = vadd.f32 0.5, %v3863_v52 }
 0x789   :  { %v3865_v6 = vmul.f32 %v3859_v50, %v3850_v56  ;;  %v8815_v50 = vld [vmem:[#allocation12 + $0x1c] ss:$12 sps:$4 sm:$0xff]  }
 0x78a   :  { %v3868_v57 = vsub.f32 1.0, %v3864_v28  ;;  %v3870_v39 = vmul.f32 %v3864_v28, %v8677_v49  ;;  %v8832_v28 = vld [vmem:[#allocation12 + $0x4c] ss:$12 sps:$4 sm:$0xff]  }
 0x78b   :  { %v3866_v14 = vadd.f32 %v3865_v6, %v9200_v32  ;;  %v8818_v6 = vld [vmem:[#allocation12 + $0x18] ss:$12 sps:$4 sm:$0xff]   ;;  %v8828_v32 = vld [vmem:[#allocation12 + $0x30] ss:$12 sps:$4 sm:$0xff]  }
 0x78d   :  { %7448 = vtanh.f32 %v3866_v14  ;;  %v7343_v14 = vld [vmem:[#allocation12 + $0x38] ss:$12 sps:$4 sm:$0xff]  }
 0x793   :  { %v4067_v27 = vpop.f32.mrb[76].mxu0  ;;  %v4108_v5 = vpop.f32.mrb[64].mxu1 }
 0x794   :  { %v4068_v16 = vadd.f32 %v4067_v27, %v8300_v10  ;;  %v4069_v58 = vpop.f32.mrb[77].mxu0  ;;  %v6840_v37 = vpop.f32.mrb[65].mxu1  ;;  %v4109_v27 = vadd.f32 %v4108_v5, %v8330_v26  ;;  %v8844_v5 = vld [vmem:[#allocation12 + $0x60] ss:$12 sps:$4 sm:$0xff]  }
 0x795   :  { %v4070_v20 = vadd.f32 %v4069_v58, %v8303_v43  ;;  %v4071_v19 = vpop.f32.mrb[78].mxu0  ;;  %v4111_v7 = vpop.f32.mrb[66].mxu1  ;;  %v8836_v58 = vld [vmem:[#allocation12 + $0x48] ss:$12 sps:$4 sm:$0xff]   ;;  %v7347_v37 = vld [vmem:[#allocation12 + $0x50] ss:$12 sps:$4 sm:$0xff]  }
 0x796   :  { %v4114_v38 = vadd.f32 %v4068_v16, %v9201_v44  ;;  %v4072_v45 = vpop.f32.mrb[79].mxu0  ;;  %v6841_v30 = vpop.f32.mrb[67].mxu1  ;;  %v8840_v19 = vld [vmem:[#allocation12 + $0x64] ss:$12 sps:$4 sm:$0xff]  }
 0x797   :  { %v7449_v54 = vpop.eup %7448  ;;  %v4119_v21 = vadd.f32 %v4070_v20, %v9202_v12  ;;  %v8848_v45 = vld [vmem:[#allocation12 + $0x7c] ss:$12 sps:$4 sm:$0xff]   ;;  %v7355_v12 = vld [vmem:[#allocation12 + $0x80] ss:$12 sps:$4 sm:$0xff]  }
 0x798   :  { %v3869_v63 = vmul.f32 %v7449_v54, %v3868_v57  ;;  %v4115_v62 = vmul.f32 0.5, %v4114_v38  ;;  %v9203_v57 = vld [vmem:[#allocation38_spill] sm:$0xff]  ;;  %v7351_v38 = vld [vmem:[#allocation12 + $0x68] ss:$12 sps:$4 sm:$0xff]  }
 0x799   :  { %v4120_v41 = vmul.f32 0.5, %v4119_v21  ;;  %v8851_v54 = vld [vmem:[#allocation12 + $0x78] ss:$12 sps:$4 sm:$0xff]   ;;  %v8855_v21 = vld [vmem:[#allocation12 + $0x94] ss:$12 sps:$4 sm:$0xff]  }
 0x79a   :  { %v3871_v17 = vadd.f32 %v3870_v39, %v3869_v63  ;;  %7450 = vtanh.f32 %v4115_v62  ;;  %v8858_v39 = vld [vmem:[#allocation12 + $0x90] ss:$12 sps:$4 sm:$0xff]   ;;  %v7359_v62 = vld [vmem:[#allocation12 + $0x98] ss:$12 sps:$4 sm:$0xff]  }
 0x79b   :  { %7452 = vtanh.f32 %v4120_v41 }
 0x79c   :  { %v4131_v2 = vsel %vm3597_vm15, %v3871_v17, 0.0  ;;  %v8808_v60 = vsel %vm3597_vm15, %v3871_v17, %v8677_v49  ;;  %v7339_v49 = vld [vmem:[#allocation12 + $0x20] ss:$12 sps:$4 sm:$0xff]  }
 0x79d   :  { %6084 = vst [vmem:[%s9121_s18 + $0x40] sm:$0xff] %v4131_v2  ;;  %v4147_v56 = vpack.c.bf16 %v8808_v60, %v8808_v60  ;;  %v8862_v17 = vld [vmem:[#allocation12 + $0xac] ss:$12 sps:$4 sm:$0xff]  }
 0x79f   :  { %4341 = vmatmul.mubr.bf16.vlgmr.msra.gmra.mrb[80].mxu0 %v4147_v56  ;;  %6859 = vmatmul.mubr.bf16.vlgmr.msra.gmra.mrb[68].mxu1 %v4147_v56 }
 0x7a0   :  { %4568 = vmatpush1.bf16.msra.mxu0 %v8803_v48  ;;  %6863 = vmatpush3.bf16.msra.mxu1 %v7335_v22 }
 0x7a1   :  { %4569 = vmatprep.subr.bf16.mxu0 %v8815_v50  ;;  %6864 = vmatprep.subr.bf16.mxu1 %v9184_v23 }
 0x7a2   :  { %4599 = vmatprep.mubr.bf16.mxu0 %v9185_v25  ;;  %6878 = vmatprep.mubr.msk.bf16.mxu1 %vm7647_vm0, %v9184_v23 }
 0x7a4   :  { %v7451_v15 = vpop.eup %7450  ;;  %4570 = vmatpush1.bf16.msra.mxu0 %v8818_v6  ;;  %6865 = vmatpush3.bf16.msra.mxu1 %v7339_v49  ;;  %v8866_v49 = vld [vmem:[#allocation12 + $0xa8] ss:$12 sps:$4 sm:$0xff]  }
 0x7a5   :  { %v4117_v52 = vmul.f32 0.5, %v7451_v15  ;;  %4571 = vmatprep.subr.bf16.mxu0 %v8822_v42  ;;  %6866 = vmatprep.subr.bf16.mxu1 %v9184_v23  ;;  %v7453_v7 = vpop.eup %7452  ;;  %v7363_v15 = vld [vmem:[#allocation12 + $0xb0] ss:$12 sps:$4 sm:$0xff]  }
 0x7a6   :  { %v4122_v30 = vmul.f32 0.5, %v7453_v7  ;;  %v7368_v7 = vld [vmem:[#allocation11 + $0x68] ss:$12 sps:$4 sm:$0xff]  }
 0x7a7   :  { %v4118_v16 = vadd.f32 0.5, %v4117_v52 }
 0x7a8   :  { %4572 = vmatpush1.bf16.msra.mxu0 %v8828_v32  ;;  %6867 = vmatpush3.bf16.msra.mxu1 %v7343_v14  ;;  %v4123_v63 = vadd.f32 0.5, %v4122_v30 }
 0x7a9   :  { %v4124_v20 = vmul.f32 %v4118_v16, %v4109_v27  ;;  %4573 = vmatprep.subr.bf16.mxu0 %v8832_v28  ;;  %6868 = vmatprep.subr.bf16.mxu1 %v9184_v23 }
 0x7aa   :  { %v4127_v2 = vsub.f32 1.0, %v4123_v63  ;;  %v4129_v56 = vmul.f32 %v4123_v63, %v8720_v24 }
 0x7ab   :  { %v4125_v44 = vadd.f32 %v4124_v20, %v9203_v57  ;;  %v7367_v20 = vld [vmem:[#allocation11 + $0x50] ss:$12 sps:$4 sm:$0xff]   ;;  %v7369_v57 = vld [vmem:[#allocation11 + $0x80] ss:$12 sps:$4 sm:$0xff]  }
 0x7ac   :  { %4574 = vmatpush1.bf16.msra.mxu0 %v8836_v58  ;;  %6869 = vmatpush3.bf16.msra.mxu1 %v7347_v37  ;;  %v7366_v37 = vld [vmem:[#allocation11 + $0x38] ss:$12 sps:$4 sm:$0xff]  }
 0x7ad   :  { %7454 = vtanh.f32 %v4125_v44  ;;  %4575 = vmatprep.subr.bf16.mxu0 %v8840_v19  ;;  %6870 = vmatprep.subr.bf16.mxu1 %v9184_v23  ;;  %v7370_v44 = vld [vmem:[#allocation11 + $0x98] ss:$12 sps:$4 sm:$0xff]  }
 0x7b0   :  { %4576 = vmatpush1.bf16.msra.mxu0 %v8844_v5  ;;  %6871 = vmatpush3.bf16.msra.mxu1 %v7351_v38  ;;  %v7371_v38 = vld [vmem:[#allocation11 + $0xb0] ss:$12 sps:$4 sm:$0xff]  }
 0x7b1   :  { %4577 = vmatprep.subr.bf16.mxu0 %v8848_v45  ;;  %6872 = vmatprep.subr.bf16.mxu1 %v9184_v23 }
 0x7b4   :  { %4578 = vmatpush1.bf16.msra.mxu0 %v8851_v54  ;;  %6873 = vmatpush3.bf16.msra.mxu1 %v7355_v12 }
 0x7b5   :  { %4579 = vmatprep.subr.bf16.mxu0 %v8855_v21  ;;  %6874 = vmatprep.subr.bf16.mxu1 %v9184_v23 }
 0x7b7   :  { %v7455_v22 = vpop.eup %7454 }
 0x7b8   :  { %v4128_v41 = vmul.f32 %v7455_v22, %v4127_v2  ;;  %4580 = vmatpush1.bf16.msra.mxu0 %v8858_v39  ;;  %6875 = vmatpush3.bf16.msra.mxu1 %v7359_v62 }
 0x7b9   :  { %4581 = vmatprep.subr.bf16.mxu0 %v8862_v17  ;;  %6876 = vmatprep.subr.bf16.mxu1 %v9184_v23 }
 0x7ba   :  { %v4130_v14 = vadd.f32 %v4129_v56, %v4128_v41 }
 0x7bc   :  { %v4133_v52 = vsel %vm3589_vm14, %v4130_v14, 0.0  ;;  %4582 = vmatpush1.bf16.msra.mxu0 %v8866_v49  ;;  %6877 = vmatpush3.bf16.msra.mxu1 %v7363_v15  ;;  %v8876_v27 = vsel %vm3589_vm14, %v4130_v14, %v8720_v24  ;;  %v7365_v24 = vld [vmem:[#allocation11 + $0x20] ss:$12 sps:$4 sm:$0xff]  }
 0x7bd   :  { %6085 = vst [vmem:[%s9121_s18 + $0x38] sm:$0xff] %v4133_v52  ;;  %v4406_v16 = vpack.c.bf16 %v8876_v27, %v8876_v27  ;;  %4842 = vmatprep.subr.bf16.mxu0 %v8731_v36  ;;  %6882 = vmatprep.subr.bf16.mxu1 %v9184_v23  ;;  %v9204_v15 = vld [vmem:[#allocation27_spill] sm:$0xff] }
 0x7bf   :  { %4600 = vmatmul.mubr.bf16.vlgmr.msra.gmra.mrb[84].mxu0 %v4406_v16  ;;  %6879 = vmatmul.mubr.bf16.vlgmr.msra.gmra.mrb[72].mxu1 %v4406_v16 }
 0x7c0   :  { %4843 = vmatpush1.bf16.msra.mxu0 %v8733_v13  ;;  %4874 = vmatprep.mubr.bf16.mxu0 %v9185_v25 }
 0x7c1   :  { %4844 = vmatprep.subr.bf16.mxu0 %v8737_v8  ;;  %6898 = vmatprep.mubr.msk.bf16.mxu1 %vm7647_vm0, %v9184_v23 }
 0x7c2   :  { %6883 = vmatpush3.bf16.msra.mxu1 %v7364_v11  ;;  %v9205_v11 = vld [vmem:[#allocation28_spill] sm:$0xff] }
 0x7c3   :  { %6884 = vmatprep.subr.bf16.mxu1 %v9184_v23 }
 0x7c4   :  { %4845 = vmatpush1.bf16.msra.mxu0 %v8740_v51 }
 0x7c5   :  { %4846 = vmatprep.subr.bf16.mxu0 %v8744_v3 }
 0x7c6   :  { %6885 = vmatpush3.bf16.msra.mxu1 %v7365_v24 }
 0x7c7   :  { %6886 = vmatprep.subr.bf16.mxu1 %v9184_v23 }
 0x7c8   :  { %4847 = vmatpush1.bf16.msra.mxu0 %v8747_v9 }
 0x7c9   :  { %4848 = vmatprep.subr.bf16.mxu0 %v8751_v31 }
 0x7ca   :  { %6887 = vmatpush3.bf16.msra.mxu1 %v7366_v37 }
 0x7cb   :  { %6888 = vmatprep.subr.bf16.mxu1 %v9184_v23 }
 0x7cc   :  { %4849 = vmatpush1.bf16.msra.mxu0 %v8754_v40 }
 0x7cd   :  { %4850 = vmatprep.subr.bf16.mxu0 %v8758_v29 }
 0x7ce   :  { %6889 = vmatpush3.bf16.msra.mxu1 %v7367_v20 }
 0x7cf   :  { %6890 = vmatprep.subr.bf16.mxu1 %v9184_v23 }
 0x7d0   :  { %4851 = vmatpush1.bf16.msra.mxu0 %v8761_v53 }
 0x7d1   :  { %4852 = vmatprep.subr.bf16.mxu0 %v8765_v34 }
 0x7d2   :  { %6891 = vmatpush3.bf16.msra.mxu1 %v7368_v7 }
 0x7d3   :  { %6892 = vmatprep.subr.bf16.mxu1 %v9184_v23 }
 0x7d4   :  { %4853 = vmatpush1.bf16.msra.mxu0 %v8768_v4 }
 0x7d5   :  { %4854 = vmatprep.subr.bf16.mxu0 %v8772_v33 }
 0x7d6   :  { %6893 = vmatpush3.bf16.msra.mxu1 %v7369_v57 }
 0x7d7   :  { %6894 = vmatprep.subr.bf16.mxu1 %v9184_v23 }
 0x7d8   :  { %4855 = vmatpush1.bf16.msra.mxu0 %v8775_v55 }
 0x7d9   :  { %4856 = vmatprep.subr.bf16.mxu0 %v8779_v46 }
 0x7da   :  { %6895 = vmatpush3.bf16.msra.mxu1 %v7370_v44 }
 0x7db   :  { %6896 = vmatprep.subr.bf16.mxu1 %v9184_v23 }
 0x7dc   :  { %4857 = vmatpush1.bf16.msra.mxu0 %v8782_v1 }
 0x7dd   :  { %5101 = vmatprep.subr.bf16.mxu0 %v8786_v0 }
 0x7de   :  { %6897 = vmatpush3.bf16.msra.mxu1 %v7371_v38 }
 0x7df   :  { %6902 = vmatprep.subr.bf16.mxu1 %v9184_v23 }
 0x872   :  { %v4342_v30 = vpop.f32.mrb[80].mxu0  ;;  %v4383_v12 = vpop.f32.mrb[68].mxu1 }
 0x873   :  { %v4343_v63 = vadd.f32 %v4342_v30, %v9191_v35  ;;  %v4344_v62 = vpop.f32.mrb[81].mxu0  ;;  %v6860_v2 = vpop.f32.mrb[69].mxu1  ;;  %v4384_v44 = vadd.f32 %v4383_v12, %v8292_v61  ;;  %v9207_v12 = vld [vmem:[#allocation41_spill] sm:$0xff] }
 0x874   :  { %v4345_v22 = vadd.f32 %v4344_v62, %v8285_v59  ;;  %v4346_v41 = vpop.f32.mrb[82].mxu0  ;;  %v4386_v56 = vpop.f32.mrb[70].mxu1  ;;  %v9206_v62 = vld [vmem:[#allocation24_spill] sm:$0xff] }
 0x875   :  { %v4389_v14 = vadd.f32 %v4343_v63, %v9204_v15  ;;  %v4347_v52 = vpop.f32.mrb[83].mxu0  ;;  %v6861_v16 = vpop.f32.mrb[71].mxu1 }
 0x876   :  { %v4394_v24 = vadd.f32 %v4345_v22, %v9205_v11 }
 0x877   :  { %v4390_v37 = vmul.f32 0.5, %v4389_v14 }
 0x878   :  { %v4395_v20 = vmul.f32 0.5, %v4394_v24 }
 0x879   :  { %7456 = vtanh.f32 %v4390_v37 }
 0x87a   :  { %7458 = vtanh.f32 %v4395_v20 }
 0x883   :  { %v7457_v7 = vpop.eup %7456 }
 0x884   :  { %v4392_v57 = vmul.f32 0.5, %v7457_v7  ;;  %v7459_v2 = vpop.eup %7458 }
 0x885   :  { %v4397_v56 = vmul.f32 0.5, %v7459_v2 }
 0x886   :  { %v4393_v38 = vadd.f32 0.5, %v4392_v57 }
 0x887   :  { %v4398_v63 = vadd.f32 0.5, %v4397_v56 }
 0x888   :  { %v4399_v30 = vmul.f32 %v4393_v38, %v4384_v44 }
 0x889   :  { %v4402_v20 = vsub.f32 1.0, %v4398_v63 }
 0x88a   :  { %v4400_v41 = vadd.f32 %v4399_v30, %v9206_v62  ;;  %v9208_v30 = vld [vmem:[#allocation42_spill] sm:$0xff] }
 0x88c   :  { %7460 = vtanh.f32 %v4400_v41  ;;  %v4404_v41 = vmul.f32 %v4398_v63, %v8808_v60 }
 0x892   :  { %v4601_v15 = vpop.f32.mrb[84].mxu0  ;;  %v4642_v52 = vpop.f32.mrb[72].mxu1 }
 0x893   :  { %v4602_v22 = vadd.f32 %v4601_v15, %v8300_v10  ;;  %v4603_v14 = vpop.f32.mrb[85].mxu0  ;;  %v6880_v16 = vpop.f32.mrb[73].mxu1 }
 0x894   :  { %v4604_v11 = vadd.f32 %v4603_v14, %v8303_v43  ;;  %v4605_v24 = vpop.f32.mrb[86].mxu0  ;;  %v4645_v37 = vpop.f32.mrb[74].mxu1 }
 0x895   :  { %v4648_v7 = vadd.f32 %v4602_v22, %v9207_v12  ;;  %v4606_v57 = vpop.f32.mrb[87].mxu0  ;;  %v6881_v44 = vpop.f32.mrb[75].mxu1  ;;  %v7372_v22 = vld [vmem:[#allocation12 + $0x8] ss:$12 sps:$4 sm:$0xff]   ;;  %v4643_v24 = vadd.f32 %v4642_v52, %v8330_v26 }
 0x896   :  { %v7461_v38 = vpop.eup %7460  ;;  %v4653_v62 = vadd.f32 %v4604_v11, %v9208_v30  ;;  %v7373_v11 = vld [vmem:[#allocation12 + $0x20] ss:$12 sps:$4 sm:$0xff]  }
 0x897   :  { %v4403_v2 = vmul.f32 %v7461_v38, %v4402_v20  ;;  %v4649_v56 = vmul.f32 0.5, %v4648_v7  ;;  %v7375_v20 = vld [vmem:[#allocation12 + $0x50] ss:$12 sps:$4 sm:$0xff]   ;;  %v9209_v57 = vld [vmem:[#allocation34_spill] sm:$0xff]  ;;  %v7376_v38 = vld [vmem:[#allocation12 + $0x68] ss:$12 sps:$4 sm:$0xff]  }
 0x898   :  { %v4654_v16 = vmul.f32 0.5, %v4653_v62  ;;  %v7377_v30 = vld [vmem:[#allocation12 + $0x80] ss:$12 sps:$4 sm:$0xff]  }
 0x899   :  { %v4405_v61 = vadd.f32 %v4404_v41, %v4403_v2  ;;  %7462 = vtanh.f32 %v4649_v56  ;;  %v7378_v2 = vld [vmem:[#allocation12 + $0x98] ss:$12 sps:$4 sm:$0xff]  }
 0x89a   :  { %7464 = vtanh.f32 %v4654_v16  ;;  %v7379_v16 = vld [vmem:[#allocation12 + $0xb0] ss:$12 sps:$4 sm:$0xff]  }
 0x89b   :  { %v4665_v15 = vsel %vm3047_vm13, %v4405_v61, 0.0  ;;  %v8928_v14 = vsel %vm3047_vm13, %v4405_v61, %v8808_v60 }
 0x89c   :  { %6134 = vst [vmem:[%s9121_s18 + $0x50] sm:$0xff] %v4665_v15  ;;  %v4681_v63 = vpack.c.bf16 %v8928_v14, %v8928_v14 }
 0x89e   :  { %4875 = vmatmul.mubr.bf16.vlgmr.msra.gmra.mrb[88].mxu0 %v4681_v63  ;;  %6899 = vmatmul.mubr.bf16.vlgmr.msra.gmra.mrb[76].mxu1 %v4681_v63 }
 0x89f   :  { %5102 = vmatpush1.bf16.msra.mxu0 %v8803_v48  ;;  %6903 = vmatpush3.bf16.msra.mxu1 %v7372_v22 }
 0x8a0   :  { %5103 = vmatprep.subr.bf16.mxu0 %v8815_v50  ;;  %6904 = vmatprep.subr.bf16.mxu1 %v9184_v23 }
 0x8a1   :  { %5133 = vmatprep.mubr.bf16.mxu0 %v9185_v25  ;;  %6918 = vmatprep.mubr.msk.bf16.mxu1 %vm7647_vm0, %v9184_v23 }
 0x8a3   :  { %v7463_v61 = vpop.eup %7462  ;;  %5104 = vmatpush1.bf16.msra.mxu0 %v8818_v6  ;;  %6905 = vmatpush3.bf16.msra.mxu1 %v7373_v11 }
 0x8a4   :  { %v4651_v60 = vmul.f32 0.5, %v7463_v61  ;;  %5105 = vmatprep.subr.bf16.mxu0 %v8822_v42  ;;  %6906 = vmatprep.subr.bf16.mxu1 %v9184_v23  ;;  %v7465_v7 = vpop.eup %7464 }
 0x8a5   :  { %v4656_v52 = vmul.f32 0.5, %v7465_v7 }
 0x8a6   :  { %v4652_v37 = vadd.f32 0.5, %v4651_v60 }
 0x8a7   :  { %5106 = vmatpush1.bf16.msra.mxu0 %v8828_v32  ;;  %6907 = vmatpush3.bf16.msra.mxu1 %v7374_v18  ;;  %v4657_v62 = vadd.f32 0.5, %v4656_v52 }
 0x8a8   :  { %v4658_v12 = vmul.f32 %v4652_v37, %v4643_v24  ;;  %5107 = vmatprep.subr.bf16.mxu0 %v8832_v28  ;;  %6908 = vmatprep.subr.bf16.mxu1 %v9184_v23  ;;  %v9211_v24 = vld [vmem:[#allocation30_spill] sm:$0xff] }
 0x8a9   :  { %v4661_v41 = vsub.f32 1.0, %v4657_v62  ;;  %v4663_v22 = vmul.f32 %v4657_v62, %v8876_v27 }
 0x8aa   :  { %v4659_v44 = vadd.f32 %v4658_v12, %v9209_v57 }
 0x8ab   :  { %5108 = vmatpush1.bf16.msra.mxu0 %v8836_v58  ;;  %6909 = vmatpush3.bf16.msra.mxu1 %v7375_v20 }
 0x8ac   :  { %7466 = vtanh.f32 %v4659_v44  ;;  %5109 = vmatprep.subr.bf16.mxu0 %v8840_v19  ;;  %6910 = vmatprep.subr.bf16.mxu1 %v9184_v23  ;;  %v9212_v44 = vld [vmem:[#allocation49_spill] sm:$0xff] }
 0x8af   :  { %5110 = vmatpush1.bf16.msra.mxu0 %v8844_v5  ;;  %6911 = vmatpush3.bf16.msra.mxu1 %v7376_v38 }
 0x8b0   :  { %5111 = vmatprep.subr.bf16.mxu0 %v8848_v45  ;;  %6912 = vmatprep.subr.bf16.mxu1 %v9184_v23 }
 0x8b3   :  { %5112 = vmatpush1.bf16.msra.mxu0 %v8851_v54  ;;  %6913 = vmatpush3.bf16.msra.mxu1 %v7377_v30 }
 0x8b4   :  { %5113 = vmatprep.subr.bf16.mxu0 %v8855_v21  ;;  %6914 = vmatprep.subr.bf16.mxu1 %v9184_v23 }
 0x8b6   :  { %v7467_v56 = vpop.eup %7466 }
 0x8b7   :  { %v4662_v15 = vmul.f32 %v7467_v56, %v4661_v41  ;;  %5114 = vmatpush1.bf16.msra.mxu0 %v8858_v39  ;;  %6915 = vmatpush3.bf16.msra.mxu1 %v7378_v2  ;;  %v9213_v2 = vld [vmem:[#allocation19_spill] sm:$0xff] }
 0x8b8   :  { %5115 = vmatprep.subr.bf16.mxu0 %v8862_v17  ;;  %6916 = vmatprep.subr.bf16.mxu1 %v9184_v23 }
 0x8b9   :  { %v4664_v63 = vadd.f32 %v4663_v22, %v4662_v15 }
 0x8bb   :  { %v4667_v11 = vsel %vm3039_vm12, %v4664_v63, 0.0  ;;  %5116 = vmatpush1.bf16.msra.mxu0 %v8866_v49  ;;  %6917 = vmatpush3.bf16.msra.mxu1 %v7379_v16  ;;  %v8968_v61 = vsel %vm3039_vm12, %v4664_v63, %v8876_v27 }
 0x8bc   :  { %6135 = vst [vmem:[%s9121_s18 + $0x28] sm:$0xff] %v4667_v11  ;;  %v4940_v18 = vpack.c.bf16 %v8968_v61, %v8968_v61  ;;  %5376 = vmatprep.subr.bf16.mxu0 %v8731_v36  ;;  %6922 = vmatprep.subr.bf16.mxu1 %v9184_v23  ;;  %v7381_v36 = vld [vmem:[#allocation11 + $0x20] ss:$12 sps:$4 sm:$0xff]  }
 0x8be   :  { %5134 = vmatmul.mubr.bf16.vlgmr.msra.gmra.mrb[92].mxu0 %v4940_v18  ;;  %6919 = vmatmul.mubr.bf16.vlgmr.msra.gmra.mrb[80].mxu1 %v4940_v18 }
 0x8bf   :  { %5377 = vmatpush1.bf16.msra.mxu0 %v8733_v13  ;;  %5408 = vmatprep.mubr.bf16.mxu0 %v9185_v25  ;;  %v7382_v13 = vld [vmem:[#allocation11 + $0x38] ss:$12 sps:$4 sm:$0xff]  }
 0x8c0   :  { %5378 = vmatprep.subr.bf16.mxu0 %v8737_v8  ;;  %6938 = vmatprep.mubr.msk.bf16.mxu1 %vm7647_vm0, %v9184_v23  ;;  %v7383_v8 = vld [vmem:[#allocation11 + $0x50] ss:$12 sps:$4 sm:$0xff]  }
 0x8c1   :  { %6923 = vmatpush3.bf16.msra.mxu1 %v7380_v47 }
 0x8c2   :  { %6924 = vmatprep.subr.bf16.mxu1 %v9184_v23 }
 0x8c3   :  { %5379 = vmatpush1.bf16.msra.mxu0 %v8740_v51  ;;  %v7384_v51 = vld [vmem:[#allocation11 + $0x68] ss:$12 sps:$4 sm:$0xff]  }
 0x8c4   :  { %5380 = vmatprep.subr.bf16.mxu0 %v8744_v3  ;;  %v7385_v3 = vld [vmem:[#allocation11 + $0x80] ss:$12 sps:$4 sm:$0xff]  }
 0x8c5   :  { %6925 = vmatpush3.bf16.msra.mxu1 %v7381_v36 }
 0x8c6   :  { %6926 = vmatprep.subr.bf16.mxu1 %v9184_v23 }
 0x8c7   :  { %5381 = vmatpush1.bf16.msra.mxu0 %v8747_v9  ;;  %v7386_v9 = vld [vmem:[#allocation11 + $0x98] ss:$12 sps:$4 sm:$0xff]  }
 0x8c8   :  { %5382 = vmatprep.subr.bf16.mxu0 %v8751_v31  ;;  %v7387_v31 = vld [vmem:[#allocation11 + $0xb0] ss:$12 sps:$4 sm:$0xff]  }
 0x8c9   :  { %6927 = vmatpush3.bf16.msra.mxu1 %v7382_v13 }
 0x8ca   :  { %6928 = vmatprep.subr.bf16.mxu1 %v9184_v23 }
 0x8cb   :  { %5383 = vmatpush1.bf16.msra.mxu0 %v8754_v40 }
 0x8cc   :  { %5384 = vmatprep.subr.bf16.mxu0 %v8758_v29 }
 0x8cd   :  { %6929 = vmatpush3.bf16.msra.mxu1 %v7383_v8 }
 0x8ce   :  { %6930 = vmatprep.subr.bf16.mxu1 %v9184_v23 }
 0x8cf   :  { %5385 = vmatpush1.bf16.msra.mxu0 %v8761_v53 }
 0x8d0   :  { %5386 = vmatprep.subr.bf16.mxu0 %v8765_v34 }
 0x8d1   :  { %6931 = vmatpush3.bf16.msra.mxu1 %v7384_v51  ;;  %v9214_v51 = vld [vmem:[#allocation37_spill] sm:$0xff] }
 0x8d2   :  { %6932 = vmatprep.subr.bf16.mxu1 %v9184_v23 }
 0x8d3   :  { %5387 = vmatpush1.bf16.msra.mxu0 %v8768_v4 }
 0x8d4   :  { %5388 = vmatprep.subr.bf16.mxu0 %v8772_v33 }
 0x8d5   :  { %6933 = vmatpush3.bf16.msra.mxu1 %v7385_v3 }
 0x8d6   :  { %6934 = vmatprep.subr.bf16.mxu1 %v9184_v23 }
 0x8d7   :  { %5389 = vmatpush1.bf16.msra.mxu0 %v8775_v55 }
 0x8d8   :  { %5390 = vmatprep.subr.bf16.mxu0 %v8779_v46 }
 0x8d9   :  { %6935 = vmatpush3.bf16.msra.mxu1 %v7386_v9 }
 0x8da   :  { %6936 = vmatprep.subr.bf16.mxu1 %v9184_v23 }
 0x8db   :  { %5391 = vmatpush1.bf16.msra.mxu0 %v8782_v1  ;;  %v9210_v1 = vld [vmem:[#allocation29_spill] sm:$0xff] }
 0x8dc   :  { %5635 = vmatprep.subr.bf16.mxu0 %v8786_v0 }
 0x8dd   :  { %6937 = vmatpush3.bf16.msra.mxu1 %v7387_v31 }
 0x8de   :  { %6942 = vmatprep.subr.bf16.mxu1 %v9184_v23 }
 0x971   :  { %v4876_v40 = vpop.f32.mrb[88].mxu0  ;;  %v4917_v29 = vpop.f32.mrb[76].mxu1 }
 0x972   :  { %v4877_v53 = vadd.f32 %v4876_v40, %v9191_v35  ;;  %v4878_v34 = vpop.f32.mrb[89].mxu0  ;;  %v6900_v4 = vpop.f32.mrb[77].mxu1  ;;  %v4918_v38 = vadd.f32 %v4917_v29, %v9212_v44  ;;  %v9215_v29 = vld [vmem:[#allocation39_spill] sm:$0xff] }
 0x973   :  { %v4879_v33 = vadd.f32 %v4878_v34, %v8285_v59  ;;  %v4880_v55 = vpop.f32.mrb[90].mxu0  ;;  %v4920_v46 = vpop.f32.mrb[78].mxu1 }
 0x974   :  { %v4923_v0 = vadd.f32 %v4877_v53, %v9210_v1  ;;  %v4881_v27 = vpop.f32.mrb[91].mxu0  ;;  %v6901_v60 = vpop.f32.mrb[79].mxu1 }
 0x975   :  { %v4928_v37 = vadd.f32 %v4879_v33, %v9211_v24  ;;  %v7388_v27 = vld [vmem:[#allocation12 + $0x8] ss:$12 sps:$4 sm:$0xff]  }
 0x976   :  { %v4924_v20 = vmul.f32 0.5, %v4923_v0 }
 0x977   :  { %v4929_v12 = vmul.f32 0.5, %v4928_v37  ;;  %v7389_v37 = vld [vmem:[#allocation12 + $0x20] ss:$12 sps:$4 sm:$0xff]  }
 0x978   :  { %7468 = vtanh.f32 %v4924_v20  ;;  %v7390_v20 = vld [vmem:[#allocation12 + $0x38] ss:$12 sps:$4 sm:$0xff]  }
 0x979   :  { %7470 = vtanh.f32 %v4929_v12 }
 0x982   :  { %v7469_v7 = vpop.eup %7468 }
 0x983   :  { %v4926_v57 = vmul.f32 0.5, %v7469_v7  ;;  %v7471_v62 = vpop.eup %7470 }
 0x984   :  { %v4931_v56 = vmul.f32 0.5, %v7471_v62 }
 0x985   :  { %v4927_v52 = vadd.f32 0.5, %v4926_v57  ;;  %v9217_v57 = vld [vmem:[#allocation40_spill] sm:$0xff] }
 0x986   :  { %v4932_v15 = vadd.f32 0.5, %v4931_v56 }
 0x987   :  { %v4933_v30 = vmul.f32 %v4927_v52, %v4918_v38  ;;  %v7393_v52 = vld [vmem:[#allocation12 + $0x80] ss:$12 sps:$4 sm:$0xff]  }
 0x988   :  { %v4936_v8 = vsub.f32 1.0, %v4932_v15  ;;  %v4938_v4 = vmul.f32 %v4932_v15, %v8928_v14 }
 0x989   :  { %v4934_v41 = vadd.f32 %v4933_v30, %v9213_v2 }
 0x98b   :  { %7472 = vtanh.f32 %v4934_v41 }
 0x991   :  { %v5135_v22 = vpop.f32.mrb[92].mxu0  ;;  %v5176_v16 = vpop.f32.mrb[80].mxu1 }
 0x992   :  { %v5136_v63 = vadd.f32 %v5135_v22, %v8300_v10  ;;  %v5137_v11 = vpop.f32.mrb[93].mxu0  ;;  %v6920_v18 = vpop.f32.mrb[81].mxu1 }
 0x993   :  { %v5138_v47 = vadd.f32 %v5137_v11, %v8303_v43  ;;  %v5139_v36 = vpop.f32.mrb[94].mxu0  ;;  %v5179_v13 = vpop.f32.mrb[82].mxu1 }
 0x994   :  { %v5182_v3 = vadd.f32 %v5136_v63, %v9214_v51  ;;  %v5140_v9 = vpop.f32.mrb[95].mxu0  ;;  %v6921_v31 = vpop.f32.mrb[83].mxu1  ;;  %v9219_v63 = vld [vmem:[#allocation31_spill] sm:$0xff]  ;;  %v9220_v36 = vld [vmem:[#allocation32_spill] sm:$0xff] }
 0x995   :  { %v7473_v40 = vpop.eup %7472  ;;  %v5187_v53 = vadd.f32 %v5138_v47, %v9215_v29 }
 0x996   :  { %v4937_v34 = vmul.f32 %v7473_v40, %v4936_v8  ;;  %v5183_v33 = vmul.f32 0.5, %v5182_v3 }
 0x997   :  { %v5188_v60 = vmul.f32 0.5, %v5187_v53 }
 0x998   :  { %v4939_v55 = vadd.f32 %v4938_v4, %v4937_v34  ;;  %7474 = vtanh.f32 %v5183_v33 }
 0x999   :  { %7476 = vtanh.f32 %v5188_v60 }
 0x99a   :  { %v5199_v1 = vsel %vm2497_vm11, %v4939_v55, 0.0  ;;  %v9020_v0 = vsel %vm2497_vm11, %v4939_v55, %v8928_v14 }
 0x99b   :  { %6184 = vst [vmem:[%s9121_s18 + $0x60] sm:$0xff] %v5199_v1  ;;  %v5215_v24 = vpack.c.bf16 %v9020_v0, %v9020_v0 }
 0x99d   :  { %5409 = vmatmul.mubr.bf16.vlgmr.msra.gmra.mrb[96].mxu0 %v5215_v24  ;;  %6939 = vmatmul.mubr.bf16.vlgmr.msra.gmra.mrb[84].mxu1 %v5215_v24 }
 0x99e   :  { %5636 = vmatpush1.bf16.msra.mxu0 %v8803_v48  ;;  %6943 = vmatpush3.bf16.msra.mxu1 %v7388_v27  ;;  %v5177_v48 = vadd.f32 %v5176_v16, %v8330_v26 }
 0x99f   :  { %5637 = vmatprep.subr.bf16.mxu0 %v8815_v50  ;;  %6944 = vmatprep.subr.bf16.mxu1 %v9184_v23 }
 0x9a0   :  { %5667 = vmatprep.mubr.bf16.mxu0 %v9185_v25  ;;  %6958 = vmatprep.mubr.msk.bf16.mxu1 %vm7647_vm0, %v9184_v23  ;;  %v7391_v25 = vld [vmem:[#allocation12 + $0x50] ss:$12 sps:$4 sm:$0xff]  }
 0x9a2   :  { %v7475_v14 = vpop.eup %7474  ;;  %5638 = vmatpush1.bf16.msra.mxu0 %v8818_v6  ;;  %6945 = vmatpush3.bf16.msra.mxu1 %v7389_v37 }
 0x9a3   :  { %v5185_v12 = vmul.f32 0.5, %v7475_v14  ;;  %5639 = vmatprep.subr.bf16.mxu0 %v8822_v42  ;;  %6946 = vmatprep.subr.bf16.mxu1 %v9184_v23  ;;  %v7477_v6 = vpop.eup %7476  ;;  %v7392_v42 = vld [vmem:[#allocation12 + $0x68] ss:$12 sps:$4 sm:$0xff]  }
 0x9a5   :  { %v5186_v50 = vadd.f32 0.5, %v5185_v12 }
 0x9a6   :  { %5640 = vmatpush1.bf16.msra.mxu0 %v8828_v32  ;;  %6947 = vmatpush3.bf16.msra.mxu1 %v7390_v20  ;;  %v5190_v32 = vmul.f32 0.5, %v7477_v6 }
 0x9a7   :  { %v5192_v7 = vmul.f32 %v5186_v50, %v5177_v48  ;;  %5641 = vmatprep.subr.bf16.mxu0 %v8832_v28  ;;  %6948 = vmatprep.subr.bf16.mxu1 %v9184_v23 }
 0x9a8   :  { %v5191_v28 = vadd.f32 0.5, %v5190_v32 }
 0x9a9   :  { %v5193_v38 = vadd.f32 %v5192_v7, %v9217_v57 }
 0x9aa   :  { %5642 = vmatpush1.bf16.msra.mxu0 %v8836_v58  ;;  %6949 = vmatpush3.bf16.msra.mxu1 %v7391_v25  ;;  %v7394_v58 = vld [vmem:[#allocation12 + $0x98] ss:$12 sps:$4 sm:$0xff]   ;;  %v9223_v25 = vld [vmem:[#allocation35_spill] sm:$0xff] }
 0x9ab   :  { %7478 = vtanh.f32 %v5193_v38  ;;  %5643 = vmatprep.subr.bf16.mxu0 %v8840_v19  ;;  %6950 = vmatprep.subr.bf16.mxu1 %v9184_v23  ;;  %v5195_v19 = vsub.f32 1.0, %v5191_v28 }
 0x9ae   :  { %5644 = vmatpush1.bf16.msra.mxu0 %v8844_v5  ;;  %6951 = vmatpush3.bf16.msra.mxu1 %v7392_v42  ;;  %v5197_v5 = vmul.f32 %v5191_v28, %v8968_v61 }
 0x9af   :  { %5645 = vmatprep.subr.bf16.mxu0 %v8848_v45  ;;  %6952 = vmatprep.subr.bf16.mxu1 %v9184_v23  ;;  %v7395_v45 = vld [vmem:[#allocation12 + $0xb0] ss:$12 sps:$4 sm:$0xff]  }
 0x9b2   :  { %5646 = vmatpush1.bf16.msra.mxu0 %v8851_v54  ;;  %6953 = vmatpush3.bf16.msra.mxu1 %v7393_v52 }
 0x9b3   :  { %5647 = vmatprep.subr.bf16.mxu0 %v8855_v21  ;;  %6954 = vmatprep.subr.bf16.mxu1 %v9184_v23 }
 0x9b5   :  { %v7479_v30 = vpop.eup %7478 }
 0x9b6   :  { %v5196_v62 = vmul.f32 %v7479_v30, %v5195_v19  ;;  %5648 = vmatpush1.bf16.msra.mxu0 %v8858_v39  ;;  %6955 = vmatpush3.bf16.msra.mxu1 %v7394_v58 }
 0x9b7   :  { %5649 = vmatprep.subr.bf16.mxu0 %v8862_v17  ;;  %6956 = vmatprep.subr.bf16.mxu1 %v9184_v23 }
 0x9b8   :  { %v5198_v54 = vadd.f32 %v5197_v5, %v5196_v62 }
 0x9ba   :  { %v5201_v41 = vsel %vm2489_vm10, %v5198_v54, 0.0  ;;  %5650 = vmatpush1.bf16.msra.mxu0 %v8866_v49  ;;  %6957 = vmatpush3.bf16.msra.mxu1 %v7395_v45  ;;  %v9060_v21 = vsel %vm2489_vm10, %v5198_v54, %v8968_v61  ;;  %v9225_v45 = vld [vmem:[#allocation36_spill] sm:$0xff] }
 0x9bb   :  { %6185 = vst [vmem:[%s9121_s18 + $0x18] sm:$0xff] %v5201_v41  ;;  %v5474_v39 = vpack.c.bf16 %v9060_v21, %v9060_v21 }
 0x9bd   :  { %5668 = vmatmul.mubr.bf16.vlgmr.msra.gmra.mrb[100].mxu0 %v5474_v39  ;;  %6959 = vmatmul.mubr.bf16.vlgmr.msra.gmra.mrb[88].mxu1 %v5474_v39 }
 0xa70   :  { %v5410_v23 = vpop.f32.mrb[96].mxu0  ;;  %v5451_v17 = vpop.f32.mrb[84].mxu1 }
 0xa71   :  { %v5411_v56 = vadd.f32 %v5410_v23, %v9191_v35  ;;  %v5412_v49 = vpop.f32.mrb[97].mxu0  ;;  %v6940_v15 = vpop.f32.mrb[85].mxu1  ;;  %v5452_v35 = vadd.f32 %v5451_v17, %v9212_v44  ;;  %v9222_v44 = vld [vmem:[#allocation33_spill] sm:$0xff] }
 0xa72   :  { %v5413_v22 = vadd.f32 %v5412_v49, %v8285_v59  ;;  %v5414_v16 = vpop.f32.mrb[98].mxu0  ;;  %v5454_v61 = vpop.f32.mrb[86].mxu1  ;;  %v9221_v59 = vld [vmem:[#allocation23_spill] sm:$0xff] }
 0xa73   :  { %v5457_v11 = vadd.f32 %v5411_v56, %v9219_v63  ;;  %v5415_v18 = vpop.f32.mrb[99].mxu0  ;;  %v6941_v47 = vpop.f32.mrb[87].mxu1 }
 0xa74   :  { %v5462_v13 = vadd.f32 %v5413_v22, %v9220_v36 }
 0xa75   :  { %v5458_v8 = vmul.f32 0.5, %v5457_v11 }
 0xa76   :  { %v5463_v51 = vmul.f32 0.5, %v5462_v13 }
 0xa77   :  { %7480 = vtanh.f32 %v5458_v8 }
 0xa78   :  { %7482 = vtanh.f32 %v5463_v51 }
 0xa81   :  { %v7481_v3 = vpop.eup %7480 }
 0xa82   :  { %v5460_v9 = vmul.f32 0.5, %v7481_v3  ;;  %v7483_v29 = vpop.eup %7482 }
 0xa83   :  { %v5465_v34 = vmul.f32 0.5, %v7483_v29 }
 0xa84   :  { %v5461_v31 = vadd.f32 0.5, %v5460_v9 }
 0xa85   :  { %v5466_v4 = vadd.f32 0.5, %v5465_v34 }
 0xa86   :  { %v5467_v40 = vmul.f32 %v5461_v31, %v5452_v35 }
 0xa87   :  { %v5470_v14 = vsub.f32 1.0, %v5466_v4  ;;  %v5472_v57 = vmul.f32 %v5466_v4, %v9020_v0 }
 0xa88   :  { %v5468_v53 = vadd.f32 %v5467_v40, %v9221_v59 }
 0xa8a   :  { %7484 = vtanh.f32 %v5468_v53 }
 0xa90   :  { %v5669_v33 = vpop.f32.mrb[100].mxu0  ;;  %v5710_v55 = vpop.f32.mrb[88].mxu1 }
 0xa91   :  { %v5670_v46 = vadd.f32 %v5669_v33, %v8300_v10  ;;  %v5671_v1 = vpop.f32.mrb[101].mxu0  ;;  %v6960_v27 = vpop.f32.mrb[89].mxu1  ;;  %v5711_v19 = vadd.f32 %v5710_v55, %v8330_v26 }
 0xa92   :  { %v5672_v60 = vadd.f32 %v5671_v1, %v8303_v43  ;;  %v5673_v24 = vpop.f32.mrb[102].mxu0  ;;  %v5713_v37 = vpop.f32.mrb[90].mxu1 }
 0xa93   :  { %v5716_v20 = vadd.f32 %v5670_v46, %v9222_v44  ;;  %v5674_v12 = vpop.f32.mrb[103].mxu0  ;;  %v6961_v48 = vpop.f32.mrb[91].mxu1 }
 0xa94   :  { %v7485_v50 = vpop.eup %7484  ;;  %v5721_v7 = vadd.f32 %v5672_v60, %v9223_v25 }
 0xa95   :  { %v5471_v6 = vmul.f32 %v7485_v50, %v5470_v14  ;;  %v5717_v38 = vmul.f32 0.5, %v5716_v20 }
 0xa96   :  { %v5722_v52 = vmul.f32 0.5, %v5721_v7 }
 0xa97   :  { %v5473_v42 = vadd.f32 %v5472_v57, %v5471_v6  ;;  %7486 = vtanh.f32 %v5717_v38 }
 0xa98   :  { %7488 = vtanh.f32 %v5722_v52 }
 0xa99   :  { %v5733_v32 = vsel %vm1947_vm9, %v5473_v42, 0.0  ;;  %v5737_v43 = vsel %vm1947_vm9, %v5473_v42, %v9020_v0 }
 0xa9a   :  { %6234 = vst [vmem:[%s9121_s18 + $0x70] sm:$0xff] %v5733_v32  ;;  %5739 = vst [vmem:[%s9122_s19] sm:$0xff] %v5737_v43 }
 0xaa1   :  { %v7487_v28 = vpop.eup %7486 }
 0xaa2   :  { %v5719_v58 = vmul.f32 0.5, %v7487_v28  ;;  %v7489_v5 = vpop.eup %7488 }
 0xaa3   :  { %v5724_v0 = vmul.f32 0.5, %v7489_v5 }
 0xaa4   :  { %v5720_v30 = vadd.f32 0.5, %v5719_v58 }
 0xaa5   :  { %v5725_v2 = vadd.f32 0.5, %v5724_v0 }
 0xaa6   :  { %v5726_v62 = vmul.f32 %v5720_v30, %v5711_v19 }
 0xaa7   :  { %v5729_v41 = vsub.f32 1.0, %v5725_v2  ;;  %v5731_v17 = vmul.f32 %v5725_v2, %v9060_v21 }
 0xaa8   :  { %v5727_v54 = vadd.f32 %v5726_v62, %v9225_v45 }
 0xaaa   :  { %7490 = vtanh.f32 %v5727_v54 }
 0xab4   :  { %v7491_v39 = vpop.eup %7490 }
 0xab5   :  { %v5730_v23 = vmul.f32 %v7491_v39, %v5729_v41 }
 0xab7   :  { %v5732_v56 = vadd.f32 %v5731_v17, %v5730_v23 }
 0xab9   :  { %v5735_v15 = vsel %vm1940_vm8, %v5732_v56, 0.0  ;;  %v5738_v26 = vsel %vm1940_vm8, %v5732_v56, %v9060_v21 }
 0xaba   :  { %5736 = vst [vmem:[%s9121_s18 + $0x8] sm:$0xff] %v5735_v15  ;;  %6235 = vst [vmem:[%s9122_s19 + $0x8] sm:$0xff] %v5738_v26 }
 0xabb   :  { %5750 = vsyncpa [#allocation5], 1 }
 0xabc   :  { %5751 = vsyncpa [#allocation7], 1 }
 0xabd   :  { %5752 = vsyncpa [#allocation10], 1 }
 0xabe   :  { %5753 = vsyncpa [#allocation13], 1 }

</bundles_post_ra>
